<compile_context>
chip_gen: v5e
topology: v5e:2x2
jax: 0.10.0
libtpu: 0.0.40
codegen_flags: <defaults>
</compile_context>

<pallas_src>
import functools
import numpy as np

import jax
import jax.numpy as jnp
from jax.experimental import pallas as pl
from jax.experimental.pallas import tpu as pltpu

BN_EPS = 1e-5


# ---------------------------------------------------------------------------
# Kernel 1: fused per-point MLP + global max-pool (channels on sublanes)
# ---------------------------------------------------------------------------
def _tnet_pointmlp_kernel(
    x_ref,                 # (1, d, tile)    bf16   point tile, NCW layout
    w1, b1, w2, b2, w3,    # weights (Cout, Cin) bf16, biases (Cout, 1) f32
    o_ref,                 # (1, 1024, 1)    f32    raw pooled max (pre bias3/relu)
    acc_ref,               # (1024, 128)     f32    scratch: lane-partial running max
):
    n = pl.program_id(1)

    @pl.when(n == 0)
    def _init():
        # Must stay -inf: layer-3 bias/ReLU are applied AFTER pooling.
        acc_ref[...] = jnp.full_like(acc_ref, -jnp.inf)

    xt = x_ref[0]                                                  # (d, tile)

    # Layers 1/2: matmul (f32 acc) + bias + ReLU + bf16 downcast in one pass.
    h1 = jnp.dot(w1[...], xt, preferred_element_type=jnp.float32) + b1[...]
    h1 = jnp.maximum(h1, 0.0).astype(jnp.bfloat16)                 # (64, tile)
    h2 = jnp.dot(w2[...], h1, preferred_element_type=jnp.float32) + b2[...]
    h2 = jnp.maximum(h2, 0.0).astype(jnp.bfloat16)                 # (128, tile)

    # Layer 3: raw matmul only (bias/ReLU hoisted past the max-pool).
    h3 = jnp.dot(w3[...], h2, preferred_element_type=jnp.float32)  # (1024, tile)

    # Lane-parallel partial max (pure vmax, no per-tile XLU reduction).
    part = acc_ref[...]
    for i in range(h3.shape[1] // 128):                            # static unroll
        part = jnp.maximum(part, h3[:, i * 128:(i + 1) * 128])
    acc_ref[...] = part

    # o_ref's block index is constant in n -> the block stays resident across
    # the point axis and is only written here; do not change the out index_map.
    @pl.when(n == pl.num_programs(1) - 1)
    def _finalize():
        o_ref[...] = jnp.max(acc_ref[...], axis=-1, keepdims=True)[None]


# ---------------------------------------------------------------------------
# Kernel 2: relu(pool + b3) + post-pool FC stack, batched over B (one step)
# ---------------------------------------------------------------------------
def _tnet_fc_kernel(p_ref, b3, wf1, bf1, wf2, bf2, wf3, bf3, o_ref):
    # Hoisted layer-3 epilogue: relu(max_n(x·W3) + b3) == max_n relu(x·W3 + b3).
    g = jnp.maximum(p_ref[...] + b3[...], 0.0).astype(jnp.bfloat16)     # (B, 1024)
    g = jnp.dot(g, wf1[...], preferred_element_type=jnp.float32) + bf1[...]
    g = jnp.maximum(g, 0.0).astype(jnp.bfloat16)                         # (B, 512)
    g = jnp.dot(g, wf2[...], preferred_element_type=jnp.float32) + bf2[...]
    g = jnp.maximum(g, 0.0).astype(jnp.bfloat16)                         # (B, 256)
    o_ref[...] = jnp.dot(g, wf3[...], preferred_element_type=jnp.float32) + bf3[...]


# ---------------------------------------------------------------------------
# Tiling helpers (generation aware)
# ---------------------------------------------------------------------------
def _round_up(x, m):
    return (x + m - 1) // m * m


def _vmem_capacity_bytes():
    try:
        return int(pltpu.get_tpu_info().vmem_capacity_bytes)
    except Exception:
        return 64 * 1024 * 1024  # conservative (v7x-sized) fallback


def _tiling(num_points, requested=None):
    """Point tile (multiple of 128), padded point count, and VMEM limit.

    Largest live intermediate per tile is the raw layer-3 output
    (1024, tile) f32 = 4 KiB * tile, so 2048-point tiles (~13 MiB total) fit
    v7x's 64 MiB VMEM under a 48 MiB cap and 4096-point tiles (~25 MiB) fit
    v5e/v6e's 128 MiB under a 96 MiB cap.
    """
    cap = _vmem_capacity_bytes()
    if cap >= (100 << 20):                    # v5e / v6e / v5p: 128 MiB VMEM
        default_tile, vmem_lim = 4096, 96 << 20
    else:                                     # v7x: 64 MiB VMEM per TensorCore
        default_tile, vmem_lim = 2048, 48 << 20
    req = default_tile if requested is None else requested
    req = max(128, (req // 128) * 128)
    tile = min(req, _round_up(num_points, 128))
    n_pad = _round_up(num_points, tile)
    return tile, n_pad, vmem_lim


def _resident_spec(shape):
    """Grid-independent full-array block -> DMA'd once, stays VMEM-resident."""
    zero = (0,) * len(shape)

    def idx(b, n):
        return zero

    return pl.BlockSpec(shape, idx)


def _single_spec(shape):
    zero = (0,) * len(shape)

    def idx(i):
        return zero

    return pl.BlockSpec(shape, idx)


# ---------------------------------------------------------------------------
# Forward pass
# ---------------------------------------------------------------------------
def tnet_forward(params, x_ncw, *, point_tile=None):
    """TNET forward.  x_ncw: (B, in_features, N) in PyTorch NCW layout.
    Returns (B, in_features, in_features)."""
    B, d, N = x_ncw.shape
    dd = d * d
    tile, n_pad, vmem_lim = _tiling(N, point_tile)

    # Edge-replicate padding on the point axis: duplicates of existing points
    # cannot change the global max, so padded tiles need no in-kernel masking.
    if n_pad != N:
        x_ncw = jnp.pad(x_ncw, ((0, 0), (0, 0), (0, n_pad - N)), mode="edge")
    x = x_ncw.astype(jnp.bfloat16)            # halves x HBM traffic

    w1, b1 = params["c1"]
    w2, b2 = params["c2"]
    w3, b3 = params["c3"]                      # b3 is a (1, 1024) row (hoisted)
    wf1, bf1 = params["f1"]
    wf2, bf2 = params["f2"]
    wf3, bf3 = params["f3"]

    # --- Kernel 1: per-point MLP + fused global max-pool ---------------------
    pooled = pl.pallas_call(
        _tnet_pointmlp_kernel,
        out_shape=jax.ShapeDtypeStruct((B, 1024, 1), jnp.float32),
        grid_spec=pltpu.PrefetchScalarGridSpec(
            num_scalar_prefetch=0,
            grid=(B, n_pad // tile),
            in_specs=[pl.BlockSpec((1, d, tile), lambda b, n: (b, 0, n))]
            + [_resident_spec(a.shape) for a in (w1, b1, w2, b2, w3)],
            out_specs=pl.BlockSpec((1, 1024, 1), lambda b, n: (b, 0, 0)),
            scratch_shapes=[pltpu.VMEM((1024, 128), jnp.float32)],
        ),
        compiler_params=pltpu.CompilerParams(
            # v7x note: megacore sharding happens on the batch axis, so keep
            # B >= 2 per chip to feed both TensorCores.
            dimension_semantics=("parallel", "arbitrary"),
            vmem_limit_bytes=vmem_lim,
        ),
    )(x, w1, b1, w2, b2, w3)

    pooled = pooled.reshape(B, 1024)           # layout-preserving (free) reshape

    # --- Kernel 2: hoisted layer-3 epilogue + batched post-pool FC stack -----
    out = pl.pallas_call(
        _tnet_fc_kernel,
        out_shape=jax.ShapeDtypeStruct((B, dd), jnp.float32),
        grid_spec=pltpu.PrefetchScalarGridSpec(
            num_scalar_prefetch=0,
            grid=(1,),
            in_specs=[_single_spec(pooled.shape)]
            + [_single_spec(a.shape) for a in (b3, wf1, bf1, wf2, bf2, wf3, bf3)],
            out_specs=pl.BlockSpec((B, dd), lambda i: (0, 0)),
        ),
        compiler_params=pltpu.CompilerParams(
            dimension_semantics=("arbitrary",),
        ),
    )(pooled, b3, wf1, bf1, wf2, bf2, wf3, bf3)

    return out.reshape(B, d, d)


# ---------------------------------------------------------------------------
# Deterministic parameter construction (synthetic, matches __init__ shapes/init)
# ---------------------------------------------------------------------------
def _fold_bn(w, b):
    """Eval-mode BatchNorm at init (mean 0, var 1, affine 1/0) -> scale 1/sqrt(1+eps)."""
    s = np.float32(1.0 / np.sqrt(1.0 + BN_EPS))
    return w * s, b * s


def make_conv_params(key, cin, cout):
    """Per-point conv layer, stored (C_out, C_in) for the W·X orientation."""
    kw, kb = jax.random.split(key)
    bound = 1.0 / np.sqrt(cin)
    w = jax.random.uniform(kw, (cout, cin), jnp.float32, -bound, bound)
    b = jax.random.uniform(kb, (cout,), jnp.float32, -bound, bound)
    w, b = _fold_bn(w, b)
    return w.astype(jnp.bfloat16), b.reshape(cout, 1).astype(jnp.float32)


def make_fc_params(key, cin, cout):
    """FC layer, stored (C_in, C_out) for the X·W orientation."""
    kw, kb = jax.random.split(key)
    bound = 1.0 / np.sqrt(cin)
    w = jax.random.uniform(kw, (cin, cout), jnp.float32, -bound, bound)
    b = jax.random.uniform(kb, (cout,), jnp.float32, -bound, bound)
    w, b = _fold_bn(w, b)
    return w.astype(jnp.bfloat16), b.reshape(1, cout).astype(jnp.float32)


def make_tnet_params(key, d):
    keys = jax.random.split(key, 6)
    c3_w, c3_b = make_conv_params(keys[2], 128, 1024)
    p = {
        "c1": make_conv_params(keys[0], d, 64),
        "c2": make_conv_params(keys[1], 64, 128),
        # Layer-3 bias is applied post-pool (hoisted) -> store it as a row.
        "c3": (c3_w, c3_b.reshape(1, 1024)),
        "f1": make_fc_params(keys[3], 1024, 512),
        "f2": make_fc_params(keys[4], 512, 256),
    }
    # Last layer: no norm / no relu.  TNET.init_weights():
    #   weight *= 1e-4; bias.fill_(1e-5); bias[arange(0, d*d-1, d+1)] = 1.0
    # arange's exclusive stop leaves the LAST diagonal entry at 1e-5 — this
    # intentionally reproduces the reference indexing bit-for-bit.
    bound = 1.0 / np.sqrt(256)
    w = jax.random.uniform(keys[5], (256, d * d), jnp.float32, -bound, bound) * 1e-4
    b = np.full((d * d,), 1e-5, dtype=np.float32)
    b[np.arange(0, d * d - 1, d + 1)] = 1.0
    p["f3"] = (w.astype(jnp.bfloat16), jnp.asarray(b).reshape(1, d * d))
    return p


# ---------------------------------------------------------------------------
# Pure-JAX reference (same folded-BN weights) for a correctness check
# ---------------------------------------------------------------------------
def tnet_reference(params, x_ncw):
    f32 = jnp.float32
    B, d, _ = x_ncw.shape
    x = x_ncw.astype(f32)

    w1, b1 = params["c1"]
    w2, b2 = params["c2"]
    w3, b3 = params["c3"]
    wf1, bf1 = params["f1"]
    wf2, bf2 = params["f2"]
    wf3, bf3 = params["f3"]

    def pconv(h, w, b):                         # per-point conv, b: (cout, 1)
        return jnp.maximum(jnp.einsum("oc,bcn->bon", w.astype(f32), h) + b[None], 0.0)

    h = pconv(x, w1, b1)
    h = pconv(h, w2, b2)
    # Reference applies bias+ReLU per point BEFORE the max (PyTorch order).
    h = jnp.maximum(jnp.einsum("oc,bcn->bon", w3.astype(f32), h)
                    + b3.astype(f32).reshape(1, -1, 1), 0.0)
    p = jnp.max(h, axis=-1)                     # global max-pool over points

    def fc(h, w, b, relu=True):
        y = jnp.dot(h, w.astype(f32)) + b
        return jnp.maximum(y, 0.0) if relu else y

    g = fc(p, wf1, bf1)
    g = fc(g, wf2, bf2)
    g = fc(g, wf3, bf3, relu=False)
    return g.reshape(B, d, d)


# ---------------------------------------------------------------------------
if __name__ == "__main__":
    key = jax.random.PRNGKey(0)
    k_param, k_x = jax.random.split(key)

    in_features = 3        # PointNet input-TNET (also works for the 64-d feature TNET)
    B, N = 2, 200          # N deliberately NOT a multiple of 128 -> exercises edge-padding

    params = make_tnet_params(k_param, in_features)
    x = jax.random.normal(k_x, (B, in_features, N), dtype=jnp.float32)

    # Forced small point-tile -> several point tiles per batch element plus a
    # padded last tile, exercising the fused running-max accumulator path.
    fwd_tiled = jax.jit(functools.partial(tnet_forward, point_tile=128))
    out_tiled = fwd_tiled(params, x)
    jax.block_until_ready(out_tiled)
    assert out_tiled.shape == (B, in_features, in_features), out_tiled.shape

    # Default (generation-aware) tiling: single point tile at this small N.
    fwd_auto = jax.jit(tnet_forward)
    out_auto = fwd_auto(params, x)
    jax.block_until_ready(out_auto)

    ref = jax.jit(tnet_reference)(params, x)
    jax.block_until_ready(ref)
    np.testing.assert_allclose(np.asarray(out_tiled), np.asarray(ref), rtol=2e-2, atol=2e-2)
    np.testing.assert_allclose(np.asarray(out_auto), np.asarray(ref), rtol=2e-2, atol=2e-2)

    print("KERNEL_OK")
</pallas_src>

<mosaic_0001>
module attributes {stable_mosaic.version = 11 : i64} {
  func.func @_tnet_fc_kernel(%arg0: i32, %arg1: memref<2x1024xf32, #tpu.memory_space<vmem>>, %arg2: memref<1x1024xf32, #tpu.memory_space<vmem>>, %arg3: memref<1024x512xbf16, #tpu.memory_space<vmem>>, %arg4: memref<1x512xf32, #tpu.memory_space<vmem>>, %arg5: memref<512x256xbf16, #tpu.memory_space<vmem>>, %arg6: memref<1x256xf32, #tpu.memory_space<vmem>>, %arg7: memref<256x9xbf16, #tpu.memory_space<vmem>>, %arg8: memref<1x9xf32, #tpu.memory_space<vmem>>, %arg9: memref<2x9xf32, #tpu.memory_space<vmem>>) attributes {dimension_semantics = [#tpu.dimension_semantics<arbitrary>], iteration_bounds = array<i64: 1>, scalar_prefetch = 0 : i64, scratch_operands = 0 : i64, tpu.core_type = #tpu.core_type<tc>, window_params = [{pipeline_mode = #tpu.pipeline_mode<synchronous>, transform_indices = @transform_0, window_bounds = array<i64: 2, 1024>}, {pipeline_mode = #tpu.pipeline_mode<synchronous>, transform_indices = @transform_1, window_bounds = array<i64: 1, 1024>}, {pipeline_mode = #tpu.pipeline_mode<synchronous>, transform_indices = @transform_2, window_bounds = array<i64: 1024, 512>}, {pipeline_mode = #tpu.pipeline_mode<synchronous>, transform_indices = @transform_3, window_bounds = array<i64: 1, 512>}, {pipeline_mode = #tpu.pipeline_mode<synchronous>, transform_indices = @transform_4, window_bounds = array<i64: 512, 256>}, {pipeline_mode = #tpu.pipeline_mode<synchronous>, transform_indices = @transform_5, window_bounds = array<i64: 1, 256>}, {pipeline_mode = #tpu.pipeline_mode<synchronous>, transform_indices = @transform_6, window_bounds = array<i64: 256, 9>}, {pipeline_mode = #tpu.pipeline_mode<synchronous>, transform_indices = @transform_7, window_bounds = array<i64: 1, 9>}, {pipeline_mode = #tpu.pipeline_mode<synchronous>, transform_indices = @transform_8, window_bounds = array<i64: 2, 9>}]} {
    %c0 = arith.constant 0 : index
    %c0_0 = arith.constant 0 : index
    %0 = vector.load %arg1[%c0, %c0_0] : memref<2x1024xf32, #tpu.memory_space<vmem>>, vector<2x1024xf32>
    %c0_1 = arith.constant 0 : index
    %c0_2 = arith.constant 0 : index
    %1 = vector.load %arg2[%c0_1, %c0_2] : memref<1x1024xf32, #tpu.memory_space<vmem>>, vector<1x1024xf32>
    %2 = vector.broadcast %1 : vector<1x1024xf32> to vector<2x1024xf32>
    %3 = arith.addf %0, %2 : vector<2x1024xf32>
    %cst = arith.constant 0.000000e+00 : f32
    %4 = vector.broadcast %cst : f32 to vector<2x1024xf32>
    %5 = arith.maximumf %3, %4 : vector<2x1024xf32>
    %6 = arith.truncf %5 : vector<2x1024xf32> to vector<2x1024xbf16>
    %c0_3 = arith.constant 0 : index
    %c0_4 = arith.constant 0 : index
    %7 = vector.load %arg3[%c0_3, %c0_4] : memref<1024x512xbf16, #tpu.memory_space<vmem>>, vector<1024x512xbf16>
    %cst_5 = arith.constant dense<0.000000e+00> : vector<2x512xf32>
    %8 = tpu.matmul %6, %7, %cst_5 {dimension_numbers = #tpu.dot_dimension_numbers<[1], [0], [0], [1], [0, 0, 1, 1], [], []>} : vector<2x1024xbf16>, vector<1024x512xbf16>, vector<2x512xf32> -> vector<2x512xf32>
    %c0_6 = arith.constant 0 : index
    %c0_7 = arith.constant 0 : index
    %9 = vector.load %arg4[%c0_6, %c0_7] : memref<1x512xf32, #tpu.memory_space<vmem>>, vector<1x512xf32>
    %10 = vector.broadcast %9 : vector<1x512xf32> to vector<2x512xf32>
    %11 = arith.addf %8, %10 : vector<2x512xf32>
    %cst_8 = arith.constant 0.000000e+00 : f32
    %12 = vector.broadcast %cst_8 : f32 to vector<2x512xf32>
    %13 = arith.maximumf %11, %12 : vector<2x512xf32>
    %14 = arith.truncf %13 : vector<2x512xf32> to vector<2x512xbf16>
    %c0_9 = arith.constant 0 : index
    %c0_10 = arith.constant 0 : index
    %15 = vector.load %arg5[%c0_9, %c0_10] : memref<512x256xbf16, #tpu.memory_space<vmem>>, vector<512x256xbf16>
    %cst_11 = arith.constant dense<0.000000e+00> : vector<2x256xf32>
    %16 = tpu.matmul %14, %15, %cst_11 {dimension_numbers = #tpu.dot_dimension_numbers<[1], [0], [0], [1], [0, 0, 1, 1], [], []>} : vector<2x512xbf16>, vector<512x256xbf16>, vector<2x256xf32> -> vector<2x256xf32>
    %c0_12 = arith.constant 0 : index
    %c0_13 = arith.constant 0 : index
    %17 = vector.load %arg6[%c0_12, %c0_13] : memref<1x256xf32, #tpu.memory_space<vmem>>, vector<1x256xf32>
    %18 = vector.broadcast %17 : vector<1x256xf32> to vector<2x256xf32>
    %19 = arith.addf %16, %18 : vector<2x256xf32>
    %cst_14 = arith.constant 0.000000e+00 : f32
    %20 = vector.broadcast %cst_14 : f32 to vector<2x256xf32>
    %21 = arith.maximumf %19, %20 : vector<2x256xf32>
    %22 = arith.truncf %21 : vector<2x256xf32> to vector<2x256xbf16>
    %c0_15 = arith.constant 0 : index
    %c0_16 = arith.constant 0 : index
    %23 = vector.load %arg7[%c0_15, %c0_16] : memref<256x9xbf16, #tpu.memory_space<vmem>>, vector<256x9xbf16>
    %cst_17 = arith.constant dense<0.000000e+00> : vector<2x9xf32>
    %24 = tpu.matmul %22, %23, %cst_17 {dimension_numbers = #tpu.dot_dimension_numbers<[1], [0], [0], [1], [0, 0, 1, 1], [], []>} : vector<2x256xbf16>, vector<256x9xbf16>, vector<2x9xf32> -> vector<2x9xf32>
    %c0_18 = arith.constant 0 : index
    %c0_19 = arith.constant 0 : index
    %25 = vector.load %arg8[%c0_18, %c0_19] : memref<1x9xf32, #tpu.memory_space<vmem>>, vector<1x9xf32>
    %26 = vector.broadcast %25 : vector<1x9xf32> to vector<2x9xf32>
    %27 = arith.addf %24, %26 : vector<2x9xf32>
    %c0_20 = arith.constant 0 : index
    %c0_21 = arith.constant 0 : index
    %28 = vector.load %arg9[%c0_20, %c0_21] : memref<2x9xf32, #tpu.memory_space<vmem>>, vector<2x9xf32>
    tpu.vector_store %arg9[%c0_20, %c0_21], %27 {strides = array<i32>} : memref<2x9xf32, #tpu.memory_space<vmem>>, vector<2x9xf32>,
    return
  }
  func.func @transform_0(%arg0: i32) -> (i32, i32) {
    %c0_i32 = arith.constant 0 : i32
    %c0_i32_0 = arith.constant 0 : i32
    %c0_i32_1 = arith.constant 0 : i32
    return %c0_i32, %c0_i32_0 : i32, i32
  }
  func.func @transform_1(%arg0: i32) -> (i32, i32) {
    %c0_i32 = arith.constant 0 : i32
    %c0_i32_0 = arith.constant 0 : i32
    %c0_i32_1 = arith.constant 0 : i32
    return %c0_i32, %c0_i32_0 : i32, i32
  }
  func.func @transform_2(%arg0: i32) -> (i32, i32) {
    %c0_i32 = arith.constant 0 : i32
    %c0_i32_0 = arith.constant 0 : i32
    %c0_i32_1 = arith.constant 0 : i32
    return %c0_i32, %c0_i32_0 : i32, i32
  }
  func.func @transform_3(%arg0: i32) -> (i32, i32) {
    %c0_i32 = arith.constant 0 : i32
    %c0_i32_0 = arith.constant 0 : i32
    %c0_i32_1 = arith.constant 0 : i32
    return %c0_i32, %c0_i32_0 : i32, i32
  }
  func.func @transform_4(%arg0: i32) -> (i32, i32) {
    %c0_i32 = arith.constant 0 : i32
    %c0_i32_0 = arith.constant 0 : i32
    %c0_i32_1 = arith.constant 0 : i32
    return %c0_i32, %c0_i32_0 : i32, i32
  }
  func.func @transform_5(%arg0: i32) -> (i32, i32) {
    %c0_i32 = arith.constant 0 : i32
    %c0_i32_0 = arith.constant 0 : i32
    %c0_i32_1 = arith.constant 0 : i32
    return %c0_i32, %c0_i32_0 : i32, i32
  }
  func.func @transform_6(%arg0: i32) -> (i32, i32) {
    %c0_i32 = arith.constant 0 : i32
    %c0_i32_0 = arith.constant 0 : i32
    %c0_i32_1 = arith.constant 0 : i32
    return %c0_i32, %c0_i32_0 : i32, i32
  }
  func.func @transform_7(%arg0: i32) -> (i32, i32) {
    %c0_i32 = arith.constant 0 : i32
    %c0_i32_0 = arith.constant 0 : i32
    %c0_i32_1 = arith.constant 0 : i32
    return %c0_i32, %c0_i32_0 : i32, i32
  }
  func.func @transform_8(%arg0: i32) -> (i32, i32) {
    %c0_i32 = arith.constant 0 : i32
    %c0_i32_0 = arith.constant 0 : i32
    %c0_i32_1 = arith.constant 0 : i32
    return %c0_i32, %c0_i32_0 : i32, i32
  }
}

module attributes {stable_mosaic.version = 11 : i64} {
  func.func @_tnet_pointmlp_kernel(%arg0: i32, %arg1: i32, %arg2: memref<1x3x128xbf16, #tpu.memory_space<vmem>>, %arg3: memref<64x3xbf16, #tpu.memory_space<vmem>>, %arg4: memref<64x1xf32, #tpu.memory_space<vmem>>, %arg5: memref<128x64xbf16, #tpu.memory_space<vmem>>, %arg6: memref<128x1xf32, #tpu.memory_space<vmem>>, %arg7: memref<1024x128xbf16, #tpu.memory_space<vmem>>, %arg8: memref<1x1024x1xf32, #tpu.memory_space<vmem>>, %arg9: memref<1024x128xf32, #tpu.memory_space<vmem>>) attributes {dimension_semantics = [#tpu.dimension_semantics<parallel>, #tpu.dimension_semantics<arbitrary>], iteration_bounds = array<i64: 2, 2>, scalar_prefetch = 0 : i64, scratch_operands = 1 : i64, tpu.core_type = #tpu.core_type<tc>, window_params = [{transform_indices = @transform_0, window_bounds = array<i64: 1, 3, 128>}, {pipeline_mode = #tpu.pipeline_mode<synchronous>, transform_indices = @transform_1, window_bounds = array<i64: 64, 3>}, {pipeline_mode = #tpu.pipeline_mode<synchronous>, transform_indices = @transform_2, window_bounds = array<i64: 64, 1>}, {pipeline_mode = #tpu.pipeline_mode<synchronous>, transform_indices = @transform_3, window_bounds = array<i64: 128, 64>}, {pipeline_mode = #tpu.pipeline_mode<synchronous>, transform_indices = @transform_4, window_bounds = array<i64: 128, 1>}, {pipeline_mode = #tpu.pipeline_mode<synchronous>, transform_indices = @transform_5, window_bounds = array<i64: 1024, 128>}, {transform_indices = @transform_6, window_bounds = array<i64: 1, 1024, 1>}]} {
    %c0_i32 = arith.constant 0 : i32
    %0 = arith.cmpi eq, %arg1, %c0_i32 : i32
    %1 = arith.extui %0 : i1 to i32
    %c0_i32_0 = arith.constant 0 : i32
    %2 = arith.cmpi ne, %1, %c0_i32_0 : i32
    scf.if %2 {
      %cst_22 = arith.constant 0xFF800000 : f32
      %29 = vector.broadcast %cst_22 : f32 to vector<1024x128xf32>
      %c0_23 = arith.constant 0 : index
      %c0_24 = arith.constant 0 : index
      %30 = vector.load %arg9[%c0_23, %c0_24] : memref<1024x128xf32, #tpu.memory_space<vmem>>, vector<1024x128xf32>
      tpu.vector_store %arg9[%c0_23, %c0_24], %29 {strides = array<i32>} : memref<1024x128xf32, #tpu.memory_space<vmem>>, vector<1024x128xf32>,
    } else {
    }
    %c0 = arith.constant 0 : index
    %c0_1 = arith.constant 0 : index
    %c0_2 = arith.constant 0 : index
    %3 = vector.load %arg2[%c0, %c0_1, %c0_2] : memref<1x3x128xbf16, #tpu.memory_space<vmem>>, vector<1x3x128xbf16>
    %4 = vector.shape_cast %3 : vector<1x3x128xbf16> to vector<3x128xbf16>
    %c0_3 = arith.constant 0 : index
    %c0_4 = arith.constant 0 : index
    %5 = vector.load %arg3[%c0_3, %c0_4] : memref<64x3xbf16, #tpu.memory_space<vmem>>, vector<64x3xbf16>
    %cst = arith.constant dense<0.000000e+00> : vector<64x128xf32>
    %6 = tpu.matmul %5, %4, %cst {dimension_numbers = #tpu.dot_dimension_numbers<[1], [0], [0], [1], [0, 0, 1, 1], [], []>} : vector<64x3xbf16>, vector<3x128xbf16>, vector<64x128xf32> -> vector<64x128xf32>
    %c0_5 = arith.constant 0 : index
    %c0_6 = arith.constant 0 : index
    %7 = vector.load %arg4[%c0_5, %c0_6] : memref<64x1xf32, #tpu.memory_space<vmem>>, vector<64x1xf32>
    %8 = vector.broadcast %7 : vector<64x1xf32> to vector<64x128xf32>
    %9 = arith.addf %6, %8 : vector<64x128xf32>
    %cst_7 = arith.constant 0.000000e+00 : f32
    %10 = vector.broadcast %cst_7 : f32 to vector<64x128xf32>
    %11 = arith.maximumf %9, %10 : vector<64x128xf32>
    %12 = arith.truncf %11 : vector<64x128xf32> to vector<64x128xbf16>
    %c0_8 = arith.constant 0 : index
    %c0_9 = arith.constant 0 : index
    %13 = vector.load %arg5[%c0_8, %c0_9] : memref<128x64xbf16, #tpu.memory_space<vmem>>, vector<128x64xbf16>
    %cst_10 = arith.constant dense<0.000000e+00> : vector<128x128xf32>
    %14 = tpu.matmul %13, %12, %cst_10 {dimension_numbers = #tpu.dot_dimension_numbers<[1], [0], [0], [1], [0, 0, 1, 1], [], []>} : vector<128x64xbf16>, vector<64x128xbf16>, vector<128x128xf32> -> vector<128x128xf32>
    %c0_11 = arith.constant 0 : index
    %c0_12 = arith.constant 0 : index
    %15 = vector.load %arg6[%c0_11, %c0_12] : memref<128x1xf32, #tpu.memory_space<vmem>>, vector<128x1xf32>
    %16 = vector.broadcast %15 : vector<128x1xf32> to vector<128x128xf32>
    %17 = arith.addf %14, %16 : vector<128x128xf32>
    %cst_13 = arith.constant 0.000000e+00 : f32
    %18 = vector.broadcast %cst_13 : f32 to vector<128x128xf32>
    %19 = arith.maximumf %17, %18 : vector<128x128xf32>
    %20 = arith.truncf %19 : vector<128x128xf32> to vector<128x128xbf16>
    %c0_14 = arith.constant 0 : index
    %c0_15 = arith.constant 0 : index
    %21 = vector.load %arg7[%c0_14, %c0_15] : memref<1024x128xbf16, #tpu.memory_space<vmem>>, vector<1024x128xbf16>
    %cst_16 = arith.constant dense<0.000000e+00> : vector<1024x128xf32>
    %22 = tpu.matmul %21, %20, %cst_16 {dimension_numbers = #tpu.dot_dimension_numbers<[1], [0], [0], [1], [0, 0, 1, 1], [], []>} : vector<1024x128xbf16>, vector<128x128xbf16>, vector<1024x128xf32> -> vector<1024x128xf32>
    %c0_17 = arith.constant 0 : index
    %c0_18 = arith.constant 0 : index
    %23 = vector.load %arg9[%c0_17, %c0_18] : memref<1024x128xf32, #tpu.memory_space<vmem>>, vector<1024x128xf32>
    %24 = arith.maximumf %23, %22 : vector<1024x128xf32>
    %c0_19 = arith.constant 0 : index
    %c0_20 = arith.constant 0 : index
    %25 = vector.load %arg9[%c0_19, %c0_20] : memref<1024x128xf32, #tpu.memory_space<vmem>>, vector<1024x128xf32>
    tpu.vector_store %arg9[%c0_19, %c0_20], %24 {strides = array<i32>} : memref<1024x128xf32, #tpu.memory_space<vmem>>, vector<1024x128xf32>,
    %c1_i32 = arith.constant 1 : i32
    %26 = arith.cmpi eq, %arg1, %c1_i32 : i32
    %27 = arith.extui %26 : i1 to i32
    %c0_i32_21 = arith.constant 0 : i32
    %28 = arith.cmpi ne, %27, %c0_i32_21 : i32
    scf.if %28 {
      %c0_22 = arith.constant 0 : index
      %c0_23 = arith.constant 0 : index
      %29 = vector.load %arg9[%c0_22, %c0_23] : memref<1024x128xf32, #tpu.memory_space<vmem>>, vector<1024x128xf32>
      %cst_24 = arith.constant dense<0xFF800000> : vector<1024xf32>
      %30 = vector.multi_reduction <maximumf>, %29, %cst_24 [1] : vector<1024x128xf32> to vector<1024xf32>
      %31 = vector.shape_cast %30 : vector<1024xf32> to vector<1024x1xf32>
      %32 = vector.shape_cast %31 : vector<1024x1xf32> to vector<1x1024x1xf32>
      %c0_25 = arith.constant 0 : index
      %c0_26 = arith.constant 0 : index
      %c0_27 = arith.constant 0 : index
      %33 = vector.load %arg8[%c0_25, %c0_26, %c0_27] : memref<1x1024x1xf32, #tpu.memory_space<vmem>>, vector<1x1024x1xf32>
      tpu.vector_store %arg8[%c0_25, %c0_26, %c0_27], %32 {strides = array<i32>} : memref<1x1024x1xf32, #tpu.memory_space<vmem>>, vector<1x1024x1xf32>,
    } else {
    }
    return
  }
  func.func @transform_0(%arg0: i32, %arg1: i32) -> (i32, i32, i32) {
    %c0_i32 = arith.constant 0 : i32
    %c0_i32_0 = arith.constant 0 : i32
    return %arg0, %c0_i32, %arg1 : i32, i32, i32
  }
  func.func @transform_1(%arg0: i32, %arg1: i32) -> (i32, i32) {
    %c0_i32 = arith.constant 0 : i32
    %c0_i32_0 = arith.constant 0 : i32
    %c0_i32_1 = arith.constant 0 : i32
    return %c0_i32, %c0_i32_0 : i32, i32
  }
  func.func @transform_2(%arg0: i32, %arg1: i32) -> (i32, i32) {
    %c0_i32 = arith.constant 0 : i32
    %c0_i32_0 = arith.constant 0 : i32
    %c0_i32_1 = arith.constant 0 : i32
    return %c0_i32, %c0_i32_0 : i32, i32
  }
  func.func @transform_3(%arg0: i32, %arg1: i32) -> (i32, i32) {
    %c0_i32 = arith.constant 0 : i32
    %c0_i32_0 = arith.constant 0 : i32
    %c0_i32_1 = arith.constant 0 : i32
    return %c0_i32, %c0_i32_0 : i32, i32
  }
  func.func @transform_4(%arg0: i32, %arg1: i32) -> (i32, i32) {
    %c0_i32 = arith.constant 0 : i32
    %c0_i32_0 = arith.constant 0 : i32
    %c0_i32_1 = arith.constant 0 : i32
    return %c0_i32, %c0_i32_0 : i32, i32
  }
  func.func @transform_5(%arg0: i32, %arg1: i32) -> (i32, i32) {
    %c0_i32 = arith.constant 0 : i32
    %c0_i32_0 = arith.constant 0 : i32
    %c0_i32_1 = arith.constant 0 : i32
    return %c0_i32, %c0_i32_0 : i32, i32
  }
  func.func @transform_6(%arg0: i32, %arg1: i32) -> (i32, i32, i32) {
    %c0_i32 = arith.constant 0 : i32
    %c0_i32_0 = arith.constant 0 : i32
    %c0_i32_1 = arith.constant 0 : i32
    return %arg0, %c0_i32, %c0_i32_0 : i32, i32, i32
  }
}

</mosaic_0001>

<bundles_post_ra>
// kernel: tnet_forward.2
= control target key start
LH: loop header
LB: loop body
LE: loop exit
PB: predicated region body
PF: predicated region fallthrough
CT: control target
= control target key end

     0   :  { %11 = vsyncpa [#allocation4], 0  ;;  %s3247_s21 = smov 0   ;;  %s3249_s22 = smov 0   ;;  %s3843_s0 = inlined_call_operand.vmem [shape: bf16[2,3,256], index: 0, kind: input, shape index: {}]   ;;  %s3844_s1 = inlined_call_operand.vmem [shape: bf16[64,3], index: 1, kind: input, shape index: {}]   ;;  %s3845_s2 = inlined_call_operand.vmem [shape: f32[64,1], index: 2, kind: input, shape index: {}]   ;;  %s3846_s3 = inlined_call_operand.vmem [shape: bf16[128,64], index: 3, kind: input, shape index: {}]   ;;  %s3847_s4 = inlined_call_operand.vmem [shape: f32[128,1], index: 4, kind: input, shape index: {}]   ;;  %s3848_s5 = inlined_call_operand.hbm [shape: bf16[1024,128], index: 5, kind: input, shape index: {}]   ;;  %s3849_s6 = inlined_call_operand.vmem [shape: f32[2,1024,1], index: 6, kind: output, shape index: {}]  }
   0x1   :  { %s3251_s23 = smov 0   ;;  %s3253_s24 = smov 0  }
   0x2   :  { %s3255_s25 = smov 0  }
   0x3 LB: > { %s2640_s26 = sadd.s32 4294967295, %s3204_s25   ;;  %s26_s27 = sadd.s32 1, %s3196_s23  ;;  %s3204_s25 = sphi %s3255_s25, %s17_s25   ;;  %s3200_s24 = sphi %s3253_s24, %s3855_s24   ;;  %s3196_s23 = sphi %s3251_s23, %s3854_s23   ;;  %s3192_s22 = sphi %s3249_s22, %s3853_s22   ;;  %s3188_s21 = sphi %s3247_s21, %s3852_s21  }
   0x4   : > { %p27_p0 = scmp.ge.s32.totalorder %s26_s27, 2  ;;  %s29_s28 = sadd.s32 1, %s3200_s24 }
   0x5   : > { %p2642_p1 = scmp.ge.s32.totalorder %s3204_s25, 1  ;;  %p193_p2 = scmp.lt.s32.totalorder %s3204_s25, 5 }
   0x6   : > { %s3857_s27 = smov (%p27_p0, %s26_s27), 0  ;;  %s3859_s28 = smov (!%p27_p0, %s29_s28), %s3200_s24 }
   0x7   : > { %p3280_p3 = pnand %p2642_p1, %p193_p2  ;;  %p31_p4 = scmp.ge.s32.totalorder %s3859_s28, 2 }
   0x8   : > { %p3284_p5 = scmp.eq.s32.totalorder %s2640_s26, 0  ;;  %s216_s9 = sshll.u32 %s3848_s5, 4  ;;  %s217_s9 = int_to_ptr.hbm [resolvable:$true] %s216_s9 }
   0x9   : > { %p3077_p6 = pneg %p3280_p3  ;;  %s3861_s28 = smov (%p31_p4, %s3859_s28), 0 }
   0xa   : > { %s3206_s10 = smov [#allocation3]   ;;  %s3207_s12 = smov 64  }
   0xb   : > { %s218_s11 = sshll.u32 %s3206_s10, 4  ;;  %p3078_p7 = pnand %p3284_p5, %p3077_p6  ;;  %s219_s11 = int_to_ptr.vmem [resolvable:$true] %s218_s11 }
   0xc   : > { %s3208_s13 = smov 4   ;;  %245 = sbr.rel (%p3280_p3) target bundleno = 1508 (0x5e4), region = 44 }
   0xd   : > { %3080 = dma.hbm_to_vmem [thread:$0]  (!%p3078_p7), %s217_s9, 8192, %s219_s11, [#allocation4], %s3207_s12, %s3207_s12, %s3208_s13  }
  0x11   : > { %3183 = dma.done.wait (%p3284_p5), [#allocation4], 8192  }
  0x12   : > { %3185 = vsyncadd (%p3284_p5), [#allocation4], 4294959104  ;;  %p279_p8 = scmp.lt.s32.totalorder %s3192_s22, 1  ;;  %p281_p9 = scmp.lt.s32.totalorder %s3188_s21, 1 }
  0x13   : > { %p2651_p10 = scmp.ne.s32.totalorder %s3188_s21, 0 }
  0x14   : > { %s3863_s22 = smov (!%p279_p8, %s3192_s22), 1 }
  0x15   : > { %s282_s14 = scalar_select %p281_p9, %s3188_s21, 1 }
  0x16   : > { %s2647_s15 = sshll.u32 %s3863_s22, 1  ;;  %s2971_s16 = sshll.u32 %s3863_s22, 10 }
  0x17   : > { %s284_s17 = sadd.s32 %s2647_s15, %s282_s14  ;;  %s3310_s20 = scalar_lea.vmem %s3849_s6, %s2971_s16 }
  0x18   : > { %s2648_s26 = sshll.u32 %s284_s17, 1  ;;  %296 = sbr.rel (%p2651_p10) target bundleno = 158 (0x9e), region = 52 }
  0x19   : > { %s3315_s7 = scalar_lea.vmem %s3843_s0, %s2648_s26 }
  0x1d   : > { %v3209_v0 = vmov -inf  }
  0x1e   : > { %297 = vst [vmem:[#allocation2 + $0x2b0] sm:$0xff] %v3209_v0 }
  0x1f   : > { %298 = vst [vmem:[#allocation2 + $0x3b0] sm:$0xff] %v3209_v0 }
  0x20   : > { %299 = vst [vmem:[#allocation2 + $0xd8] sm:$0xff] %v3209_v0 }
  0x21   : > { %300 = vst [vmem:[#allocation2 + $0x18] sm:$0xff] %v3209_v0 }
  0x22   : > { %301 = vst [vmem:[#allocation2 + $0x50] sm:$0xff] %v3209_v0 }
  0x23   : > { %302 = vst [vmem:[#allocation2 + $0x368] sm:$0xff] %v3209_v0 }
  0x24   : > { %303 = vst [vmem:[#allocation2 + $0x330] sm:$0xff] %v3209_v0 }
  0x25   : > { %304 = vst [vmem:[#allocation2 + $0x48] sm:$0xff] %v3209_v0 }
  0x26   : > { %305 = vst [vmem:[#allocation2 + $0x380] sm:$0xff] %v3209_v0 }
  0x27   : > { %306 = vst [vmem:[#allocation2 + $0x110] sm:$0xff] %v3209_v0 }
  0x28   : > { %307 = vst [vmem:[#allocation2 + $0x118] sm:$0xff] %v3209_v0 }
  0x29   : > { %308 = vst [vmem:[#allocation2 + $0x98] sm:$0xff] %v3209_v0 }
  0x2a   : > { %309 = vst [vmem:[#allocation2 + $0x320] sm:$0xff] %v3209_v0 }
  0x2b   : > { %310 = vst [vmem:[#allocation2 + $0x150] sm:$0xff] %v3209_v0 }
  0x2c   : > { %311 = vst [vmem:[#allocation2 + $0x108] sm:$0xff] %v3209_v0 }
  0x2d   : > { %312 = vst [vmem:[#allocation2 + $0x60] sm:$0xff] %v3209_v0 }
  0x2e   : > { %313 = vst [vmem:[#allocation2 + $0x2e0] sm:$0xff] %v3209_v0 }
  0x2f   : > { %314 = vst [vmem:[#allocation2 + $0x388] sm:$0xff] %v3209_v0 }
  0x30   : > { %315 = vst [vmem:[#allocation2 + $0x338] sm:$0xff] %v3209_v0 }
  0x31   : > { %316 = vst [vmem:[#allocation2 + $0x340] sm:$0xff] %v3209_v0 }
  0x32   : > { %317 = vst [vmem:[#allocation2 + $0x80] sm:$0xff] %v3209_v0 }
  0x33   : > { %318 = vst [vmem:[#allocation2 + $0x1a8] sm:$0xff] %v3209_v0 }
  0x34   : > { %319 = vst [vmem:[#allocation2 + $0x1b8] sm:$0xff] %v3209_v0 }
  0x35   : > { %320 = vst [vmem:[#allocation2 + $0x168] sm:$0xff] %v3209_v0 }
  0x36   : > { %321 = vst [vmem:[#allocation2 + $0x3e8] sm:$0xff] %v3209_v0 }
  0x37   : > { %322 = vst [vmem:[#allocation2 + $0x2f8] sm:$0xff] %v3209_v0 }
  0x38   : > { %323 = vst [vmem:[#allocation2 + $0x290] sm:$0xff] %v3209_v0 }
  0x39   : > { %324 = vst [vmem:[#allocation2 + $0x28] sm:$0xff] %v3209_v0 }
  0x3a   : > { %325 = vst [vmem:[#allocation2 + $0x138] sm:$0xff] %v3209_v0 }
  0x3b   : > { %326 = vst [vmem:[#allocation2 + $0xc0] sm:$0xff] %v3209_v0 }
  0x3c   : > { %327 = vst [vmem:[#allocation2 + $0x1c0] sm:$0xff] %v3209_v0 }
  0x3d   : > { %328 = vst [vmem:[#allocation2 + $0x280] sm:$0xff] %v3209_v0 }
  0x3e   : > { %329 = vst [vmem:[#allocation2 + $0x100] sm:$0xff] %v3209_v0 }
  0x3f   : > { %330 = vst [vmem:[#allocation2 + $0x3c0] sm:$0xff] %v3209_v0 }
  0x40   : > { %331 = vst [vmem:[#allocation2 + $0x158] sm:$0xff] %v3209_v0 }
  0x41   : > { %332 = vst [vmem:[#allocation2 + $0x3e0] sm:$0xff] %v3209_v0 }
  0x42   : > { %333 = vst [vmem:[#allocation2 + $0x218] sm:$0xff] %v3209_v0 }
  0x43   : > { %334 = vst [vmem:[#allocation2 + $0x3f8] sm:$0xff] %v3209_v0 }
  0x44   : > { %335 = vst [vmem:[#allocation2 + $0x8] sm:$0xff] %v3209_v0 }
  0x45   : > { %336 = vst [vmem:[#allocation2 + $0x128] sm:$0xff] %v3209_v0 }
  0x46   : > { %337 = vst [vmem:[#allocation2 + $0x2a0] sm:$0xff] %v3209_v0 }
  0x47   : > { %338 = vst [vmem:[#allocation2 + $0x3f0] sm:$0xff] %v3209_v0 }
  0x48   : > { %339 = vst [vmem:[#allocation2 + $0xa0] sm:$0xff] %v3209_v0 }
  0x49   : > { %340 = vst [vmem:[#allocation2 + $0x2c0] sm:$0xff] %v3209_v0 }
  0x4a   : > { %341 = vst [vmem:[#allocation2 + $0xb0] sm:$0xff] %v3209_v0 }
  0x4b   : > { %342 = vst [vmem:[#allocation2 + $0x1e0] sm:$0xff] %v3209_v0 }
  0x4c   : > { %343 = vst [vmem:[#allocation2 + $0x1f0] sm:$0xff] %v3209_v0 }
  0x4d   : > { %344 = vst [vmem:[#allocation2 + $0x10] sm:$0xff] %v3209_v0 }
  0x4e   : > { %345 = vst [vmem:[#allocation2 + $0x230] sm:$0xff] %v3209_v0 }
  0x4f   : > { %346 = vst [vmem:[#allocation2 + $0x240] sm:$0xff] %v3209_v0 }
  0x50   : > { %347 = vst [vmem:[#allocation2 + $0x90] sm:$0xff] %v3209_v0 }
  0x51   : > { %348 = vst [vmem:[#allocation2 + $0x3a0] sm:$0xff] %v3209_v0 }
  0x52   : > { %349 = vst [vmem:[#allocation2 + $0x208] sm:$0xff] %v3209_v0 }
  0x53   : > { %350 = vst [vmem:[#allocation2 + $0xd0] sm:$0xff] %v3209_v0 }
  0x54   : > { %351 = vst [vmem:[#allocation2 + $0x88] sm:$0xff] %v3209_v0 }
  0x55   : > { %352 = vst [vmem:[#allocation2 + $0x2f0] sm:$0xff] %v3209_v0 }
  0x56   : > { %353 = vst [vmem:[#allocation2 + $0x358] sm:$0xff] %v3209_v0 }
  0x57   : > { %354 = vst [vmem:[#allocation2 + $0x268] sm:$0xff] %v3209_v0 }
  0x58   : > { %355 = vst [vmem:[#allocation2 + $0x350] sm:$0xff] %v3209_v0 }
  0x59   : > { %356 = vst [vmem:[#allocation2 + $0x188] sm:$0xff] %v3209_v0 }
  0x5a   : > { %357 = vst [vmem:[#allocation2 + $0x1d8] sm:$0xff] %v3209_v0 }
  0x5b   : > { %358 = vst [vmem:[#allocation2 + $0x30] sm:$0xff] %v3209_v0 }
  0x5c   : > { %359 = vst [vmem:[#allocation2 + $0x140] sm:$0xff] %v3209_v0 }
  0x5d   : > { %360 = vst [vmem:[#allocation2 + $0x2a8] sm:$0xff] %v3209_v0 }
  0x5e   : > { %361 = vst [vmem:[#allocation2 + $0x130] sm:$0xff] %v3209_v0 }
  0x5f   : > { %362 = vst [vmem:[#allocation2 + $0x200] sm:$0xff] %v3209_v0 }
  0x60   : > { %363 = vst [vmem:[#allocation2 + $0x318] sm:$0xff] %v3209_v0 }
  0x61   : > { %364 = vst [vmem:[#allocation2 + $0x220] sm:$0xff] %v3209_v0 }
  0x62   : > { %365 = vst [vmem:[#allocation2 + $0x70] sm:$0xff] %v3209_v0 }
  0x63   : > { %366 = vst [vmem:[#allocation2 + $0x300] sm:$0xff] %v3209_v0 }
  0x64   : > { %367 = vst [vmem:[#allocation2 + $0xe0] sm:$0xff] %v3209_v0 }
  0x65   : > { %368 = vst [vmem:[#allocation2 + $0x178] sm:$0xff] %v3209_v0 }
  0x66   : > { %369 = vst [vmem:[#allocation2 + $0x328] sm:$0xff] %v3209_v0 }
  0x67   : > { %370 = vst [vmem:[#allocation2 + $0x260] sm:$0xff] %v3209_v0 }
  0x68   : > { %371 = vst [vmem:[#allocation2 + $0x3b8] sm:$0xff] %v3209_v0 }
  0x69   : > { %372 = vst [vmem:[#allocation2 + $0x2b8] sm:$0xff] %v3209_v0 }
  0x6a   : > { %373 = vst [vmem:[#allocation2 + $0x248] sm:$0xff] %v3209_v0 }
  0x6b   : > { %374 = vst [vmem:[#allocation2 + $0x40] sm:$0xff] %v3209_v0 }
  0x6c   : > { %375 = vst [vmem:[#allocation2 + $0x20] sm:$0xff] %v3209_v0 }
  0x6d   : > { %376 = vst [vmem:[#allocation2 + $0xe8] sm:$0xff] %v3209_v0 }
  0x6e   : > { %377 = vst [vmem:[#allocation2 + $0x288] sm:$0xff] %v3209_v0 }
  0x6f   : > { %378 = vst [vmem:[#allocation2 + $0x3a8] sm:$0xff] %v3209_v0 }
  0x70   : > { %379 = vst [vmem:[#allocation2 + $0x3c8] sm:$0xff] %v3209_v0 }
  0x71   : > { %380 = vst [vmem:[#allocation2 + $0x160] sm:$0xff] %v3209_v0 }
  0x72   : > { %381 = vst [vmem:[#allocation2 + $0x2c8] sm:$0xff] %v3209_v0 }
  0x73   : > { %382 = vst [vmem:[#allocation2 + $0x210] sm:$0xff] %v3209_v0 }
  0x74   : > { %383 = vst [vmem:[#allocation2 + $0x3d8] sm:$0xff] %v3209_v0 }
  0x75   : > { %384 = vst [vmem:[#allocation2 + $0x1e8] sm:$0xff] %v3209_v0 }
  0x76   : > { %385 = vst [vmem:[#allocation2 + $0x1b0] sm:$0xff] %v3209_v0 }
  0x77   : > { %386 = vst [vmem:[#allocation2 + $0x1c8] sm:$0xff] %v3209_v0 }
  0x78   : > { %387 = vst [vmem:[#allocation2 + $0x2d0] sm:$0xff] %v3209_v0 }
  0x79   : > { %388 = vst [vmem:[#allocation2 + $0x1d0] sm:$0xff] %v3209_v0 }
  0x7a   : > { %389 = vst [vmem:[#allocation2 + $0x58] sm:$0xff] %v3209_v0 }
  0x7b   : > { %390 = vst [vmem:[#allocation2 + $0x120] sm:$0xff] %v3209_v0 }
  0x7c   : > { %391 = vst [vmem:[#allocation2 + $0x198] sm:$0xff] %v3209_v0 }
  0x7d   : > { %392 = vst [vmem:[#allocation2 + $0x2e8] sm:$0xff] %v3209_v0 }
  0x7e   : > { %393 = vst [vmem:[#allocation2 + $0x1f8] sm:$0xff] %v3209_v0 }
  0x7f   : > { %394 = vst [vmem:[#allocation2 + $0x238] sm:$0xff] %v3209_v0 }
  0x80   : > { %395 = vst [vmem:[#allocation2 + $0x398] sm:$0xff] %v3209_v0 }
  0x81   : > { %396 = vst [vmem:[#allocation2 + $0x390] sm:$0xff] %v3209_v0 }
  0x82   : > { %397 = vst [vmem:[#allocation2 + $0x1a0] sm:$0xff] %v3209_v0 }
  0x83   : > { %398 = vst [vmem:[#allocation2 + $0xa8] sm:$0xff] %v3209_v0 }
  0x84   : > { %399 = vst [vmem:[#allocation2 + $0x258] sm:$0xff] %v3209_v0 }
  0x85   : > { %400 = vst [vmem:[#allocation2 + $0x2d8] sm:$0xff] %v3209_v0 }
  0x86   : > { %401 = vst [vmem:[#allocation2 + $0xf0] sm:$0xff] %v3209_v0 }
  0x87   : > { %402 = vst [vmem:[#allocation2 + $0x180] sm:$0xff] %v3209_v0 }
  0x88   : > { %403 = vst [vmem:[#allocation2 + $0x170] sm:$0xff] %v3209_v0 }
  0x89   : > { %404 = vst [vmem:[#allocation2 + $0x3d0] sm:$0xff] %v3209_v0 }
  0x8a   : > { %405 = vst [vmem:[#allocation2 + $0x250] sm:$0xff] %v3209_v0 }
  0x8b   : > { %406 = vst [vmem:[#allocation2 + $0x378] sm:$0xff] %v3209_v0 }
  0x8c   : > { %407 = vst [vmem:[#allocation2 + $0xb8] sm:$0xff] %v3209_v0 }
  0x8d   : > { %408 = vst [vmem:[#allocation2 + $0x38] sm:$0xff] %v3209_v0 }
  0x8e   : > { %409 = vst [vmem:[#allocation2 + $0x78] sm:$0xff] %v3209_v0 }
  0x8f   : > { %410 = vst [vmem:[#allocation2 + $0x308] sm:$0xff] %v3209_v0 }
  0x90   : > { %411 = vst [vmem:[#allocation2 + $0x370] sm:$0xff] %v3209_v0 }
  0x91   : > { %412 = vst [vmem:[#allocation2 + $0xc8] sm:$0xff] %v3209_v0 }
  0x92   : > { %413 = vst [vmem:[#allocation2 + $0x278] sm:$0xff] %v3209_v0 }
  0x93   : > { %414 = vst [vmem:[#allocation2 + $0x360] sm:$0xff] %v3209_v0 }
  0x94   : > { %415 = vst [vmem:[#allocation2 + $0x228] sm:$0xff] %v3209_v0 }
  0x95   : > { %416 = vst [vmem:[#allocation2 + $0x348] sm:$0xff] %v3209_v0 }
  0x96   : > { %417 = vst [vmem:[#allocation2 + $0x148] sm:$0xff] %v3209_v0 }
  0x97   : > { %418 = vst [vmem:[#allocation2 + $0xf8] sm:$0xff] %v3209_v0 }
  0x98   : > { %419 = vst [vmem:[#allocation2 + $0x68] sm:$0xff] %v3209_v0 }
  0x99   : > { %420 = vst [vmem:[#allocation2] sm:$0xff] %v3209_v0 }
  0x9a   : > { %421 = vst [vmem:[#allocation2 + $0x298] sm:$0xff] %v3209_v0 }
  0x9b   : > { %422 = vst [vmem:[#allocation2 + $0x270] sm:$0xff] %v3209_v0 }
  0x9c   : > { %423 = vst [vmem:[#allocation2 + $0x310] sm:$0xff] %v3209_v0 }
  0x9d   : > { %424 = vst [vmem:[#allocation2 + $0x190] sm:$0xff] %v3209_v0 }
  0x9e PF: > { %v440_v1 = vld [vmem:[%s3845_s2 + $0x30] sm:$0xff]  ;;  %v438_v2 = vld [vmem:[%s3845_s2 + $0x20] sm:$0xff]  ;;  %vm515_vm0 = vcmask 1040384   ;;  %v3210_v3 = vmov 0   ;;  %vm516_vm1 = vcmask 1041408   ;;  %v3211_v5 = vmov 65535  }
  0x9f   : > { %3130 = vset.pattern.permute.xlu1 %v3210_v3  ;;  %3129 = vset.pattern.permute.xlu0 %v3210_v3  ;;  %v425_v4 = vld [vmem:[%s3315_s7] sm:$0x3]  ;;  %v517_v6 = vsel %vm515_vm0, 4294967295, %v3211_v5  ;;  %v436_v8 = vld [vmem:[%s3845_s2 + $0x10] sm:$0xff]  ;;  %vm502_vm2 = vcmask 23552   ;;  %v441_v12 = vld [vmem:[%s3845_s2 + $0x38] sm:$0xff] }
  0xa0   : > { %474 = vperm.xlu0 %3129, %v440_v1   ;;  %464 = vperm.xlu1 %3130, %v438_v2   ;;  %v518_v7 = vsel %vm516_vm1, %v517_v6, 0  ;;  %v2974_v10 = vld [vmem:[%s3844_s1 + $0x10] sm:$0xff]  ;;  %v2972_v11 = vld [vmem:[%s3844_s1] sm:$0xff]  ;;  %v439_v13 = vld [vmem:[%s3845_s2 + $0x28] sm:$0xff]  ;;  %vm715_vm3 = vcmask 523264   ;;  %p2968_p11 = scmp.ne.s32.totalorder %s3188_s21, 1 }
  0xa1   : > { %3131 = vset.pattern.permute.xlu2 %v3210_v3  ;;  %v520_v9 = vand.u32 %v518_v7, %v425_v4  ;;  %v437_v14 = vld [vmem:[%s3845_s2 + $0x18] sm:$0xff]  ;;  %v435_v15 = vld [vmem:[%s3845_s2 + $0x8] sm:$0xff]  ;;  %v434_v16 = vld [vmem:[%s3845_s2] sm:$0xff] }
  0xa2   : > { %454 = vperm.xlu2 %3131, %v436_v8   ;;  %v593_v17 = vld [vmem:[%s3847_s4 + $0x70] sm:$0xff]  ;;  %v2975_v18 = vld [vmem:[%s3844_s1 + $0x18] sm:$0xff]  ;;  %v2973_v19 = vld [vmem:[%s3844_s1 + $0x8] sm:$0xff] }
  0xa3   : > { %3048 = vmatpush.bf16.msra.mxu1 %v520_v9  ;;  %529 = vmatpush.bf16.msra.mxu0 %v520_v9  ;;  %v591_v20 = vld [vmem:[%s3847_s4 + $0x60] sm:$0xff]  ;;  %v594_v21 = vld [vmem:[%s3847_s4 + $0x78] sm:$0xff]  ;;  %v592_v22 = vld [vmem:[%s3847_s4 + $0x68] sm:$0xff] }
  0xa4   : > { %v590_v23 = vld [vmem:[%s3847_s4 + $0x58] sm:$0xff]  ;;  %v589_v24 = vld [vmem:[%s3847_s4 + $0x50] sm:$0xff]  ;;  %v587_v25 = vld [vmem:[%s3847_s4 + $0x40] sm:$0xff] }
  0xa5   : > { %v585_v26 = vld [vmem:[%s3847_s4 + $0x30] sm:$0xff]  ;;  %v588_v27 = vld [vmem:[%s3847_s4 + $0x48] sm:$0xff]  ;;  %v586_v28 = vld [vmem:[%s3847_s4 + $0x38] sm:$0xff] }
  0xa6   : > { %2670 = vmatmul.msk.bf16.vlgmr.msra.gmra.mxu1 %vm502_vm2, %v2974_v10  ;;  %2668 = vmatmul.msk.bf16.vlgmr.msra.gmra.mxu0 %vm502_vm2, %v2972_v11  ;;  %v584_v29 = vld [vmem:[%s3847_s4 + $0x28] sm:$0xff]  ;;  %v583_v30 = vld [vmem:[%s3847_s4 + $0x20] sm:$0xff]  ;;  %v581_v31 = vld [vmem:[%s3847_s4 + $0x10] sm:$0xff] }
  0xa7   : > { %v579_v32 = vld [vmem:[%s3847_s4] sm:$0xff]  ;;  %v582_v33 = vld [vmem:[%s3847_s4 + $0x18] sm:$0xff]  ;;  %v580_v34 = vld [vmem:[%s3847_s4 + $0x8] sm:$0xff] }
  0xa8   : > { %479 = vperm.xlu0 %3129, %v441_v12   ;;  %469 = vperm.xlu1 %3130, %v439_v13   ;;  %v2976_v7 = vld [vmem:[%s3846_s3] sm:$0xff]  ;;  %v2977_v8 = vld [vmem:[%s3846_s3 + $0x8] sm:$0xff]  ;;  %v2978_v9 = vld [vmem:[%s3846_s3 + $0x10] sm:$0xff] }
  0xa9   : > { %v2979_v10 = vld [vmem:[%s3846_s3 + $0x18] sm:$0xff]  ;;  %v2980_v11 = vld [vmem:[%s3846_s3 + $0x20] sm:$0xff]  ;;  %v2981_v12 = vld [vmem:[%s3846_s3 + $0x28] sm:$0xff] }
  0xaa   : > { %459 = vperm.xlu2 %3131, %v437_v14   ;;  %v2982_v13 = vld [vmem:[%s3846_s3 + $0x30] sm:$0xff]  ;;  %v2983_v14 = vld [vmem:[%s3846_s3 + $0x38] sm:$0xff] }
  0xb0   : > { %449 = vperm.xlu1 %3130, %v435_v15   ;;  %444 = vperm.xlu0 %3129, %v434_v16  }
  0xb2   : > { %667 = vperm.xlu2 %3131, %v593_v17  }
  0xb6   : > { %2671 = vmatmul.msk.bf16.gmra.mxu1 %vm502_vm2, %v2975_v18  ;;  %2669 = vmatmul.msk.bf16.gmra.mxu0 %vm502_vm2, %v2973_v19 }
  0xb8   : > { %657 = vperm.xlu1 %3130, %v591_v20   ;;  %672 = vperm.xlu0 %3129, %v594_v21  }
  0xba   : > { %662 = vperm.xlu2 %3131, %v592_v22  }
  0xc0   : > { %652 = vperm.xlu1 %3130, %v590_v23   ;;  %647 = vperm.xlu0 %3129, %v589_v24  }
  0xc2   : > { %637 = vperm.xlu2 %3131, %v587_v25  }
  0xc8   : > { %627 = vperm.xlu1 %3130, %v585_v26   ;;  %642 = vperm.xlu0 %3129, %v588_v27  }
  0xca   : > { %632 = vperm.xlu2 %3131, %v586_v28  }
  0xd0   : > { %622 = vperm.xlu1 %3130, %v584_v29   ;;  %617 = vperm.xlu0 %3129, %v583_v30  }
  0xd2   : > { %607 = vperm.xlu2 %3131, %v581_v31  }
  0xd8   : > { %597 = vperm.xlu1 %3130, %v579_v32   ;;  %612 = vperm.xlu0 %3129, %v582_v33  }
  0xda   : > { %602 = vperm.xlu2 %3131, %v580_v34  }
  0xfc   : > { %v455_v43 = vpop.permute.xlu2 %454 }
 0x104   : > { %v460_v54 = vpop.permute.xlu2 %459 }
 0x10c   : > { %v668_v27 = vpop.permute.xlu2 %667 }
 0x112   : > { %v475_v39 = vpop.permute.xlu0 %474  ;;  %v465_v40 = vpop.permute.xlu1 %464 }
 0x114   : > { %v663_v30 = vpop.permute.xlu2 %662 }
 0x11a   : > { %v480_v44 = vpop.permute.xlu0 %479  ;;  %v470_v45 = vpop.permute.xlu1 %469 }
 0x122   : > { %v445_v59 = vpop.permute.xlu0 %444  ;;  %v450_v61 = vpop.permute.xlu1 %449 }
 0x123   : > { %v541_v35 = vpop.f32.mrf.mxu1  ;;  %v531_v36 = vpop.f32.mrf.mxu0 }
 0x124   : > { %v542_v51 = vadd.f32 %v541_v35, %v465_v40  ;;  %v532_v62 = vadd.f32 %v531_v36, %v445_v59  ;;  %v638_v35 = vpop.permute.xlu2 %637 }
 0x126   : > { %v555_v60 = vmax.f32 %v542_v51, 0.0  ;;  %v551_v3 = vmax.f32 %v532_v62, 0.0 }
 0x12a   : > { %v673_v29 = vpop.permute.xlu0 %672  ;;  %v658_v32 = vpop.permute.xlu1 %657 }
 0x12b   : > { %v543_v37 = vpop.f32.mrf.mxu1  ;;  %v533_v38 = vpop.f32.mrf.mxu0 }
 0x12c   : > { %v544_v48 = vadd.f32 %v543_v37, %v470_v45  ;;  %v534_v63 = vadd.f32 %v533_v38, %v450_v61  ;;  %v633_v45 = vpop.permute.xlu2 %632 }
 0x12e   : > { %v556_v55 = vmax.f32 %v544_v48, 0.0  ;;  %v552_v4 = vmax.f32 %v534_v63, 0.0 }
 0x130   : > { %v561_v2 = vpack.c.bf16 %v556_v55, %v555_v60  ;;  %v559_v6 = vpack.c.bf16 %v552_v4, %v551_v3 }
 0x132   : > { %v648_v33 = vpop.permute.xlu0 %647  ;;  %v653_v36 = vpop.permute.xlu1 %652 }
 0x133   : > { %v546_v41 = vpop.f32.mrf.mxu1  ;;  %v536_v42 = vpop.f32.mrf.mxu0 }
 0x134   : > { %v547_v46 = vadd.f32 %v546_v41, %v475_v39  ;;  %v537_v56 = vadd.f32 %v536_v42, %v455_v43  ;;  %v608_v61 = vpop.permute.xlu2 %607 }
 0x136   : > { %v557_v52 = vmax.f32 %v547_v46, 0.0  ;;  %v553_v0 = vmax.f32 %v537_v56, 0.0 }
 0x13a   : > { %v643_v38 = vpop.permute.xlu0 %642 }
 0x13b   : > { %v548_v47 = vpop.f32.mrf.mxu1  ;;  %v538_v50 = vpop.f32.mrf.mxu0 }
 0x13c   : > { %v549_v49 = vadd.f32 %v548_v47, %v480_v44  ;;  %v539_v58 = vadd.f32 %v538_v50, %v460_v54 }
 0x13e   : > { %v558_v53 = vmax.f32 %v549_v49, 0.0  ;;  %v554_v1 = vmax.f32 %v539_v58, 0.0  ;;  %v628_v49 = vpop.permute.xlu1 %627 }
 0x140   : > { %v562_v57 = vpack.c.bf16 %v558_v53, %v557_v52  ;;  %v560_v5 = vpack.c.bf16 %v554_v1, %v553_v0 }
 0x142   : > { %744 = vmatpush.bf16.msrb.mxu1 %v562_v57  ;;  %v618_v55 = vpop.permute.xlu0 %617 }
 0x146   : > { %745 = vmatpush.bf16.msrb.mxu1 %v561_v2  ;;  %v623_v0 = vpop.permute.xlu1 %622 }
 0x14a   : > { %746 = vmatpush.bf16.msrb.mxu1 %v560_v5 }
 0x14e   : > { %747 = vmatpush.bf16.msrb.mxu1 %v559_v6  ;;  %v613_v6 = vpop.permute.xlu0 %612 }
 0x151   : > { %2704 = vmatmul.msk.bf16.vlgmr.msrb.gmra.mxu1 %vm715_vm3, %v2976_v7 }
 0x161   : > { %2705 = vmatmul.msk.bf16.gmra.mxu1 %vm715_vm3, %v2977_v8 }
 0x171   : > { %2706 = vmatmul.msk.bf16.gmra.mxu1 %vm715_vm3, %v2978_v9 }
 0x181   : > { %2707 = vmatmul.msk.bf16.gmra.mxu1 %vm715_vm3, %v2979_v10 }
 0x191   : > { %2708 = vmatmul.msk.bf16.gmra.mxu1 %vm715_vm3, %v2980_v11 }
 0x1a1   : > { %2709 = vmatmul.msk.bf16.gmra.mxu1 %vm715_vm3, %v2981_v12  ;;  %v603_v12 = vpop.permute.xlu2 %602 }
 0x1b1   : > { %2710 = vmatmul.msk.bf16.gmra.mxu1 %vm715_vm3, %v2982_v13 }
 0x1c1   : > { %2711 = vmatmul.msk.bf16.gmra.mxu1 %vm715_vm3, %v2983_v14 }
 0x1ce   : > { %v3559_v15 = vpop.f32.mrf.mxu1 }
 0x1d6   : > { %v3561_v16 = vpop.f32.mrf.mxu1 }
 0x1d7   : > { %v752_v13 = vadd.f32 %v3561_v16, %v603_v12  ;;  %v3010_v16 = vld [vmem:[#allocation3 + $0xd0] sm:$0xff]  ;;  %v1746_v12 = vld [vmem:[#allocation2 + $0x58] sm:$0xff] }
 0x1de   : > { %v3563_v17 = vpop.f32.mrf.mxu1 }
 0x1df   : > { %v755_v10 = vadd.f32 %v3563_v17, %v608_v61  ;;  %v1655_v61 = vld [vmem:[#allocation2 + $0x3b0] sm:$0xff] }
 0x1e6   : > { %v3565_v18 = vpop.f32.mrf.mxu1 }
 0x1e7   : > { %v757_v7 = vadd.f32 %v3565_v18, %v613_v6  ;;  %v790_v18 = vmax.f32 %v752_v13, 0.0  ;;  %v3038_v6 = vld [vmem:[#allocation3 + $0x1b0] sm:$0xff] }
 0x1e9   : > { %v792_v14 = vmax.f32 %v757_v7, 0.0 }
 0x1ee   : > { %v759_v19 = vpop.f32.mrf.mxu1 }
 0x1ef   : > { %v760_v4 = vadd.f32 %v759_v19, %v618_v55 }
 0x1f1   : > { %v793_v11 = vmax.f32 %v760_v4, 0.0 }
 0x1f6   : > { %v761_v20 = vpop.f32.mrf.mxu1 }
 0x1f7   : > { %v762_v1 = vadd.f32 %v761_v20, %v623_v0  ;;  %v598_v20 = vpop.permute.xlu1 %597  ;;  %v1745_v0 = vld [vmem:[#allocation2 + $0x1d0] sm:$0xff] }
 0x1f9   : > { %v794_v8 = vmax.f32 %v762_v1, 0.0 }
 0x1fb   : > { %v807_v19 = vpack.c.bf16 %v794_v8, %v793_v11  ;;  %v2993_v8 = vld [vmem:[#allocation3 + $0x48] sm:$0xff] }
 0x1fc   : > { %v1708_v11 = vld [vmem:[#allocation2 + $0x88] sm:$0xff] }
 0x1fe   : > { %v764_v21 = vpop.f32.mrf.mxu1 }
 0x1ff   : > { %v765_v62 = vadd.f32 %v764_v21, %v628_v49  ;;  %v750_v21 = vadd.f32 %v3559_v15, %v598_v20  ;;  %v3011_v15 = vld [vmem:[#allocation3 + $0xd8] sm:$0xff] }
 0x201   : > { %v795_v5 = vmax.f32 %v765_v62, 0.0 }
 0x206   : > { %v766_v22 = vpop.f32.mrf.mxu1 }
 0x207   : > { %v767_v58 = vadd.f32 %v766_v22, %v633_v45  ;;  %v791_v22 = vmax.f32 %v755_v10, 0.0  ;;  %v3036_v45 = vld [vmem:[#allocation3 + $0x1a0] sm:$0xff]  ;;  %v1656_v10 = vld [vmem:[#allocation2 + $0xd8] sm:$0xff] }
 0x209   : > { %v796_v2 = vmax.f32 %v767_v58, 0.0  ;;  %v806_v17 = vpack.c.bf16 %v792_v14, %v791_v22 }
 0x20b   : > { %v808_v9 = vpack.c.bf16 %v796_v2, %v795_v5  ;;  %v3019_v5 = vld [vmem:[#allocation3 + $0x118] sm:$0xff] }
 0x20e   : > { %v769_v23 = vpop.f32.mrf.mxu1 }
 0x20f   : > { %v770_v56 = vadd.f32 %v769_v23, %v638_v35  ;;  %v789_v23 = vmax.f32 %v750_v21, 0.0  ;;  %v3014_v35 = vld [vmem:[#allocation3 + $0xf0] sm:$0xff] }
 0x211   : > { %v797_v63 = vmax.f32 %v770_v56, 0.0 }
 0x216   : > { %v771_v24 = vpop.f32.mrf.mxu1 }
 0x217   : > { %v772_v52 = vadd.f32 %v771_v24, %v643_v38  ;;  %v805_v24 = vpack.c.bf16 %v790_v18, %v789_v23  ;;  %v3015_v38 = vld [vmem:[#allocation3 + $0xf8] sm:$0xff]  ;;  %v1709_v23 = vld [vmem:[#allocation2 + $0x2f0] sm:$0xff] }
 0x218   : > { %v1657_v18 = vld [vmem:[#allocation2 + $0x18] sm:$0xff] }
 0x219   : > { %v798_v59 = vmax.f32 %v772_v52, 0.0  ;;  %v1654_v52 = vld [vmem:[#allocation2 + $0x2b0] sm:$0xff] }
 0x21b   : > { %v809_v3 = vpack.c.bf16 %v798_v59, %v797_v63  ;;  %v1707_v63 = vld [vmem:[#allocation2 + $0xd0] sm:$0xff] }
 0x21e   : > { %v774_v25 = vpop.f32.mrf.mxu1 }
 0x21f   : > { %v775_v50 = vadd.f32 %v774_v25, %v648_v33  ;;  %v3029_v25 = vld [vmem:[#allocation3 + $0x168] sm:$0xff]  ;;  %v3032_v33 = vld [vmem:[#allocation3 + $0x180] sm:$0xff] }
 0x221   : > { %v799_v57 = vmax.f32 %v775_v50, 0.0  ;;  %v2992_v50 = vld [vmem:[#allocation3 + $0x40] sm:$0xff] }
 0x226   : > { %v776_v26 = vpop.f32.mrf.mxu1 }
 0x227   : > { %v777_v46 = vadd.f32 %v776_v26, %v653_v36  ;;  %v2984_v26 = vld [vmem:[#allocation3] sm:$0xff]  ;;  %v3033_v36 = vld [vmem:[#allocation3 + $0x188] sm:$0xff] }
 0x229   : > { %v800_v53 = vmax.f32 %v777_v46, 0.0  ;;  %v2991_v46 = vld [vmem:[#allocation3 + $0x38] sm:$0xff] }
 0x22b   : > { %v810_v60 = vpack.c.bf16 %v800_v53, %v799_v57  ;;  %v1706_v53 = vld [vmem:[#allocation2 + $0x208] sm:$0xff] }
 0x22e   : > { %v779_v28 = vpop.f32.mrf.mxu1 }
 0x22f   : > { %v780_v42 = vadd.f32 %v779_v28, %v658_v32  ;;  %v2985_v28 = vld [vmem:[#allocation3 + $0x8] sm:$0xff] }
 0x230   : > { %v3013_v32 = vld [vmem:[#allocation3 + $0xe8] sm:$0xff] }
 0x231   : > { %v801_v51 = vmax.f32 %v780_v42, 0.0  ;;  %v3035_v42 = vld [vmem:[#allocation3 + $0x198] sm:$0xff] }
 0x236   : > { %v781_v31 = vpop.f32.mrf.mxu1 }
 0x237   : > { %v782_v40 = vadd.f32 %v781_v31, %v663_v30  ;;  %v3031_v30 = vld [vmem:[#allocation3 + $0x178] sm:$0xff]  ;;  %v2986_v31 = vld [vmem:[#allocation3 + $0x10] sm:$0xff] }
 0x239   : > { %v802_v47 = vmax.f32 %v782_v40, 0.0  ;;  %v2989_v40 = vld [vmem:[#allocation3 + $0x28] sm:$0xff] }
 0x23b   : > { %v811_v54 = vpack.c.bf16 %v802_v47, %v801_v51  ;;  %v3018_v47 = vld [vmem:[#allocation3 + $0x110] sm:$0xff]  ;;  %v3001_v51 = vld [vmem:[#allocation3 + $0x88] sm:$0xff] }
 0x23e   : > { %v784_v34 = vpop.f32.mrf.mxu1 }
 0x23f   : > { %v785_v37 = vadd.f32 %v784_v34, %v668_v27  ;;  %v3030_v27 = vld [vmem:[#allocation3 + $0x170] sm:$0xff]  ;;  %v2987_v34 = vld [vmem:[#allocation3 + $0x18] sm:$0xff] }
 0x241   : > { %v803_v43 = vmax.f32 %v785_v37, 0.0  ;;  %v2988_v37 = vld [vmem:[#allocation3 + $0x20] sm:$0xff] }
 0x246   : > { %v786_v39 = vpop.f32.mrf.mxu1 }
 0x247   : > { %v787_v41 = vadd.f32 %v786_v39, %v673_v29  ;;  %v3012_v29 = vld [vmem:[#allocation3 + $0xe0] sm:$0xff]  ;;  %v3034_v39 = vld [vmem:[#allocation3 + $0x190] sm:$0xff] }
 0x249   : > { %v804_v44 = vmax.f32 %v787_v41, 0.0  ;;  %v3016_v41 = vld [vmem:[#allocation3 + $0x100] sm:$0xff] }
 0x24b   : > { %v812_v48 = vpack.c.bf16 %v804_v44, %v803_v43  ;;  %v2990_v43 = vld [vmem:[#allocation3 + $0x30] sm:$0xff]  ;;  %v3017_v44 = vld [vmem:[#allocation3 + $0x108] sm:$0xff] }
 0x24d   : > { %1325 = vmatpush.bf16.msrb.mxu0 %v812_v48  ;;  %3049 = vmatpush.bf16.msra.mxu1 %v812_v48 }
 0x24e   : > { %3050 = vmatpush.bf16.msra.mxu2 %v812_v48  ;;  %3051 = vmatpush.bf16.msra.mxu3 %v812_v48  ;;  %v3037_v48 = vld [vmem:[#allocation3 + $0x1a8] sm:$0xff] }
 0x251   : > { %1326 = vmatpush.bf16.msrb.mxu0 %v811_v54  ;;  %3052 = vmatpush.bf16.msra.mxu1 %v811_v54 }
 0x252   : > { %3053 = vmatpush.bf16.msra.mxu2 %v811_v54  ;;  %3054 = vmatpush.bf16.msra.mxu3 %v811_v54  ;;  %v1744_v54 = vld [vmem:[#allocation2 + $0x2d0] sm:$0xff] }
 0x255   : > { %1327 = vmatpush.bf16.msrb.mxu0 %v810_v60  ;;  %3055 = vmatpush.bf16.msra.mxu1 %v810_v60 }
 0x256   : > { %3056 = vmatpush.bf16.msra.mxu2 %v810_v60  ;;  %3057 = vmatpush.bf16.msra.mxu3 %v810_v60 }
 0x259   : > { %1328 = vmatpush.bf16.msrb.mxu0 %v809_v3  ;;  %3058 = vmatpush.bf16.msra.mxu1 %v809_v3 }
 0x25a   : > { %3059 = vmatpush.bf16.msra.mxu2 %v809_v3  ;;  %3060 = vmatpush.bf16.msra.mxu3 %v809_v3 }
 0x25d   : > { %1329 = vmatpush.bf16.msrb.mxu0 %v808_v9  ;;  %3061 = vmatpush.bf16.msra.mxu1 %v808_v9 }
 0x25e   : > { %3062 = vmatpush.bf16.msra.mxu2 %v808_v9  ;;  %3063 = vmatpush.bf16.msra.mxu3 %v808_v9  ;;  %v3002_v9 = vld [vmem:[#allocation3 + $0x90] sm:$0xff] }
 0x261   : > { %1330 = vmatpush.bf16.msrb.mxu0 %v807_v19  ;;  %3064 = vmatpush.bf16.msra.mxu1 %v807_v19 }
 0x262   : > { %3065 = vmatpush.bf16.msra.mxu2 %v807_v19  ;;  %3066 = vmatpush.bf16.msra.mxu3 %v807_v19 }
 0x265   : > { %1331 = vmatpush.bf16.msrb.mxu0 %v806_v17  ;;  %3067 = vmatpush.bf16.msra.mxu1 %v806_v17 }
 0x266   : > { %3068 = vmatpush.bf16.msra.mxu2 %v806_v17  ;;  %3069 = vmatpush.bf16.msra.mxu3 %v806_v17 }
 0x269   : > { %1332 = vmatpush.bf16.msrb.mxu0 %v805_v24  ;;  %3070 = vmatpush.bf16.msra.mxu1 %v805_v24 }
 0x26a   : > { %3071 = vmatpush.bf16.msra.mxu2 %v805_v24  ;;  %3072 = vmatpush.bf16.msra.mxu3 %v805_v24  ;;  %v1747_v24 = vld [vmem:[#allocation2 + $0x120] sm:$0xff] }
 0x26c   : > { %1333 = vmatmul.bf16.vlgmr.msrb.gmra.mxu0 %v2984_v26  ;;  %1418 = vmatmul.bf16.vlgmr.msra.gmra.mxu1 %v3001_v51 }
 0x26d   : > { %1463 = vmatmul.bf16.vlgmr.msra.gmra.mxu2 %v3010_v16  ;;  %1558 = vmatmul.bf16.vlgmr.msra.gmra.mxu3 %v3029_v25 }
 0x27c   : > { %1338 = vmatmul.bf16.gmra.mxu0 %v2985_v28  ;;  %1423 = vmatmul.bf16.gmra.mxu1 %v3002_v9  ;;  %v3039_v28 = vld [vmem:[#allocation3 + $0x1b8] sm:$0xff] }
 0x27d   : > { %1468 = vmatmul.bf16.gmra.mxu2 %v3011_v15  ;;  %1563 = vmatmul.bf16.gmra.mxu3 %v3030_v27  ;;  %v3020_v27 = vld [vmem:[#allocation3 + $0x120] sm:$0xff] }
 0x28c   : > { %1343 = vmatmul.bf16.gmra.mxu0 %v2986_v31  ;;  %v3003_v31 = vld [vmem:[#allocation3 + $0x98] sm:$0xff] }
 0x28d   : > { %1473 = vmatmul.bf16.gmra.mxu2 %v3012_v29  ;;  %1568 = vmatmul.bf16.gmra.mxu3 %v3031_v30  ;;  %v2994_v30 = vld [vmem:[#allocation3 + $0x50] sm:$0xff] }
 0x28e   : > { %1428 = vmatmul.bf16.gmra.mxu1 %v3003_v31 }
 0x29c   : > { %1348 = vmatmul.bf16.gmra.mxu0 %v2987_v34  ;;  %v1748_v34 = vld [vmem:[#allocation2 + $0x198] sm:$0xff] }
 0x29d   : > { %1478 = vmatmul.bf16.gmra.mxu2 %v3013_v32  ;;  %1573 = vmatmul.bf16.gmra.mxu3 %v3032_v33  ;;  %v1658_v32 = vld [vmem:[#allocation2 + $0x50] sm:$0xff]  ;;  %v1710_v33 = vld [vmem:[#allocation2 + $0x358] sm:$0xff] }
 0x2ac   : > { %1353 = vmatmul.bf16.gmra.mxu0 %v2988_v37 }
 0x2ad   : > { %1483 = vmatmul.bf16.gmra.mxu2 %v3014_v35  ;;  %1578 = vmatmul.bf16.gmra.mxu3 %v3033_v36 }
 0x2bc   : > { %1358 = vmatmul.bf16.gmra.mxu0 %v2989_v40 }
 0x2bd   : > { %1488 = vmatmul.bf16.gmra.mxu2 %v3015_v38  ;;  %1583 = vmatmul.bf16.gmra.mxu3 %v3034_v39 }
 0x2cc   : > { %1363 = vmatmul.bf16.gmra.mxu0 %v2990_v43  ;;  %v1711_v43 = vld [vmem:[#allocation2 + $0x268] sm:$0xff] }
 0x2cd   : > { %1493 = vmatmul.bf16.gmra.mxu2 %v3016_v41  ;;  %1588 = vmatmul.bf16.gmra.mxu3 %v3035_v42  ;;  %v1659_v41 = vld [vmem:[#allocation2 + $0x368] sm:$0xff] }
 0x2dc   : > { %1368 = vmatmul.bf16.gmra.mxu0 %v2991_v46 }
 0x2dd   : > { %1498 = vmatmul.bf16.gmra.mxu2 %v3017_v44  ;;  %1593 = vmatmul.bf16.gmra.mxu3 %v3036_v45  ;;  %v1749_v44 = vld [vmem:[#allocation2 + $0x2e8] sm:$0xff] }
 0x2e9   : > { %v1334_v49 = vpop.f32.mrf.mxu0 }
 0x2ea   : > { %v1782_v55 = vmax.f32 %v1654_v52, %v1334_v49  ;;  %v3021_v49 = vld [vmem:[#allocation3 + $0x128] sm:$0xff]  ;;  %v2995_v52 = vld [vmem:[#allocation3 + $0x58] sm:$0xff] }
 0x2ec   : > { %1373 = vmatmul.bf16.gmra.mxu0 %v2992_v50  ;;  %1910 = vst [vmem:[#allocation2 + $0x2b0] sm:$0xff] %v1782_v55  ;;  %v3040_v50 = vld [vmem:[#allocation3 + $0x1c0] sm:$0xff]  ;;  %v1712_v55 = vld [vmem:[#allocation2 + $0x350] sm:$0xff] }
 0x2ed   : > { %1503 = vmatmul.bf16.gmra.mxu2 %v3018_v47  ;;  %1598 = vmatmul.bf16.gmra.mxu3 %v3037_v48 }
 0x2f0   : > { %v1464_v56 = vpop.f32.mrf.mxu2  ;;  %v1559_v57 = vpop.f32.mrf.mxu3 }
 0x2f1   : > { %v1834_v58 = vmax.f32 %v1706_v53, %v1464_v56  ;;  %v1872_v59 = vmax.f32 %v1744_v54, %v1559_v57  ;;  %v1336_v60 = vpop.f32.mrf.mxu0  ;;  %v3004_v53 = vld [vmem:[#allocation3 + $0xa0] sm:$0xff]  ;;  %v1660_v54 = vld [vmem:[#allocation2 + $0x330] sm:$0xff]  ;;  %v1750_v56 = vld [vmem:[#allocation2 + $0x1f8] sm:$0xff] }
 0x2f2   : > { %v1783_v62 = vmax.f32 %v1655_v61, %v1336_v60  ;;  %1433 = vmatmul.bf16.gmra.mxu1 %v3004_v53 }
 0x2f3   : > { %1962 = vst [vmem:[#allocation2 + $0x208] sm:$0xff] %v1834_v58 }
 0x2f4   : > { %2000 = vst [vmem:[#allocation2 + $0x2d0] sm:$0xff] %v1872_v59 }
 0x2f5   : > { %1911 = vst [vmem:[#allocation2 + $0x3b0] sm:$0xff] %v1783_v62 }
 0x2f8   : > { %v1466_v1 = vpop.f32.mrf.mxu2  ;;  %v1561_v2 = vpop.f32.mrf.mxu3 }
 0x2f9   : > { %v1835_v3 = vmax.f32 %v1707_v63, %v1466_v1  ;;  %v1873_v4 = vmax.f32 %v1745_v0, %v1561_v2  ;;  %v1339_v7 = vpop.f32.mrf.mxu0  ;;  %v1661_v63 = vld [vmem:[#allocation2 + $0x48] sm:$0xff]  ;;  %v1751_v2 = vld [vmem:[#allocation2 + $0x238] sm:$0xff] }
 0x2fa   : > { %v1784_v13 = vmax.f32 %v1656_v10, %v1339_v7  ;;  %v1713_v1 = vld [vmem:[#allocation2 + $0x188] sm:$0xff]  ;;  %v3022_v7 = vld [vmem:[#allocation3 + $0x130] sm:$0xff]  ;;  %v2996_v10 = vld [vmem:[#allocation3 + $0x60] sm:$0xff] }
 0x2fb   : > { %1963 = vst [vmem:[#allocation2 + $0xd0] sm:$0xff] %v1835_v3 }
 0x2fc   : > { %2001 = vst [vmem:[#allocation2 + $0x1d0] sm:$0xff] %v1873_v4  ;;  %1378 = vmatmul.bf16.gmra.mxu0 %v2993_v8  ;;  %v3041_v8 = vld [vmem:[#allocation3 + $0x1c8] sm:$0xff] }
 0x2fd   : > { %1508 = vmatmul.bf16.gmra.mxu2 %v3019_v5  ;;  %1603 = vmatmul.bf16.gmra.mxu3 %v3038_v6  ;;  %1912 = vst [vmem:[#allocation2 + $0xd8] sm:$0xff] %v1784_v13  ;;  %v1714_v13 = vld [vmem:[#allocation2 + $0x1d8] sm:$0xff] }
 0x300   : > { %v1469_v14 = vpop.f32.mrf.mxu2  ;;  %v1564_v19 = vpop.f32.mrf.mxu3 }
 0x301   : > { %v1836_v20 = vmax.f32 %v1708_v11, %v1469_v14  ;;  %v1874_v21 = vmax.f32 %v1746_v12, %v1564_v19  ;;  %v1341_v22 = vpop.f32.mrf.mxu0  ;;  %v3005_v11 = vld [vmem:[#allocation3 + $0xa8] sm:$0xff]  ;;  %v1662_v12 = vld [vmem:[#allocation2 + $0x380] sm:$0xff]  ;;  %v1752_v14 = vld [vmem:[#allocation2 + $0x398] sm:$0xff] }
 0x302   : > { %v1785_v17 = vmax.f32 %v1657_v18, %v1341_v22  ;;  %1438 = vmatmul.bf16.gmra.mxu1 %v3005_v11 }
 0x303   : > { %1964 = vst [vmem:[#allocation2 + $0x88] sm:$0xff] %v1836_v20 }
 0x304   : > { %2002 = vst [vmem:[#allocation2 + $0x58] sm:$0xff] %v1874_v21 }
 0x305   : > { %1913 = vst [vmem:[#allocation2 + $0x18] sm:$0xff] %v1785_v17 }
 0x308   : > { %v1471_v16 = vpop.f32.mrf.mxu2  ;;  %v1566_v25 = vpop.f32.mrf.mxu3 }
 0x309   : > { %v1837_v26 = vmax.f32 %v1709_v23, %v1471_v16  ;;  %v1875_v15 = vmax.f32 %v1747_v24, %v1566_v25  ;;  %v1344_v29 = vpop.f32.mrf.mxu0  ;;  %v1663_v23 = vld [vmem:[#allocation2 + $0x110] sm:$0xff] }
 0x30a   : > { %v1786_v35 = vmax.f32 %v1658_v32, %v1344_v29  ;;  %v1715_v16 = vld [vmem:[#allocation2 + $0x30] sm:$0xff]  ;;  %v3023_v29 = vld [vmem:[#allocation3 + $0x138] sm:$0xff]  ;;  %v2997_v32 = vld [vmem:[#allocation3 + $0x68] sm:$0xff] }
 0x30b   : > { %1965 = vst [vmem:[#allocation2 + $0x2f0] sm:$0xff] %v1837_v26  ;;  %v1753_v25 = vld [vmem:[#allocation2 + $0x390] sm:$0xff] }
 0x30c   : > { %2003 = vst [vmem:[#allocation2 + $0x120] sm:$0xff] %v1875_v15  ;;  %1383 = vmatmul.bf16.gmra.mxu0 %v2994_v30  ;;  %v3042_v30 = vld [vmem:[#allocation3 + $0x1d0] sm:$0xff] }
 0x30d   : > { %1513 = vmatmul.bf16.gmra.mxu2 %v3020_v27  ;;  %1608 = vmatmul.bf16.gmra.mxu3 %v3039_v28  ;;  %1914 = vst [vmem:[#allocation2 + $0x50] sm:$0xff] %v1786_v35  ;;  %v1716_v35 = vld [vmem:[#allocation2 + $0x140] sm:$0xff] }
 0x310   : > { %v1474_v36 = vpop.f32.mrf.mxu2  ;;  %v1569_v37 = vpop.f32.mrf.mxu3 }
 0x311   : > { %v1838_v38 = vmax.f32 %v1710_v33, %v1474_v36  ;;  %v1876_v39 = vmax.f32 %v1748_v34, %v1569_v37  ;;  %v1346_v40 = vpop.f32.mrf.mxu0  ;;  %v3006_v33 = vld [vmem:[#allocation3 + $0xb0] sm:$0xff]  ;;  %v1664_v34 = vld [vmem:[#allocation2 + $0x118] sm:$0xff]  ;;  %v1754_v36 = vld [vmem:[#allocation2 + $0x1a0] sm:$0xff] }
 0x312   : > { %v1787_v42 = vmax.f32 %v1659_v41, %v1346_v40  ;;  %1443 = vmatmul.bf16.gmra.mxu1 %v3006_v33 }
 0x313   : > { %1966 = vst [vmem:[#allocation2 + $0x358] sm:$0xff] %v1838_v38 }
 0x314   : > { %2004 = vst [vmem:[#allocation2 + $0x198] sm:$0xff] %v1876_v39 }
 0x315   : > { %1915 = vst [vmem:[#allocation2 + $0x368] sm:$0xff] %v1787_v42 }
 0x318   : > { %v1476_v45 = vpop.f32.mrf.mxu2  ;;  %v1571_v46 = vpop.f32.mrf.mxu3 }
 0x319   : > { %v1839_v47 = vmax.f32 %v1711_v43, %v1476_v45  ;;  %v1877_v48 = vmax.f32 %v1749_v44, %v1571_v46  ;;  %v1349_v51 = vpop.f32.mrf.mxu0  ;;  %v1665_v43 = vld [vmem:[#allocation2 + $0x98] sm:$0xff]  ;;  %v1717_v45 = vld [vmem:[#allocation2 + $0x2a8] sm:$0xff] }
 0x31a   : > { %v1788_v57 = vmax.f32 %v1660_v54, %v1349_v51  ;;  %v1755_v46 = vld [vmem:[#allocation2 + $0xa8] sm:$0xff]  ;;  %v3024_v51 = vld [vmem:[#allocation3 + $0x140] sm:$0xff]  ;;  %v2998_v54 = vld [vmem:[#allocation3 + $0x70] sm:$0xff] }
 0x31b   : > { %1967 = vst [vmem:[#allocation2 + $0x268] sm:$0xff] %v1839_v47 }
 0x31c   : > { %2005 = vst [vmem:[#allocation2 + $0x2e8] sm:$0xff] %v1877_v48  ;;  %1388 = vmatmul.bf16.gmra.mxu0 %v2995_v52  ;;  %v3043_v52 = vld [vmem:[#allocation3 + $0x1d8] sm:$0xff] }
 0x31d   : > { %1518 = vmatmul.bf16.gmra.mxu2 %v3021_v49  ;;  %1613 = vmatmul.bf16.gmra.mxu3 %v3040_v50  ;;  %1916 = vst [vmem:[#allocation2 + $0x330] sm:$0xff] %v1788_v57  ;;  %v1718_v57 = vld [vmem:[#allocation2 + $0x130] sm:$0xff] }
 0x320   : > { %v1479_v58 = vpop.f32.mrf.mxu2  ;;  %v1574_v59 = vpop.f32.mrf.mxu3 }
 0x321   : > { %v1840_v60 = vmax.f32 %v1712_v55, %v1479_v58  ;;  %v1878_v61 = vmax.f32 %v1750_v56, %v1574_v59  ;;  %v1351_v62 = vpop.f32.mrf.mxu0  ;;  %v3007_v55 = vld [vmem:[#allocation3 + $0xb8] sm:$0xff]  ;;  %v1666_v56 = vld [vmem:[#allocation2 + $0x320] sm:$0xff] }
 0x322   : > { %v1789_v0 = vmax.f32 %v1661_v63, %v1351_v62  ;;  %1448 = vmatmul.bf16.gmra.mxu1 %v3007_v55  ;;  %v1756_v58 = vld [vmem:[#allocation2 + $0x258] sm:$0xff] }
 0x323   : > { %1968 = vst [vmem:[#allocation2 + $0x350] sm:$0xff] %v1840_v60 }
 0x324   : > { %2006 = vst [vmem:[#allocation2 + $0x1f8] sm:$0xff] %v1878_v61 }
 0x325   : > { %1917 = vst [vmem:[#allocation2 + $0x48] sm:$0xff] %v1789_v0 }
 0x328   : > { %v1481_v3 = vpop.f32.mrf.mxu2  ;;  %v1576_v4 = vpop.f32.mrf.mxu3 }
 0x329   : > { %v1841_v5 = vmax.f32 %v1713_v1, %v1481_v3  ;;  %v1879_v6 = vmax.f32 %v1751_v2, %v1576_v4  ;;  %v1354_v9 = vpop.f32.mrf.mxu0  ;;  %v1667_v1 = vld [vmem:[#allocation2 + $0x150] sm:$0xff]  ;;  %v1719_v3 = vld [vmem:[#allocation2 + $0x200] sm:$0xff]  ;;  %v1757_v4 = vld [vmem:[#allocation2 + $0x2d8] sm:$0xff] }
 0x32a   : > { %v1790_v19 = vmax.f32 %v1662_v12, %v1354_v9  ;;  %v3025_v9 = vld [vmem:[#allocation3 + $0x148] sm:$0xff]  ;;  %v2999_v12 = vld [vmem:[#allocation3 + $0x78] sm:$0xff] }
 0x32b   : > { %1969 = vst [vmem:[#allocation2 + $0x188] sm:$0xff] %v1841_v5 }
 0x32c   : > { %2007 = vst [vmem:[#allocation2 + $0x238] sm:$0xff] %v1879_v6  ;;  %1393 = vmatmul.bf16.gmra.mxu0 %v2996_v10  ;;  %v3044_v10 = vld [vmem:[#allocation3 + $0x1e0] sm:$0xff] }
 0x32d   : > { %1523 = vmatmul.bf16.gmra.mxu2 %v3022_v7  ;;  %1618 = vmatmul.bf16.gmra.mxu3 %v3041_v8  ;;  %1918 = vst [vmem:[#allocation2 + $0x380] sm:$0xff] %v1790_v19  ;;  %v1720_v19 = vld [vmem:[#allocation2 + $0x318] sm:$0xff] }
 0x330   : > { %v1484_v20 = vpop.f32.mrf.mxu2  ;;  %v1579_v21 = vpop.f32.mrf.mxu3 }
 0x331   : > { %v1842_v22 = vmax.f32 %v1714_v13, %v1484_v20  ;;  %v1880_v18 = vmax.f32 %v1752_v14, %v1579_v21  ;;  %v1356_v17 = vpop.f32.mrf.mxu0  ;;  %v3008_v13 = vld [vmem:[#allocation3 + $0xc0] sm:$0xff]  ;;  %v1668_v14 = vld [vmem:[#allocation2 + $0x108] sm:$0xff]  ;;  %v1758_v20 = vld [vmem:[#allocation2 + $0xf0] sm:$0xff] }
 0x332   : > { %v1791_v24 = vmax.f32 %v1663_v23, %v1356_v17  ;;  %1453 = vmatmul.bf16.gmra.mxu1 %v3008_v13 }
 0x333   : > { %1970 = vst [vmem:[#allocation2 + $0x1d8] sm:$0xff] %v1842_v22 }
 0x334   : > { %2008 = vst [vmem:[#allocation2 + $0x398] sm:$0xff] %v1880_v18 }
 0x335   : > { %1919 = vst [vmem:[#allocation2 + $0x110] sm:$0xff] %v1791_v24 }
 0x338   : > { %v1486_v26 = vpop.f32.mrf.mxu2  ;;  %v1581_v15 = vpop.f32.mrf.mxu3 }
 0x339   : > { %v1843_v27 = vmax.f32 %v1715_v16, %v1486_v26  ;;  %v1881_v28 = vmax.f32 %v1753_v25, %v1581_v15  ;;  %v1359_v31 = vpop.f32.mrf.mxu0  ;;  %v1669_v16 = vld [vmem:[#allocation2 + $0x60] sm:$0xff] }
 0x33a   : > { %v1792_v37 = vmax.f32 %v1664_v34, %v1359_v31  ;;  %v1721_v26 = vld [vmem:[#allocation2 + $0x220] sm:$0xff]  ;;  %v3026_v31 = vld [vmem:[#allocation3 + $0x150] sm:$0xff]  ;;  %v1419_v34 = vpop.f32.mrf.mxu1 }
 0x33b   : > { %1971 = vst [vmem:[#allocation2 + $0x30] sm:$0xff] %v1843_v27  ;;  %v1759_v15 = vld [vmem:[#allocation2 + $0x180] sm:$0xff] }
 0x33c   : > { %2009 = vst [vmem:[#allocation2 + $0x390] sm:$0xff] %v1881_v28  ;;  %1398 = vmatmul.bf16.gmra.mxu0 %v2997_v32  ;;  %v3045_v32 = vld [vmem:[#allocation3 + $0x1e8] sm:$0xff] }
 0x33d   : > { %1528 = vmatmul.bf16.gmra.mxu2 %v3023_v29  ;;  %1623 = vmatmul.bf16.gmra.mxu3 %v3042_v30  ;;  %1920 = vst [vmem:[#allocation2 + $0x118] sm:$0xff] %v1792_v37  ;;  %v1670_v37 = vld [vmem:[#allocation2 + $0x2e0] sm:$0xff] }
 0x340   : > { %v1489_v38 = vpop.f32.mrf.mxu2  ;;  %v1584_v39 = vpop.f32.mrf.mxu3 }
 0x341   : > { %v1844_v40 = vmax.f32 %v1716_v35, %v1489_v38  ;;  %v1882_v41 = vmax.f32 %v1754_v36, %v1584_v39  ;;  %v1361_v42 = vpop.f32.mrf.mxu0  ;;  %v3000_v35 = vld [vmem:[#allocation3 + $0x80] sm:$0xff]  ;;  %v3009_v36 = vld [vmem:[#allocation3 + $0xc8] sm:$0xff]  ;;  %v1688_v38 = vld [vmem:[#allocation2 + $0x158] sm:$0xff] }
 0x342   : > { %v1793_v44 = vmax.f32 %v1665_v43, %v1361_v42  ;;  %1458 = vmatmul.bf16.gmra.mxu1 %v3009_v36  ;;  %v1722_v39 = vld [vmem:[#allocation2 + $0x70] sm:$0xff]  ;;  %v1816_v42 = vmax.f32 %v1688_v38, %v1419_v34  ;;  %v1675_v36 = vld [vmem:[#allocation2 + $0x1a8] sm:$0xff] }
 0x343   : > { %1972 = vst [vmem:[#allocation2 + $0x140] sm:$0xff] %v1844_v40  ;;  %v1760_v40 = vld [vmem:[#allocation2 + $0x170] sm:$0xff]  ;;  %v1693_v38 = vld [vmem:[#allocation2 + $0x128] sm:$0xff] }
 0x344   : > { %2010 = vst [vmem:[#allocation2 + $0x1a0] sm:$0xff] %v1882_v41 }
 0x345   : > { %1921 = vst [vmem:[#allocation2 + $0x98] sm:$0xff] %v1793_v44 }
 0x346   : > { %1944 = vst [vmem:[#allocation2 + $0x158] sm:$0xff] %v1816_v42  ;;  %v1765_v42 = vld [vmem:[#allocation2 + $0x38] sm:$0xff] }
 0x348   : > { %v1491_v47 = vpop.f32.mrf.mxu2  ;;  %v1586_v48 = vpop.f32.mrf.mxu3 }
 0x349   : > { %v1845_v49 = vmax.f32 %v1717_v45, %v1491_v47  ;;  %v1883_v50 = vmax.f32 %v1755_v46, %v1586_v48  ;;  %v1364_v53 = vpop.f32.mrf.mxu0  ;;  %v1671_v48 = vld [vmem:[#allocation2 + $0x388] sm:$0xff] }
 0x34a   : > { %v1794_v59 = vmax.f32 %v1666_v56, %v1364_v53  ;;  %v1723_v53 = vld [vmem:[#allocation2 + $0x300] sm:$0xff] }
 0x34b   : > { %1973 = vst [vmem:[#allocation2 + $0x2a8] sm:$0xff] %v1845_v49  ;;  %v1421_v49 = vpop.f32.mrf.mxu1 }
 0x34c   : > { %2011 = vst [vmem:[#allocation2 + $0xa8] sm:$0xff] %v1883_v50  ;;  %1403 = vmatmul.bf16.gmra.mxu0 %v2998_v54  ;;  %v1689_v50 = vld [vmem:[#allocation2 + $0x3e0] sm:$0xff]  ;;  %v1761_v54 = vld [vmem:[#allocation2 + $0x3d0] sm:$0xff] }
 0x34d   : > { %1533 = vmatmul.bf16.gmra.mxu2 %v3024_v51  ;;  %1628 = vmatmul.bf16.gmra.mxu3 %v3043_v52  ;;  %1922 = vst [vmem:[#allocation2 + $0x320] sm:$0xff] %v1794_v59  ;;  %v1817_v52 = vmax.f32 %v1689_v50, %v1421_v49  ;;  %v3027_v59 = vld [vmem:[#allocation3 + $0x158] sm:$0xff]  ;;  %v1694_v50 = vld [vmem:[#allocation2 + $0x2a0] sm:$0xff] }
 0x34e   : > { %v1676_v49 = vld [vmem:[#allocation2 + $0x1b8] sm:$0xff] }
 0x34f   : > { %1945 = vst [vmem:[#allocation2 + $0x3e0] sm:$0xff] %v1817_v52 }
 0x350   : > { %v1494_v60 = vpop.f32.mrf.mxu2  ;;  %v1589_v61 = vpop.f32.mrf.mxu3 }
 0x351   : > { %v1846_v62 = vmax.f32 %v1718_v57, %v1494_v60  ;;  %v1884_v63 = vmax.f32 %v1756_v58, %v1589_v61  ;;  %v1366_v0 = vpop.f32.mrf.mxu0  ;;  %v3046_v60 = vld [vmem:[#allocation3 + $0x1f0] sm:$0xff] }
 0x352   : > { %v1795_v2 = vmax.f32 %v1667_v1, %v1366_v0  ;;  %v1690_v0 = vld [vmem:[#allocation2 + $0x218] sm:$0xff] }
 0x353   : > { %1974 = vst [vmem:[#allocation2 + $0x130] sm:$0xff] %v1846_v62  ;;  %v1424_v62 = vpop.f32.mrf.mxu1 }
 0x354   : > { %2012 = vst [vmem:[#allocation2 + $0x258] sm:$0xff] %v1884_v63  ;;  %v1672_v63 = vld [vmem:[#allocation2 + $0x338] sm:$0xff] }
 0x355   : > { %1923 = vst [vmem:[#allocation2 + $0x150] sm:$0xff] %v1795_v2  ;;  %v1818_v2 = vmax.f32 %v1690_v0, %v1424_v62  ;;  %v1695_v62 = vld [vmem:[#allocation2 + $0x3f0] sm:$0xff] }
 0x357   : > { %1946 = vst [vmem:[#allocation2 + $0x218] sm:$0xff] %v1818_v2  ;;  %v1767_v2 = vld [vmem:[#allocation2 + $0x308] sm:$0xff] }
 0x358   : > { %v1496_v5 = vpop.f32.mrf.mxu2  ;;  %v1591_v6 = vpop.f32.mrf.mxu3 }
 0x359   : > { %v1847_v7 = vmax.f32 %v1719_v3, %v1496_v5  ;;  %v1885_v8 = vmax.f32 %v1757_v4, %v1591_v6  ;;  %v1369_v11 = vpop.f32.mrf.mxu0  ;;  %v1724_v3 = vld [vmem:[#allocation2 + $0xe0] sm:$0xff]  ;;  %v1762_v4 = vld [vmem:[#allocation2 + $0x250] sm:$0xff] }
 0x35a   : > { %v1796_v21 = vmax.f32 %v1668_v14, %v1369_v11 }
 0x35b   : > { %1975 = vst [vmem:[#allocation2 + $0x200] sm:$0xff] %v1847_v7  ;;  %v1426_v11 = vpop.f32.mrf.mxu1 }
 0x35c   : > { %2013 = vst [vmem:[#allocation2 + $0x2d8] sm:$0xff] %v1885_v8  ;;  %1408 = vmatmul.bf16.gmra.mxu0 %v2999_v12  ;;  %v1691_v12 = vld [vmem:[#allocation2 + $0x3f8] sm:$0xff] }
 0x35d   : > { %1538 = vmatmul.bf16.gmra.mxu2 %v3025_v9  ;;  %1633 = vmatmul.bf16.gmra.mxu3 %v3044_v10  ;;  %1924 = vst [vmem:[#allocation2 + $0x108] sm:$0xff] %v1796_v21  ;;  %v1673_v10 = vld [vmem:[#allocation2 + $0x340] sm:$0xff]  ;;  %v1819_v14 = vmax.f32 %v1691_v12, %v1426_v11 }
 0x35f   : > { %1947 = vst [vmem:[#allocation2 + $0x3f8] sm:$0xff] %v1819_v14  ;;  %v1768_v14 = vld [vmem:[#allocation2 + $0x370] sm:$0xff] }
 0x360   : > { %v1499_v22 = vpop.f32.mrf.mxu2  ;;  %v1594_v18 = vpop.f32.mrf.mxu3 }
 0x361   : > { %v1848_v17 = vmax.f32 %v1720_v19, %v1499_v22  ;;  %v1886_v23 = vmax.f32 %v1758_v20, %v1594_v18  ;;  %v1371_v24 = vpop.f32.mrf.mxu0  ;;  %v1725_v19 = vld [vmem:[#allocation2 + $0x178] sm:$0xff] }
 0x362   : > { %v1797_v25 = vmax.f32 %v1669_v16, %v1371_v24  ;;  %v1763_v20 = vld [vmem:[#allocation2 + $0x378] sm:$0xff] }
 0x363   : > { %1976 = vst [vmem:[#allocation2 + $0x318] sm:$0xff] %v1848_v17  ;;  %v3047_v24 = vld [vmem:[#allocation3 + $0x1f8] sm:$0xff] }
 0x364   : > { %2014 = vst [vmem:[#allocation2 + $0xf0] sm:$0xff] %v1886_v23  ;;  %v3028_v23 = vld [vmem:[#allocation3 + $0x160] sm:$0xff] }
 0x365   : > { %1925 = vst [vmem:[#allocation2 + $0x60] sm:$0xff] %v1797_v25  ;;  %v1429_v25 = vpop.f32.mrf.mxu1 }
 0x368   : > { %v1501_v27 = vpop.f32.mrf.mxu2  ;;  %v1596_v28 = vpop.f32.mrf.mxu3 }
 0x369   : > { %v1849_v29 = vmax.f32 %v1721_v26, %v1501_v27  ;;  %v1887_v30 = vmax.f32 %v1759_v15, %v1596_v28  ;;  %v1374_v33 = vpop.f32.mrf.mxu0  ;;  %v1674_v26 = vld [vmem:[#allocation2 + $0x80] sm:$0xff]  ;;  %v1692_v15 = vld [vmem:[#allocation2 + $0x8] sm:$0xff] }
 0x36a   : > { %v1798_v41 = vmax.f32 %v1670_v37, %v1374_v33  ;;  %v1820_v28 = vmax.f32 %v1692_v15, %v1429_v25  ;;  %v1769_v15 = vld [vmem:[#allocation2 + $0xc8] sm:$0xff] }
 0x36b   : > { %1977 = vst [vmem:[#allocation2 + $0x220] sm:$0xff] %v1849_v29  ;;  %v1726_v29 = vld [vmem:[#allocation2 + $0x328] sm:$0xff] }
 0x36c   : > { %2015 = vst [vmem:[#allocation2 + $0x180] sm:$0xff] %v1887_v30  ;;  %1413 = vmatmul.bf16.gmra.mxu0 %v3000_v35  ;;  %v1764_v30 = vld [vmem:[#allocation2 + $0xb8] sm:$0xff] }
 0x36d   : > { %1543 = vmatmul.bf16.gmra.mxu2 %v3026_v31  ;;  %1638 = vmatmul.bf16.gmra.mxu3 %v3045_v32  ;;  %1926 = vst [vmem:[#allocation2 + $0x2e0] sm:$0xff] %v1798_v41  ;;  %v1431_v37 = vpop.f32.mrf.mxu1  ;;  %v1727_v41 = vld [vmem:[#allocation2 + $0x260] sm:$0xff] }
 0x36e   : > { %1948 = vst [vmem:[#allocation2 + $0x8] sm:$0xff] %v1820_v28 }
 0x370   : > { %v1504_v43 = vpop.f32.mrf.mxu2  ;;  %v1599_v44 = vpop.f32.mrf.mxu3 }
 0x371   : > { %v1850_v45 = vmax.f32 %v1722_v39, %v1504_v43  ;;  %v1888_v46 = vmax.f32 %v1760_v40, %v1599_v44  ;;  %v1376_v47 = vpop.f32.mrf.mxu0  ;;  %v1821_v40 = vmax.f32 %v1693_v38, %v1431_v37  ;;  %v1732_v37 = vld [vmem:[#allocation2 + $0x20] sm:$0xff]  ;;  %v1770_v38 = vld [vmem:[#allocation2 + $0x278] sm:$0xff] }
 0x372   : > { %v1799_v51 = vmax.f32 %v1671_v48, %v1376_v47 }
 0x373   : > { %1978 = vst [vmem:[#allocation2 + $0x70] sm:$0xff] %v1850_v45 }
 0x374   : > { %2016 = vst [vmem:[#allocation2 + $0x170] sm:$0xff] %v1888_v46 }
 0x375   : > { %1927 = vst [vmem:[#allocation2 + $0x388] sm:$0xff] %v1799_v51  ;;  %v1434_v48 = vpop.f32.mrf.mxu1 }
 0x376   : > { %1949 = vst [vmem:[#allocation2 + $0x128] sm:$0xff] %v1821_v40  ;;  %v1822_v52 = vmax.f32 %v1694_v50, %v1434_v48  ;;  %v1771_v50 = vld [vmem:[#allocation2 + $0x360] sm:$0xff] }
 0x378   : > { %v1506_v55 = vpop.f32.mrf.mxu2  ;;  %v1601_v56 = vpop.f32.mrf.mxu3  ;;  %1950 = vst [vmem:[#allocation2 + $0x2a0] sm:$0xff] %v1822_v52 }
 0x379   : > { %v1851_v57 = vmax.f32 %v1723_v53, %v1506_v55  ;;  %v1889_v58 = vmax.f32 %v1761_v54, %v1601_v56  ;;  %v1379_v61 = vpop.f32.mrf.mxu0  ;;  %v1728_v53 = vld [vmem:[#allocation2 + $0x3b8] sm:$0xff] }
 0x37a   : > { %v1800_v1 = vmax.f32 %v1672_v63, %v1379_v61  ;;  %v1766_v54 = vld [vmem:[#allocation2 + $0x78] sm:$0xff] }
 0x37b   : > { %1979 = vst [vmem:[#allocation2 + $0x300] sm:$0xff] %v1851_v57 }
 0x37c   : > { %2017 = vst [vmem:[#allocation2 + $0x3d0] sm:$0xff] %v1889_v58 }
 0x37d   : > { %1548 = vmatmul.bf16.gmra.mxu2 %v3027_v59  ;;  %1643 = vmatmul.bf16.gmra.mxu3 %v3046_v60  ;;  %1928 = vst [vmem:[#allocation2 + $0x338] sm:$0xff] %v1800_v1  ;;  %v1677_v60 = vld [vmem:[#allocation2 + $0x168] sm:$0xff]  ;;  %v1436_v61 = vpop.f32.mrf.mxu1  ;;  %v1729_v1 = vld [vmem:[#allocation2 + $0x2b8] sm:$0xff] }
 0x37e   : > { %v1823_v0 = vmax.f32 %v1695_v62, %v1436_v61  ;;  %v1734_v61 = vld [vmem:[#allocation2 + $0x288] sm:$0xff] }
 0x37f   : > { %v1772_v62 = vld [vmem:[#allocation2 + $0x228] sm:$0xff] }
 0x380   : > { %v1509_v5 = vpop.f32.mrf.mxu2  ;;  %v1604_v6 = vpop.f32.mrf.mxu3  ;;  %1951 = vst [vmem:[#allocation2 + $0x3f0] sm:$0xff] %v1823_v0 }
 0x381   : > { %v1852_v7 = vmax.f32 %v1724_v3, %v1509_v5  ;;  %v1890_v8 = vmax.f32 %v1762_v4, %v1604_v6  ;;  %v1381_v9 = vpop.f32.mrf.mxu0 }
 0x382   : > { %v1801_v13 = vmax.f32 %v1673_v10, %v1381_v9  ;;  %v1678_v9 = vld [vmem:[#allocation2 + $0x3e8] sm:$0xff]  ;;  %v1696_v10 = vld [vmem:[#allocation2 + $0xa0] sm:$0xff] }
 0x383   : > { %1980 = vst [vmem:[#allocation2 + $0xe0] sm:$0xff] %v1852_v7 }
 0x384   : > { %2018 = vst [vmem:[#allocation2 + $0x250] sm:$0xff] %v1890_v8 }
 0x385   : > { %1929 = vst [vmem:[#allocation2 + $0x340] sm:$0xff] %v1801_v13  ;;  %v1439_v8 = vpop.f32.mrf.mxu1  ;;  %v1730_v13 = vld [vmem:[#allocation2 + $0x248] sm:$0xff] }
 0x386   : > { %v1824_v12 = vmax.f32 %v1696_v10, %v1439_v8  ;;  %v1773_v10 = vld [vmem:[#allocation2 + $0x348] sm:$0xff] }
 0x388   : > { %v1511_v21 = vpop.f32.mrf.mxu2  ;;  %v1606_v22 = vpop.f32.mrf.mxu3  ;;  %1952 = vst [vmem:[#allocation2 + $0xa0] sm:$0xff] %v1824_v12 }
 0x389   : > { %v1853_v18 = vmax.f32 %v1725_v19, %v1511_v21  ;;  %v1891_v17 = vmax.f32 %v1763_v20, %v1606_v22  ;;  %v1384_v16 = vpop.f32.mrf.mxu0 }
 0x38a   : > { %v1802_v27 = vmax.f32 %v1674_v26, %v1384_v16  ;;  %v1731_v26 = vld [vmem:[#allocation2 + $0x40] sm:$0xff] }
 0x38b   : > { %1981 = vst [vmem:[#allocation2 + $0x178] sm:$0xff] %v1853_v18 }
 0x38c   : > { %2019 = vst [vmem:[#allocation2 + $0x378] sm:$0xff] %v1891_v17  ;;  %v1679_v17 = vld [vmem:[#allocation2 + $0x2f8] sm:$0xff] }
 0x38d   : > { %1553 = vmatmul.bf16.gmra.mxu2 %v3028_v23  ;;  %1648 = vmatmul.bf16.gmra.mxu3 %v3047_v24  ;;  %1930 = vst [vmem:[#allocation2 + $0x80] sm:$0xff] %v1802_v27  ;;  %v1441_v23 = vpop.f32.mrf.mxu1  ;;  %v1697_v24 = vld [vmem:[#allocation2 + $0x2c0] sm:$0xff] }
 0x38e   : > { %v1825_v25 = vmax.f32 %v1697_v24, %v1441_v23  ;;  %v1736_v23 = vld [vmem:[#allocation2 + $0x3c8] sm:$0xff] }
 0x38f   : > { %v1774_v24 = vld [vmem:[#allocation2 + $0x148] sm:$0xff] }
 0x390   : > { %v1514_v31 = vpop.f32.mrf.mxu2  ;;  %v1609_v32 = vpop.f32.mrf.mxu3  ;;  %1953 = vst [vmem:[#allocation2 + $0x2c0] sm:$0xff] %v1825_v25 }
 0x391   : > { %v1854_v33 = vmax.f32 %v1726_v29, %v1514_v31  ;;  %v1892_v34 = vmax.f32 %v1764_v30, %v1609_v32  ;;  %v1386_v35 = vpop.f32.mrf.mxu0 }
 0x392   : > { %v1803_v39 = vmax.f32 %v1675_v36, %v1386_v35 }
 0x393   : > { %1982 = vst [vmem:[#allocation2 + $0x328] sm:$0xff] %v1854_v33  ;;  %v1680_v33 = vld [vmem:[#allocation2 + $0x290] sm:$0xff] }
 0x394   : > { %2020 = vst [vmem:[#allocation2 + $0xb8] sm:$0xff] %v1892_v34  ;;  %v1698_v34 = vld [vmem:[#allocation2 + $0xb0] sm:$0xff] }
 0x395   : > { %1931 = vst [vmem:[#allocation2 + $0x1a8] sm:$0xff] %v1803_v39  ;;  %v1444_v32 = vpop.f32.mrf.mxu1 }
 0x396   : > { %v1826_v36 = vmax.f32 %v1698_v34, %v1444_v32  ;;  %v1775_v34 = vld [vmem:[#allocation2 + $0xf8] sm:$0xff] }
 0x398   : > { %v1516_v43 = vpop.f32.mrf.mxu2  ;;  %v1611_v44 = vpop.f32.mrf.mxu3  ;;  %1954 = vst [vmem:[#allocation2 + $0xb0] sm:$0xff] %v1826_v36 }
 0x399   : > { %v1855_v45 = vmax.f32 %v1727_v41, %v1516_v43  ;;  %v1893_v46 = vmax.f32 %v1765_v42, %v1611_v44  ;;  %v1389_v47 = vpop.f32.mrf.mxu0  ;;  %v1681_v44 = vld [vmem:[#allocation2 + $0x28] sm:$0xff] }
 0x39a   : > { %v1804_v51 = vmax.f32 %v1676_v49, %v1389_v47  ;;  %v1733_v49 = vld [vmem:[#allocation2 + $0xe8] sm:$0xff] }
 0x39b   : > { %1983 = vst [vmem:[#allocation2 + $0x260] sm:$0xff] %v1855_v45 }
 0x39c   : > { %2021 = vst [vmem:[#allocation2 + $0x38] sm:$0xff] %v1893_v46  ;;  %v1699_v46 = vld [vmem:[#allocation2 + $0x1e0] sm:$0xff] }
 0x39d   : > { %1932 = vst [vmem:[#allocation2 + $0x1b8] sm:$0xff] %v1804_v51  ;;  %v1446_v45 = vpop.f32.mrf.mxu1 }
 0x39e   : > { %v1827_v48 = vmax.f32 %v1699_v46, %v1446_v45  ;;  %v1738_v45 = vld [vmem:[#allocation2 + $0x2c8] sm:$0xff] }
 0x39f   : > { %v1776_v46 = vld [vmem:[#allocation2 + $0x68] sm:$0xff] }
 0x3a0   : > { %v1519_v55 = vpop.f32.mrf.mxu2  ;;  %v1614_v56 = vpop.f32.mrf.mxu3  ;;  %1955 = vst [vmem:[#allocation2 + $0x1e0] sm:$0xff] %v1827_v48 }
 0x3a1   : > { %v1856_v57 = vmax.f32 %v1728_v53, %v1519_v55  ;;  %v1894_v58 = vmax.f32 %v1766_v54, %v1614_v56  ;;  %v1391_v59 = vpop.f32.mrf.mxu0 }
 0x3a2   : > { %v1805_v63 = vmax.f32 %v1677_v60, %v1391_v59 }
 0x3a3   : > { %1984 = vst [vmem:[#allocation2 + $0x3b8] sm:$0xff] %v1856_v57  ;;  %v1682_v57 = vld [vmem:[#allocation2 + $0x138] sm:$0xff] }
 0x3a4   : > { %2022 = vst [vmem:[#allocation2 + $0x78] sm:$0xff] %v1894_v58  ;;  %v1700_v58 = vld [vmem:[#allocation2 + $0x1f0] sm:$0xff] }
 0x3a5   : > { %1933 = vst [vmem:[#allocation2 + $0x168] sm:$0xff] %v1805_v63  ;;  %v1449_v56 = vpop.f32.mrf.mxu1 }
 0x3a6   : > { %v1828_v60 = vmax.f32 %v1700_v58, %v1449_v56  ;;  %v1777_v58 = vld [vmem:[#allocation2] sm:$0xff] }
 0x3a8   : > { %v1521_v3 = vpop.f32.mrf.mxu2  ;;  %v1616_v4 = vpop.f32.mrf.mxu3  ;;  %1956 = vst [vmem:[#allocation2 + $0x1f0] sm:$0xff] %v1828_v60 }
 0x3a9   : > { %v1857_v5 = vmax.f32 %v1729_v1, %v1521_v3  ;;  %v1895_v6 = vmax.f32 %v1767_v2, %v1616_v4  ;;  %v1394_v7 = vpop.f32.mrf.mxu0  ;;  %v1683_v4 = vld [vmem:[#allocation2 + $0xc0] sm:$0xff] }
 0x3aa   : > { %v1806_v11 = vmax.f32 %v1678_v9, %v1394_v7  ;;  %v1735_v9 = vld [vmem:[#allocation2 + $0x3a8] sm:$0xff] }
 0x3ab   : > { %1985 = vst [vmem:[#allocation2 + $0x2b8] sm:$0xff] %v1857_v5 }
 0x3ac   : > { %2023 = vst [vmem:[#allocation2 + $0x308] sm:$0xff] %v1895_v6  ;;  %v1701_v6 = vld [vmem:[#allocation2 + $0x10] sm:$0xff] }
 0x3ad   : > { %1934 = vst [vmem:[#allocation2 + $0x3e8] sm:$0xff] %v1806_v11  ;;  %v1451_v5 = vpop.f32.mrf.mxu1 }
 0x3ae   : > { %v1829_v8 = vmax.f32 %v1701_v6, %v1451_v5  ;;  %v1741_v5 = vld [vmem:[#allocation2 + $0x1e8] sm:$0xff]  ;;  %v1779_v6 = vld [vmem:[#allocation2 + $0x270] sm:$0xff] }
 0x3b0   : > { %v1524_v19 = vpop.f32.mrf.mxu2  ;;  %v1619_v20 = vpop.f32.mrf.mxu3  ;;  %1957 = vst [vmem:[#allocation2 + $0x10] sm:$0xff] %v1829_v8 }
 0x3b1   : > { %v1858_v21 = vmax.f32 %v1730_v13, %v1524_v19  ;;  %v1896_v22 = vmax.f32 %v1768_v14, %v1619_v20  ;;  %v1396_v18 = vpop.f32.mrf.mxu0 }
 0x3b2   : > { %v1807_v16 = vmax.f32 %v1679_v17, %v1396_v18 }
 0x3b3   : > { %1986 = vst [vmem:[#allocation2 + $0x248] sm:$0xff] %v1858_v21  ;;  %v1684_v21 = vld [vmem:[#allocation2 + $0x1c0] sm:$0xff] }
 0x3b4   : > { %2024 = vst [vmem:[#allocation2 + $0x370] sm:$0xff] %v1896_v22  ;;  %v1702_v22 = vld [vmem:[#allocation2 + $0x230] sm:$0xff] }
 0x3b5   : > { %1935 = vst [vmem:[#allocation2 + $0x2f8] sm:$0xff] %v1807_v16  ;;  %v1454_v20 = vpop.f32.mrf.mxu1 }
 0x3b6   : > { %v1830_v17 = vmax.f32 %v1702_v22, %v1454_v20  ;;  %v1781_v22 = vld [vmem:[#allocation2 + $0x190] sm:$0xff] }
 0x3b8   : > { %v1526_v27 = vpop.f32.mrf.mxu2  ;;  %v1621_v28 = vpop.f32.mrf.mxu3  ;;  %1958 = vst [vmem:[#allocation2 + $0x230] sm:$0xff] %v1830_v17 }
 0x3b9   : > { %v1859_v29 = vmax.f32 %v1731_v26, %v1526_v27  ;;  %v1897_v30 = vmax.f32 %v1769_v15, %v1621_v28  ;;  %v1399_v31 = vpop.f32.mrf.mxu0  ;;  %v1685_v28 = vld [vmem:[#allocation2 + $0x280] sm:$0xff] }
 0x3ba   : > { %v1808_v35 = vmax.f32 %v1680_v33, %v1399_v31  ;;  %v1737_v33 = vld [vmem:[#allocation2 + $0x160] sm:$0xff] }
 0x3bb   : > { %1987 = vst [vmem:[#allocation2 + $0x40] sm:$0xff] %v1859_v29 }
 0x3bc   : > { %2025 = vst [vmem:[#allocation2 + $0xc8] sm:$0xff] %v1897_v30  ;;  %v1703_v30 = vld [vmem:[#allocation2 + $0x240] sm:$0xff] }
 0x3bd   : > { %1936 = vst [vmem:[#allocation2 + $0x290] sm:$0xff] %v1808_v35  ;;  %v1456_v29 = vpop.f32.mrf.mxu1 }
 0x3be   : > { %v1831_v32 = vmax.f32 %v1703_v30, %v1456_v29 }
 0x3c0   : > { %v1529_v39 = vpop.f32.mrf.mxu2  ;;  %v1624_v40 = vpop.f32.mrf.mxu3  ;;  %1959 = vst [vmem:[#allocation2 + $0x240] sm:$0xff] %v1831_v32 }
 0x3c1   : > { %v1860_v41 = vmax.f32 %v1732_v37, %v1529_v39  ;;  %v1898_v42 = vmax.f32 %v1770_v38, %v1624_v40  ;;  %v1401_v43 = vpop.f32.mrf.mxu0 }
 0x3c2   : > { %v1809_v47 = vmax.f32 %v1681_v44, %v1401_v43 }
 0x3c3   : > { %1988 = vst [vmem:[#allocation2 + $0x20] sm:$0xff] %v1860_v41  ;;  %v1686_v41 = vld [vmem:[#allocation2 + $0x100] sm:$0xff] }
 0x3c4   : > { %2026 = vst [vmem:[#allocation2 + $0x278] sm:$0xff] %v1898_v42  ;;  %v1704_v42 = vld [vmem:[#allocation2 + $0x90] sm:$0xff] }
 0x3c5   : > { %1937 = vst [vmem:[#allocation2 + $0x28] sm:$0xff] %v1809_v47  ;;  %v1459_v40 = vpop.f32.mrf.mxu1 }
 0x3c6   : > { %v1832_v44 = vmax.f32 %v1704_v42, %v1459_v40 }
 0x3c8   : > { %v1531_v51 = vpop.f32.mrf.mxu2  ;;  %v1626_v52 = vpop.f32.mrf.mxu3  ;;  %1960 = vst [vmem:[#allocation2 + $0x90] sm:$0xff] %v1832_v44 }
 0x3c9   : > { %v1861_v53 = vmax.f32 %v1733_v49, %v1531_v51  ;;  %v1899_v54 = vmax.f32 %v1771_v50, %v1626_v52  ;;  %v1404_v55 = vpop.f32.mrf.mxu0  ;;  %v1687_v52 = vld [vmem:[#allocation2 + $0x3c0] sm:$0xff] }
 0x3ca   : > { %v1810_v59 = vmax.f32 %v1682_v57, %v1404_v55  ;;  %v1739_v57 = vld [vmem:[#allocation2 + $0x210] sm:$0xff] }
 0x3cb   : > { %1989 = vst [vmem:[#allocation2 + $0xe8] sm:$0xff] %v1861_v53 }
 0x3cc   : > { %2027 = vst [vmem:[#allocation2 + $0x360] sm:$0xff] %v1899_v54  ;;  %v1705_v54 = vld [vmem:[#allocation2 + $0x3a0] sm:$0xff] }
 0x3cd   : > { %1938 = vst [vmem:[#allocation2 + $0x138] sm:$0xff] %v1810_v59  ;;  %v1461_v53 = vpop.f32.mrf.mxu1 }
 0x3ce   : > { %v1833_v56 = vmax.f32 %v1705_v54, %v1461_v53 }
 0x3d0   : > { %v1534_v63 = vpop.f32.mrf.mxu2  ;;  %v1629_v0 = vpop.f32.mrf.mxu3  ;;  %1961 = vst [vmem:[#allocation2 + $0x3a0] sm:$0xff] %v1833_v56 }
 0x3d1   : > { %v1862_v1 = vmax.f32 %v1734_v61, %v1534_v63  ;;  %v1900_v2 = vmax.f32 %v1772_v62, %v1629_v0  ;;  %v1406_v3 = vpop.f32.mrf.mxu0  ;;  %v1740_v63 = vld [vmem:[#allocation2 + $0x3d8] sm:$0xff] }
 0x3d2   : > { %v1811_v7 = vmax.f32 %v1683_v4, %v1406_v3  ;;  %v1778_v0 = vld [vmem:[#allocation2 + $0x298] sm:$0xff] }
 0x3d3   : > { %1990 = vst [vmem:[#allocation2 + $0x288] sm:$0xff] %v1862_v1 }
 0x3d4   : > { %2028 = vst [vmem:[#allocation2 + $0x228] sm:$0xff] %v1900_v2 }
 0x3d5   : > { %1939 = vst [vmem:[#allocation2 + $0xc0] sm:$0xff] %v1811_v7 }
 0x3d8   : > { %v1536_v11 = vpop.f32.mrf.mxu2  ;;  %v1631_v12 = vpop.f32.mrf.mxu3 }
 0x3d9   : > { %v1863_v13 = vmax.f32 %v1735_v9, %v1536_v11  ;;  %v1901_v14 = vmax.f32 %v1773_v10, %v1631_v12  ;;  %v1409_v19 = vpop.f32.mrf.mxu0  ;;  %v1742_v11 = vld [vmem:[#allocation2 + $0x1b0] sm:$0xff] }
 0x3da   : > { %v1812_v18 = vmax.f32 %v1684_v21, %v1409_v19  ;;  %v1780_v12 = vld [vmem:[#allocation2 + $0x310] sm:$0xff]  ;;  %v1743_v21 = vld [vmem:[#allocation2 + $0x1c8] sm:$0xff] }
 0x3db   : > { %1991 = vst [vmem:[#allocation2 + $0x3a8] sm:$0xff] %v1863_v13 }
 0x3dc   : > { %2029 = vst [vmem:[#allocation2 + $0x348] sm:$0xff] %v1901_v14 }
 0x3dd   : > { %1940 = vst [vmem:[#allocation2 + $0x1c0] sm:$0xff] %v1812_v18 }
 0x3e0   : > { %v1539_v16 = vpop.f32.mrf.mxu2  ;;  %v1634_v25 = vpop.f32.mrf.mxu3 }
 0x3e1   : > { %v1864_v26 = vmax.f32 %v1736_v23, %v1539_v16  ;;  %v1902_v15 = vmax.f32 %v1774_v24, %v1634_v25  ;;  %v1411_v27 = vpop.f32.mrf.mxu0 }
 0x3e2   : > { %v1813_v31 = vmax.f32 %v1685_v28, %v1411_v27 }
 0x3e3   : > { %1992 = vst [vmem:[#allocation2 + $0x3c8] sm:$0xff] %v1864_v26 }
 0x3e4   : > { %2030 = vst [vmem:[#allocation2 + $0x148] sm:$0xff] %v1902_v15 }
 0x3e5   : > { %1941 = vst [vmem:[#allocation2 + $0x280] sm:$0xff] %v1813_v31 }
 0x3e8   : > { %v1541_v35 = vpop.f32.mrf.mxu2  ;;  %v1636_v36 = vpop.f32.mrf.mxu3 }
 0x3e9   : > { %v1865_v37 = vmax.f32 %v1737_v33, %v1541_v35  ;;  %v1903_v38 = vmax.f32 %v1775_v34, %v1636_v36  ;;  %v1414_v39 = vpop.f32.mrf.mxu0 }
 0x3ea   : > { %v1814_v43 = vmax.f32 %v1686_v41, %v1414_v39 }
 0x3eb   : > { %1993 = vst [vmem:[#allocation2 + $0x160] sm:$0xff] %v1865_v37 }
 0x3ec   : > { %2031 = vst [vmem:[#allocation2 + $0xf8] sm:$0xff] %v1903_v38 }
 0x3ed   : > { %1942 = vst [vmem:[#allocation2 + $0x100] sm:$0xff] %v1814_v43 }
 0x3f0   : > { %v1544_v47 = vpop.f32.mrf.mxu2  ;;  %v1639_v48 = vpop.f32.mrf.mxu3 }
 0x3f1   : > { %v1866_v49 = vmax.f32 %v1738_v45, %v1544_v47  ;;  %v1904_v50 = vmax.f32 %v1776_v46, %v1639_v48  ;;  %v1416_v51 = vpop.f32.mrf.mxu0 }
 0x3f2   : > { %v1815_v55 = vmax.f32 %v1687_v52, %v1416_v51 }
 0x3f3   : > { %1994 = vst [vmem:[#allocation2 + $0x2c8] sm:$0xff] %v1866_v49 }
 0x3f4   : > { %2032 = vst [vmem:[#allocation2 + $0x68] sm:$0xff] %v1904_v50 }
 0x3f5   : > { %1943 = vst [vmem:[#allocation2 + $0x3c0] sm:$0xff] %v1815_v55 }
 0x3f8   : > { %v1546_v59 = vpop.f32.mrf.mxu2  ;;  %v1641_v60 = vpop.f32.mrf.mxu3 }
 0x3f9   : > { %v1867_v61 = vmax.f32 %v1739_v57, %v1546_v59  ;;  %v1905_v62 = vmax.f32 %v1777_v58, %v1641_v60 }
 0x3fb   : > { %1995 = vst [vmem:[#allocation2 + $0x210] sm:$0xff] %v1867_v61 }
 0x3fc   : > { %2033 = vst [vmem:[#allocation2] sm:$0xff] %v1905_v62 }
 0x400   : > { %v1549_v1 = vpop.f32.mrf.mxu2  ;;  %v1644_v2 = vpop.f32.mrf.mxu3 }
 0x401   : > { %v1868_v3 = vmax.f32 %v1740_v63, %v1549_v1  ;;  %v1906_v4 = vmax.f32 %v1778_v0, %v1644_v2 }
 0x403   : > { %1996 = vst [vmem:[#allocation2 + $0x3d8] sm:$0xff] %v1868_v3 }
 0x404   : > { %2034 = vst [vmem:[#allocation2 + $0x298] sm:$0xff] %v1906_v4 }
 0x408   : > { %v1551_v7 = vpop.f32.mrf.mxu2  ;;  %v1646_v8 = vpop.f32.mrf.mxu3 }
 0x409   : > { %v1869_v9 = vmax.f32 %v1741_v5, %v1551_v7  ;;  %v1907_v10 = vmax.f32 %v1779_v6, %v1646_v8 }
 0x40b   : > { %1997 = vst [vmem:[#allocation2 + $0x1e8] sm:$0xff] %v1869_v9 }
 0x40c   : > { %2035 = vst [vmem:[#allocation2 + $0x270] sm:$0xff] %v1907_v10 }
 0x410   : > { %v1554_v13 = vpop.f32.mrf.mxu2  ;;  %v1649_v14 = vpop.f32.mrf.mxu3 }
 0x411   : > { %v1870_v19 = vmax.f32 %v1742_v11, %v1554_v13  ;;  %v1908_v20 = vmax.f32 %v1780_v12, %v1649_v14 }
 0x413   : > { %1998 = vst [vmem:[#allocation2 + $0x1b0] sm:$0xff] %v1870_v19 }
 0x414   : > { %2036 = vst [vmem:[#allocation2 + $0x310] sm:$0xff] %v1908_v20 }
 0x418   : > { %v1556_v18 = vpop.f32.mrf.mxu2  ;;  %v1651_v17 = vpop.f32.mrf.mxu3  ;;  %2041 = sbr.rel (%p2968_p11) target bundleno = 1508 (0x5e4), region = 56 }
 0x419   : > { %v1871_v23 = vmax.f32 %v1743_v21, %v1556_v18  ;;  %v1909_v24 = vmax.f32 %v1781_v22, %v1651_v17 }
 0x41b   : > { %1999 = vst [vmem:[#allocation2 + $0x1c8] sm:$0xff] %v1871_v23 }
 0x41c   : > { %2037 = vst [vmem:[#allocation2 + $0x190] sm:$0xff] %v1909_v24 }
 0x41d   : > { %v2044_v16 = vld [vmem:[#allocation2 + $0xd8] sm:$0xff]  ;;  %v2042_v25 = vld [vmem:[#allocation2 + $0x2b0] sm:$0xff]  ;;  %v2047_v28 = vld [vmem:[#allocation2 + $0x368] sm:$0xff]  ;;  %vm2426_vm4 = vcmask 7168  }
 0x41e   : > { %v2046_v26 = vld [vmem:[#allocation2 + $0x50] sm:$0xff]  ;;  %2174 = vmax.xlane.f32.xlu1 %v2044_v16  ;;  %2170 = vmax.xlane.f32.xlu0 %v2042_v25  ;;  %v2045_v15 = vld [vmem:[#allocation2 + $0x18] sm:$0xff]  ;;  %v2049_v29 = vld [vmem:[#allocation2 + $0x48] sm:$0xff] }
 0x41f   : > { %2178 = vmax.xlane.f32.xlu2 %v2046_v26  ;;  %v2043_v27 = vld [vmem:[#allocation2 + $0x3b0] sm:$0xff]  ;;  %v2050_v31 = vld [vmem:[#allocation2 + $0x380] sm:$0xff]  ;;  %v2052_v32 = vld [vmem:[#allocation2 + $0x118] sm:$0xff] }
 0x420   : > { %v2048_v30 = vld [vmem:[#allocation2 + $0x330] sm:$0xff]  ;;  %v2053_v34 = vld [vmem:[#allocation2 + $0x98] sm:$0xff]  ;;  %v2054_v36 = vld [vmem:[#allocation2 + $0x320] sm:$0xff] }
 0x421   : > { %v2051_v33 = vld [vmem:[#allocation2 + $0x110] sm:$0xff]  ;;  %v2056_v37 = vld [vmem:[#allocation2 + $0x108] sm:$0xff]  ;;  %v2058_v38 = vld [vmem:[#allocation2 + $0x2e0] sm:$0xff] }
 0x422   : > { %v2055_v35 = vld [vmem:[#allocation2 + $0x150] sm:$0xff]  ;;  %v2057_v39 = vld [vmem:[#allocation2 + $0x60] sm:$0xff]  ;;  %v2059_v40 = vld [vmem:[#allocation2 + $0x388] sm:$0xff] }
 0x423   : > { %v2061_v41 = vld [vmem:[#allocation2 + $0x340] sm:$0xff]  ;;  %v2060_v42 = vld [vmem:[#allocation2 + $0x338] sm:$0xff]  ;;  %v2063_v45 = vld [vmem:[#allocation2 + $0x1a8] sm:$0xff] }
 0x424   : > { %v2062_v43 = vld [vmem:[#allocation2 + $0x80] sm:$0xff]  ;;  %v2064_v44 = vld [vmem:[#allocation2 + $0x1b8] sm:$0xff]  ;;  %v2065_v46 = vld [vmem:[#allocation2 + $0x168] sm:$0xff] }
 0x425   : > { %v2067_v47 = vld [vmem:[#allocation2 + $0x2f8] sm:$0xff]  ;;  %v2066_v48 = vld [vmem:[#allocation2 + $0x3e8] sm:$0xff]  ;;  %v2068_v49 = vld [vmem:[#allocation2 + $0x290] sm:$0xff] }
 0x426   : > { %2176 = vmax.xlane.f32.xlu1 %v2045_v15  ;;  %2172 = vmax.xlane.f32.xlu0 %v2043_v27  ;;  %v2070_v50 = vld [vmem:[#allocation2 + $0x138] sm:$0xff]  ;;  %v2069_v51 = vld [vmem:[#allocation2 + $0x28] sm:$0xff]  ;;  %v2071_v52 = vld [vmem:[#allocation2 + $0xc0] sm:$0xff] }
 0x427   : > { %2180 = vmax.xlane.f32.xlu2 %v2047_v28  ;;  %v2073_v53 = vld [vmem:[#allocation2 + $0x280] sm:$0xff]  ;;  %v2076_v56 = vld [vmem:[#allocation2 + $0x158] sm:$0xff]  ;;  %v2080_v61 = vld [vmem:[#allocation2 + $0x8] sm:$0xff] }
 0x428   : > { %v2072_v54 = vld [vmem:[#allocation2 + $0x1c0] sm:$0xff]  ;;  %v2079_v59 = vld [vmem:[#allocation2 + $0x3f8] sm:$0xff]  ;;  %v2081_v63 = vld [vmem:[#allocation2 + $0x128] sm:$0xff] }
 0x429   : > { %v2074_v55 = vld [vmem:[#allocation2 + $0x100] sm:$0xff]  ;;  %v2078_v60 = vld [vmem:[#allocation2 + $0x218] sm:$0xff]  ;;  %v2083_v0 = vld [vmem:[#allocation2 + $0x3f0] sm:$0xff] }
 0x42a   : > { %v2075_v57 = vld [vmem:[#allocation2 + $0x3c0] sm:$0xff]  ;;  %v2086_v3 = vld [vmem:[#allocation2 + $0xb0] sm:$0xff]  ;;  %v2094_v18 = vld [vmem:[#allocation2 + $0x208] sm:$0xff] }
 0x42b   : > { %v2077_v58 = vld [vmem:[#allocation2 + $0x3e0] sm:$0xff]  ;;  %v2088_v7 = vld [vmem:[#allocation2 + $0x1f0] sm:$0xff]  ;;  %v2096_v15 = vld [vmem:[#allocation2 + $0x88] sm:$0xff] }
 0x42c   : > { %v2082_v62 = vld [vmem:[#allocation2 + $0x2a0] sm:$0xff]  ;;  %v2089_v9 = vld [vmem:[#allocation2 + $0x10] sm:$0xff]  ;;  %v2098_v27 = vld [vmem:[#allocation2 + $0x358] sm:$0xff] }
 0x42d   : > { %v2085_v1 = vld [vmem:[#allocation2 + $0x2c0] sm:$0xff]  ;;  %v2090_v14 = vld [vmem:[#allocation2 + $0x230] sm:$0xff] }
 0x42e   : > { %2184 = vmax.xlane.f32.xlu1 %v2049_v29  ;;  %2182 = vmax.xlane.f32.xlu0 %v2048_v30  ;;  %v2084_v2 = vld [vmem:[#allocation2 + $0xa0] sm:$0xff]  ;;  %v2092_v19 = vld [vmem:[#allocation2 + $0x90] sm:$0xff] }
 0x42f   : > { %2186 = vmax.xlane.f32.xlu2 %v2050_v31  ;;  %v2087_v8 = vld [vmem:[#allocation2 + $0x1e0] sm:$0xff]  ;;  %v2095_v23 = vld [vmem:[#allocation2 + $0xd0] sm:$0xff] }
 0x430   : > { %v2091_v13 = vld [vmem:[#allocation2 + $0x240] sm:$0xff]  ;;  %v2097_v26 = vld [vmem:[#allocation2 + $0x2f0] sm:$0xff] }
 0x431   : > { %v2093_v17 = vld [vmem:[#allocation2 + $0x3a0] sm:$0xff]  ;;  %v2100_v31 = vld [vmem:[#allocation2 + $0x350] sm:$0xff] }
 0x436   : > { %2190 = vmax.xlane.f32.xlu1 %v2052_v32  ;;  %2188 = vmax.xlane.f32.xlu0 %v2051_v33  ;;  %v2099_v32 = vld [vmem:[#allocation2 + $0x268] sm:$0xff] }
 0x437   : > { %2192 = vmax.xlane.f32.xlu2 %v2053_v34  ;;  %v2101_v33 = vld [vmem:[#allocation2 + $0x188] sm:$0xff] }
 0x43e   : > { %2196 = vmax.xlane.f32.xlu1 %v2055_v35  ;;  %2194 = vmax.xlane.f32.xlu0 %v2054_v36 }
 0x43f   : > { %2198 = vmax.xlane.f32.xlu2 %v2056_v37  ;;  %v2103_v37 = vld [vmem:[#allocation2 + $0x30] sm:$0xff] }
 0x446   : > { %2202 = vmax.xlane.f32.xlu1 %v2058_v38  ;;  %2200 = vmax.xlane.f32.xlu0 %v2057_v39  ;;  %v2102_v38 = vld [vmem:[#allocation2 + $0x1d8] sm:$0xff]  ;;  %v2104_v39 = vld [vmem:[#allocation2 + $0x140] sm:$0xff] }
 0x447   : > { %2204 = vmax.xlane.f32.xlu2 %v2059_v40 }
 0x44e   : > { %2208 = vmax.xlane.f32.xlu1 %v2061_v41  ;;  %2206 = vmax.xlane.f32.xlu0 %v2060_v42 }
 0x44f   : > { %2210 = vmax.xlane.f32.xlu2 %v2062_v43  ;;  %v2106_v43 = vld [vmem:[#allocation2 + $0x130] sm:$0xff] }
 0x456   : > { %2214 = vmax.xlane.f32.xlu1 %v2064_v44  ;;  %2212 = vmax.xlane.f32.xlu0 %v2063_v45  ;;  %v2105_v44 = vld [vmem:[#allocation2 + $0x2a8] sm:$0xff]  ;;  %v2107_v45 = vld [vmem:[#allocation2 + $0x200] sm:$0xff] }
 0x457   : > { %2216 = vmax.xlane.f32.xlu2 %v2065_v46 }
 0x45e   : > { %2220 = vmax.xlane.f32.xlu1 %v2067_v47  ;;  %2218 = vmax.xlane.f32.xlu0 %v2066_v48 }
 0x45f   : > { %2222 = vmax.xlane.f32.xlu2 %v2068_v49  ;;  %v2109_v49 = vld [vmem:[#allocation2 + $0x220] sm:$0xff] }
 0x466   : > { %2226 = vmax.xlane.f32.xlu1 %v2070_v50  ;;  %2224 = vmax.xlane.f32.xlu0 %v2069_v51  ;;  %v2108_v50 = vld [vmem:[#allocation2 + $0x318] sm:$0xff]  ;;  %v2110_v51 = vld [vmem:[#allocation2 + $0x70] sm:$0xff] }
 0x467   : > { %2228 = vmax.xlane.f32.xlu2 %v2071_v52 }
 0x46e   : > { %2232 = vmax.xlane.f32.xlu1 %v2073_v53  ;;  %2230 = vmax.xlane.f32.xlu0 %v2072_v54 }
 0x46f   : > { %2234 = vmax.xlane.f32.xlu2 %v2074_v55  ;;  %v2112_v55 = vld [vmem:[#allocation2 + $0xe0] sm:$0xff] }
 0x476   : > { %2238 = vmax.xlane.f32.xlu1 %v2076_v56  ;;  %2236 = vmax.xlane.f32.xlu0 %v2075_v57  ;;  %v2111_v56 = vld [vmem:[#allocation2 + $0x300] sm:$0xff]  ;;  %v2113_v57 = vld [vmem:[#allocation2 + $0x178] sm:$0xff] }
 0x477   : > { %2240 = vmax.xlane.f32.xlu2 %v2077_v58 }
 0x47e   : > { %2244 = vmax.xlane.f32.xlu1 %v2079_v59  ;;  %2242 = vmax.xlane.f32.xlu0 %v2078_v60 }
 0x47f   : > { %2246 = vmax.xlane.f32.xlu2 %v2080_v61  ;;  %v2115_v61 = vld [vmem:[#allocation2 + $0x260] sm:$0xff] }
 0x486   : > { %2250 = vmax.xlane.f32.xlu1 %v2082_v62  ;;  %2248 = vmax.xlane.f32.xlu0 %v2081_v63  ;;  %v2114_v62 = vld [vmem:[#allocation2 + $0x328] sm:$0xff]  ;;  %v2116_v63 = vld [vmem:[#allocation2 + $0x3b8] sm:$0xff] }
 0x487   : > { %2252 = vmax.xlane.f32.xlu2 %v2083_v0 }
 0x48e   : > { %2256 = vmax.xlane.f32.xlu1 %v2085_v1  ;;  %2254 = vmax.xlane.f32.xlu0 %v2084_v2 }
 0x48f   : > { %2258 = vmax.xlane.f32.xlu2 %v2086_v3  ;;  %v2118_v3 = vld [vmem:[#allocation2 + $0x248] sm:$0xff] }
 0x491   : > { %v2175_v4 = vpop.xlane.xlu1 %2174  ;;  %v2171_v5 = vpop.xlane.xlu0 %2170 }
 0x492   : > { %2429 = vst.msk [vmem:[%s3310_s20 + $0x10] sm:$0xff] %vm2426_vm4, %v2175_v4  ;;  %v2179_v6 = vpop.xlane.xlu2 %2178  ;;  %v2117_v4 = vld [vmem:[#allocation2 + $0x2b8] sm:$0xff] }
 0x493   : > { %2427 = vst.msk [vmem:[%s3310_s20] sm:$0xff] %vm2426_vm4, %v2171_v5  ;;  %v2119_v5 = vld [vmem:[#allocation2 + $0x40] sm:$0xff] }
 0x494   : > { %2431 = vst.msk [vmem:[%s3310_s20 + $0x20] sm:$0xff] %vm2426_vm4, %v2179_v6 }
 0x496   : > { %2262 = vmax.xlane.f32.xlu1 %v2088_v7  ;;  %2260 = vmax.xlane.f32.xlu0 %v2087_v8 }
 0x497   : > { %2264 = vmax.xlane.f32.xlu2 %v2089_v9  ;;  %v2121_v9 = vld [vmem:[#allocation2 + $0xe8] sm:$0xff] }
 0x499   : > { %v2177_v10 = vpop.xlane.xlu1 %2176  ;;  %v2173_v11 = vpop.xlane.xlu0 %2172 }
 0x49a   : > { %2430 = vst.msk [vmem:[%s3310_s20 + $0x18] sm:$0xff] %vm2426_vm4, %v2177_v10  ;;  %v2181_v12 = vpop.xlane.xlu2 %2180  ;;  %v2120_v10 = vld [vmem:[#allocation2 + $0x20] sm:$0xff] }
 0x49b   : > { %2428 = vst.msk [vmem:[%s3310_s20 + $0x8] sm:$0xff] %vm2426_vm4, %v2173_v11  ;;  %v2122_v11 = vld [vmem:[#allocation2 + $0x288] sm:$0xff] }
 0x49c   : > { %2432 = vst.msk [vmem:[%s3310_s20 + $0x28] sm:$0xff] %vm2426_vm4, %v2181_v12 }
 0x49e   : > { %2268 = vmax.xlane.f32.xlu1 %v2091_v13  ;;  %2266 = vmax.xlane.f32.xlu0 %v2090_v14 }
 0x49f   : > { %2270 = vmax.xlane.f32.xlu2 %v2092_v19  ;;  %v2124_v19 = vld [vmem:[#allocation2 + $0x3c8] sm:$0xff] }
 0x4a1   : > { %v2185_v20 = vpop.xlane.xlu1 %2184  ;;  %v2183_v21 = vpop.xlane.xlu0 %2182 }
 0x4a2   : > { %2434 = vst.msk [vmem:[%s3310_s20 + $0x38] sm:$0xff] %vm2426_vm4, %v2185_v20  ;;  %v2187_v22 = vpop.xlane.xlu2 %2186  ;;  %v2123_v20 = vld [vmem:[#allocation2 + $0x3a8] sm:$0xff] }
 0x4a3   : > { %2433 = vst.msk [vmem:[%s3310_s20 + $0x30] sm:$0xff] %vm2426_vm4, %v2183_v21  ;;  %v2125_v21 = vld [vmem:[#allocation2 + $0x160] sm:$0xff] }
 0x4a4   : > { %2435 = vst.msk [vmem:[%s3310_s20 + $0x40] sm:$0xff] %vm2426_vm4, %v2187_v22 }
 0x4a6   : > { %2274 = vmax.xlane.f32.xlu1 %v2094_v18  ;;  %2272 = vmax.xlane.f32.xlu0 %v2093_v17 }
 0x4a7   : > { %2276 = vmax.xlane.f32.xlu2 %v2095_v23  ;;  %v2127_v23 = vld [vmem:[#allocation2 + $0x210] sm:$0xff] }
 0x4a9   : > { %v2191_v24 = vpop.xlane.xlu1 %2190  ;;  %v2189_v16 = vpop.xlane.xlu0 %2188 }
 0x4aa   : > { %2437 = vst.msk [vmem:[%s3310_s20 + $0x50] sm:$0xff] %vm2426_vm4, %v2191_v24  ;;  %v2193_v25 = vpop.xlane.xlu2 %2192  ;;  %v2126_v24 = vld [vmem:[#allocation2 + $0x2c8] sm:$0xff] }
 0x4ab   : > { %2436 = vst.msk [vmem:[%s3310_s20 + $0x48] sm:$0xff] %vm2426_vm4, %v2189_v16  ;;  %v2128_v16 = vld [vmem:[#allocation2 + $0x3d8] sm:$0xff] }
 0x4ac   : > { %2438 = vst.msk [vmem:[%s3310_s20 + $0x58] sm:$0xff] %vm2426_vm4, %v2193_v25 }
 0x4ae   : > { %2280 = vmax.xlane.f32.xlu1 %v2097_v26  ;;  %2278 = vmax.xlane.f32.xlu0 %v2096_v15 }
 0x4af   : > { %2282 = vmax.xlane.f32.xlu2 %v2098_v27  ;;  %v2130_v27 = vld [vmem:[#allocation2 + $0x1b0] sm:$0xff] }
 0x4b1   : > { %v2197_v28 = vpop.xlane.xlu1 %2196  ;;  %v2195_v29 = vpop.xlane.xlu0 %2194 }
 0x4b2   : > { %2440 = vst.msk [vmem:[%s3310_s20 + $0x68] sm:$0xff] %vm2426_vm4, %v2197_v28  ;;  %v2199_v30 = vpop.xlane.xlu2 %2198  ;;  %v2129_v28 = vld [vmem:[#allocation2 + $0x1e8] sm:$0xff] }
 0x4b3   : > { %2439 = vst.msk [vmem:[%s3310_s20 + $0x60] sm:$0xff] %vm2426_vm4, %v2195_v29  ;;  %v2131_v29 = vld [vmem:[#allocation2 + $0x1c8] sm:$0xff] }
 0x4b4   : > { %2441 = vst.msk [vmem:[%s3310_s20 + $0x70] sm:$0xff] %vm2426_vm4, %v2199_v30 }
 0x4b6   : > { %2286 = vmax.xlane.f32.xlu1 %v2100_v31  ;;  %2284 = vmax.xlane.f32.xlu0 %v2099_v32 }
 0x4b7   : > { %2288 = vmax.xlane.f32.xlu2 %v2101_v33  ;;  %v2133_v33 = vld [vmem:[#allocation2 + $0x1d0] sm:$0xff] }
 0x4b9   : > { %v2203_v34 = vpop.xlane.xlu1 %2202  ;;  %v2201_v35 = vpop.xlane.xlu0 %2200 }
 0x4ba   : > { %2443 = vst.msk [vmem:[%s3310_s20 + $0x80] sm:$0xff] %vm2426_vm4, %v2203_v34  ;;  %v2205_v36 = vpop.xlane.xlu2 %2204  ;;  %v2132_v34 = vld [vmem:[#allocation2 + $0x2d0] sm:$0xff] }
 0x4bb   : > { %2442 = vst.msk [vmem:[%s3310_s20 + $0x78] sm:$0xff] %vm2426_vm4, %v2201_v35  ;;  %v2134_v35 = vld [vmem:[#allocation2 + $0x58] sm:$0xff] }
 0x4bc   : > { %2444 = vst.msk [vmem:[%s3310_s20 + $0x88] sm:$0xff] %vm2426_vm4, %v2205_v36 }
 0x4be   : > { %2292 = vmax.xlane.f32.xlu1 %v2103_v37  ;;  %2290 = vmax.xlane.f32.xlu0 %v2102_v38 }
 0x4bf   : > { %2294 = vmax.xlane.f32.xlu2 %v2104_v39  ;;  %v2136_v39 = vld [vmem:[#allocation2 + $0x198] sm:$0xff] }
 0x4c1   : > { %v2209_v40 = vpop.xlane.xlu1 %2208  ;;  %v2207_v41 = vpop.xlane.xlu0 %2206 }
 0x4c2   : > { %2446 = vst.msk [vmem:[%s3310_s20 + $0x98] sm:$0xff] %vm2426_vm4, %v2209_v40  ;;  %v2211_v42 = vpop.xlane.xlu2 %2210  ;;  %v2135_v40 = vld [vmem:[#allocation2 + $0x120] sm:$0xff] }
 0x4c3   : > { %2445 = vst.msk [vmem:[%s3310_s20 + $0x90] sm:$0xff] %vm2426_vm4, %v2207_v41  ;;  %v2137_v41 = vld [vmem:[#allocation2 + $0x2e8] sm:$0xff] }
 0x4c4   : > { %2447 = vst.msk [vmem:[%s3310_s20 + $0xa0] sm:$0xff] %vm2426_vm4, %v2211_v42 }
 0x4c6   : > { %2298 = vmax.xlane.f32.xlu1 %v2106_v43  ;;  %2296 = vmax.xlane.f32.xlu0 %v2105_v44 }
 0x4c7   : > { %2300 = vmax.xlane.f32.xlu2 %v2107_v45  ;;  %v2139_v45 = vld [vmem:[#allocation2 + $0x238] sm:$0xff] }
 0x4c9   : > { %v2215_v46 = vpop.xlane.xlu1 %2214  ;;  %v2213_v47 = vpop.xlane.xlu0 %2212 }
 0x4ca   : > { %2449 = vst.msk [vmem:[%s3310_s20 + $0xb0] sm:$0xff] %vm2426_vm4, %v2215_v46  ;;  %v2217_v48 = vpop.xlane.xlu2 %2216  ;;  %v2138_v46 = vld [vmem:[#allocation2 + $0x1f8] sm:$0xff] }
 0x4cb   : > { %2448 = vst.msk [vmem:[%s3310_s20 + $0xa8] sm:$0xff] %vm2426_vm4, %v2213_v47  ;;  %v2140_v47 = vld [vmem:[#allocation2 + $0x398] sm:$0xff] }
 0x4cc   : > { %2450 = vst.msk [vmem:[%s3310_s20 + $0xb8] sm:$0xff] %vm2426_vm4, %v2217_v48 }
 0x4ce   : > { %2304 = vmax.xlane.f32.xlu1 %v2109_v49  ;;  %2302 = vmax.xlane.f32.xlu0 %v2108_v50 }
 0x4cf   : > { %2306 = vmax.xlane.f32.xlu2 %v2110_v51  ;;  %v2142_v51 = vld [vmem:[#allocation2 + $0x1a0] sm:$0xff] }
 0x4d1   : > { %v2221_v52 = vpop.xlane.xlu1 %2220  ;;  %v2219_v53 = vpop.xlane.xlu0 %2218 }
 0x4d2   : > { %2452 = vst.msk [vmem:[%s3310_s20 + $0xc8] sm:$0xff] %vm2426_vm4, %v2221_v52  ;;  %v2223_v54 = vpop.xlane.xlu2 %2222  ;;  %v2141_v52 = vld [vmem:[#allocation2 + $0x390] sm:$0xff] }
 0x4d3   : > { %2451 = vst.msk [vmem:[%s3310_s20 + $0xc0] sm:$0xff] %vm2426_vm4, %v2219_v53  ;;  %v2143_v53 = vld [vmem:[#allocation2 + $0xa8] sm:$0xff] }
 0x4d4   : > { %2453 = vst.msk [vmem:[%s3310_s20 + $0xd0] sm:$0xff] %vm2426_vm4, %v2223_v54 }
 0x4d6   : > { %2310 = vmax.xlane.f32.xlu1 %v2112_v55  ;;  %2308 = vmax.xlane.f32.xlu0 %v2111_v56 }
 0x4d7   : > { %2312 = vmax.xlane.f32.xlu2 %v2113_v57  ;;  %v2145_v57 = vld [vmem:[#allocation2 + $0x2d8] sm:$0xff] }
 0x4d9   : > { %v2227_v58 = vpop.xlane.xlu1 %2226  ;;  %v2225_v59 = vpop.xlane.xlu0 %2224 }
 0x4da   : > { %2455 = vst.msk [vmem:[%s3310_s20 + $0xe0] sm:$0xff] %vm2426_vm4, %v2227_v58  ;;  %v2229_v60 = vpop.xlane.xlu2 %2228  ;;  %v2144_v58 = vld [vmem:[#allocation2 + $0x258] sm:$0xff] }
 0x4db   : > { %2454 = vst.msk [vmem:[%s3310_s20 + $0xd8] sm:$0xff] %vm2426_vm4, %v2225_v59  ;;  %v2146_v59 = vld [vmem:[#allocation2 + $0xf0] sm:$0xff] }
 0x4dc   : > { %2456 = vst.msk [vmem:[%s3310_s20 + $0xe8] sm:$0xff] %vm2426_vm4, %v2229_v60 }
 0x4de   : > { %2316 = vmax.xlane.f32.xlu1 %v2115_v61  ;;  %2314 = vmax.xlane.f32.xlu0 %v2114_v62 }
 0x4df   : > { %2318 = vmax.xlane.f32.xlu2 %v2116_v63  ;;  %v2148_v63 = vld [vmem:[#allocation2 + $0x170] sm:$0xff] }
 0x4e1   : > { %v2233_v0 = vpop.xlane.xlu1 %2232  ;;  %v2231_v1 = vpop.xlane.xlu0 %2230 }
 0x4e2   : > { %2458 = vst.msk [vmem:[%s3310_s20 + $0xf8] sm:$0xff] %vm2426_vm4, %v2233_v0  ;;  %v2235_v2 = vpop.xlane.xlu2 %2234  ;;  %v2147_v0 = vld [vmem:[#allocation2 + $0x180] sm:$0xff] }
 0x4e3   : > { %2457 = vst.msk [vmem:[%s3310_s20 + $0xf0] sm:$0xff] %vm2426_vm4, %v2231_v1  ;;  %v2149_v1 = vld [vmem:[#allocation2 + $0x3d0] sm:$0xff] }
 0x4e4   : > { %2459 = vst.msk [vmem:[%s3310_s20 + $0x100] sm:$0xff] %vm2426_vm4, %v2235_v2 }
 0x4e6   : > { %2322 = vmax.xlane.f32.xlu1 %v2118_v3  ;;  %2320 = vmax.xlane.f32.xlu0 %v2117_v4 }
 0x4e7   : > { %2324 = vmax.xlane.f32.xlu2 %v2119_v5  ;;  %v2151_v5 = vld [vmem:[#allocation2 + $0x378] sm:$0xff] }
 0x4e9   : > { %v2239_v6 = vpop.xlane.xlu1 %2238  ;;  %v2237_v7 = vpop.xlane.xlu0 %2236 }
 0x4ea   : > { %2461 = vst.msk [vmem:[%s3310_s20 + $0x110] sm:$0xff] %vm2426_vm4, %v2239_v6  ;;  %v2241_v8 = vpop.xlane.xlu2 %2240  ;;  %v2150_v6 = vld [vmem:[#allocation2 + $0x250] sm:$0xff] }
 0x4eb   : > { %2460 = vst.msk [vmem:[%s3310_s20 + $0x108] sm:$0xff] %vm2426_vm4, %v2237_v7  ;;  %v2152_v7 = vld [vmem:[#allocation2 + $0xb8] sm:$0xff] }
 0x4ec   : > { %2462 = vst.msk [vmem:[%s3310_s20 + $0x118] sm:$0xff] %vm2426_vm4, %v2241_v8 }
 0x4ee   : > { %2328 = vmax.xlane.f32.xlu1 %v2121_v9  ;;  %2326 = vmax.xlane.f32.xlu0 %v2120_v10 }
 0x4ef   : > { %2330 = vmax.xlane.f32.xlu2 %v2122_v11  ;;  %v2154_v11 = vld [vmem:[#allocation2 + $0x78] sm:$0xff] }
 0x4f1   : > { %v2245_v12 = vpop.xlane.xlu1 %2244  ;;  %v2243_v13 = vpop.xlane.xlu0 %2242 }
 0x4f2   : > { %2464 = vst.msk [vmem:[%s3310_s20 + $0x128] sm:$0xff] %vm2426_vm4, %v2245_v12  ;;  %v2247_v14 = vpop.xlane.xlu2 %2246  ;;  %v2153_v12 = vld [vmem:[#allocation2 + $0x38] sm:$0xff] }
 0x4f3   : > { %2463 = vst.msk [vmem:[%s3310_s20 + $0x120] sm:$0xff] %vm2426_vm4, %v2243_v13  ;;  %v2155_v13 = vld [vmem:[#allocation2 + $0x308] sm:$0xff] }
 0x4f4   : > { %2465 = vst.msk [vmem:[%s3310_s20 + $0x130] sm:$0xff] %vm2426_vm4, %v2247_v14 }
 0x4f6   : > { %2334 = vmax.xlane.f32.xlu1 %v2124_v19  ;;  %2332 = vmax.xlane.f32.xlu0 %v2123_v20 }
 0x4f7   : > { %2336 = vmax.xlane.f32.xlu2 %v2125_v21  ;;  %v2157_v21 = vld [vmem:[#allocation2 + $0xc8] sm:$0xff] }
 0x4f9   : > { %v2251_v22 = vpop.xlane.xlu1 %2250  ;;  %v2249_v18 = vpop.xlane.xlu0 %2248 }
 0x4fa   : > { %2467 = vst.msk [vmem:[%s3310_s20 + $0x140] sm:$0xff] %vm2426_vm4, %v2251_v22  ;;  %v2253_v17 = vpop.xlane.xlu2 %2252  ;;  %v2156_v22 = vld [vmem:[#allocation2 + $0x370] sm:$0xff] }
 0x4fb   : > { %2466 = vst.msk [vmem:[%s3310_s20 + $0x138] sm:$0xff] %vm2426_vm4, %v2249_v18  ;;  %v2158_v18 = vld [vmem:[#allocation2 + $0x278] sm:$0xff] }
 0x4fc   : > { %2468 = vst.msk [vmem:[%s3310_s20 + $0x148] sm:$0xff] %vm2426_vm4, %v2253_v17 }
 0x4fe   : > { %2340 = vmax.xlane.f32.xlu1 %v2127_v23  ;;  %2338 = vmax.xlane.f32.xlu0 %v2126_v24 }
 0x4ff   : > { %2342 = vmax.xlane.f32.xlu2 %v2128_v16  ;;  %v2160_v16 = vld [vmem:[#allocation2 + $0x228] sm:$0xff] }
 0x501   : > { %v2257_v25 = vpop.xlane.xlu1 %2256  ;;  %v2255_v26 = vpop.xlane.xlu0 %2254 }
 0x502   : > { %2470 = vst.msk [vmem:[%s3310_s20 + $0x158] sm:$0xff] %vm2426_vm4, %v2257_v25  ;;  %v2259_v15 = vpop.xlane.xlu2 %2258  ;;  %v2159_v25 = vld [vmem:[#allocation2 + $0x360] sm:$0xff] }
 0x503   : > { %2469 = vst.msk [vmem:[%s3310_s20 + $0x150] sm:$0xff] %vm2426_vm4, %v2255_v26  ;;  %v2161_v26 = vld [vmem:[#allocation2 + $0x348] sm:$0xff] }
 0x504   : > { %2471 = vst.msk [vmem:[%s3310_s20 + $0x160] sm:$0xff] %vm2426_vm4, %v2259_v15 }
 0x506   : > { %2346 = vmax.xlane.f32.xlu1 %v2130_v27  ;;  %2344 = vmax.xlane.f32.xlu0 %v2129_v28 }
 0x507   : > { %2348 = vmax.xlane.f32.xlu2 %v2131_v29  ;;  %v2163_v29 = vld [vmem:[#allocation2 + $0xf8] sm:$0xff] }
 0x509   : > { %v2263_v30 = vpop.xlane.xlu1 %2262  ;;  %v2261_v31 = vpop.xlane.xlu0 %2260 }
 0x50a   : > { %2473 = vst.msk [vmem:[%s3310_s20 + $0x170] sm:$0xff] %vm2426_vm4, %v2263_v30  ;;  %v2265_v32 = vpop.xlane.xlu2 %2264  ;;  %v2162_v30 = vld [vmem:[#allocation2 + $0x148] sm:$0xff] }
 0x50b   : > { %2472 = vst.msk [vmem:[%s3310_s20 + $0x168] sm:$0xff] %vm2426_vm4, %v2261_v31  ;;  %v2164_v31 = vld [vmem:[#allocation2 + $0x68] sm:$0xff] }
 0x50c   : > { %2474 = vst.msk [vmem:[%s3310_s20 + $0x178] sm:$0xff] %vm2426_vm4, %v2265_v32 }
 0x50e   : > { %2352 = vmax.xlane.f32.xlu1 %v2133_v33  ;;  %2350 = vmax.xlane.f32.xlu0 %v2132_v34 }
 0x50f   : > { %2354 = vmax.xlane.f32.xlu2 %v2134_v35  ;;  %v2166_v35 = vld [vmem:[#allocation2 + $0x298] sm:$0xff] }
 0x511   : > { %v2269_v36 = vpop.xlane.xlu1 %2268  ;;  %v2267_v37 = vpop.xlane.xlu0 %2266 }
 0x512   : > { %2476 = vst.msk [vmem:[%s3310_s20 + $0x188] sm:$0xff] %vm2426_vm4, %v2269_v36  ;;  %v2271_v38 = vpop.xlane.xlu2 %2270  ;;  %v2165_v36 = vld [vmem:[#allocation2] sm:$0xff] }
 0x513   : > { %2475 = vst.msk [vmem:[%s3310_s20 + $0x180] sm:$0xff] %vm2426_vm4, %v2267_v37  ;;  %v2167_v37 = vld [vmem:[#allocation2 + $0x270] sm:$0xff] }
 0x514   : > { %2477 = vst.msk [vmem:[%s3310_s20 + $0x190] sm:$0xff] %vm2426_vm4, %v2271_v38 }
 0x516   : > { %2358 = vmax.xlane.f32.xlu1 %v2136_v39  ;;  %2356 = vmax.xlane.f32.xlu0 %v2135_v40 }
 0x517   : > { %2360 = vmax.xlane.f32.xlu2 %v2137_v41  ;;  %v2169_v41 = vld [vmem:[#allocation2 + $0x190] sm:$0xff] }
 0x519   : > { %v2275_v42 = vpop.xlane.xlu1 %2274  ;;  %v2273_v43 = vpop.xlane.xlu0 %2272 }
 0x51a   : > { %2479 = vst.msk [vmem:[%s3310_s20 + $0x1a0] sm:$0xff] %vm2426_vm4, %v2275_v42  ;;  %v2277_v44 = vpop.xlane.xlu2 %2276  ;;  %v2168_v42 = vld [vmem:[#allocation2 + $0x310] sm:$0xff] }
 0x51b   : > { %2478 = vst.msk [vmem:[%s3310_s20 + $0x198] sm:$0xff] %vm2426_vm4, %v2273_v43 }
 0x51c   : > { %2480 = vst.msk [vmem:[%s3310_s20 + $0x1a8] sm:$0xff] %vm2426_vm4, %v2277_v44 }
 0x51e   : > { %2364 = vmax.xlane.f32.xlu1 %v2139_v45  ;;  %2362 = vmax.xlane.f32.xlu0 %v2138_v46 }
 0x51f   : > { %2366 = vmax.xlane.f32.xlu2 %v2140_v47 }
 0x521   : > { %v2281_v48 = vpop.xlane.xlu1 %2280  ;;  %v2279_v49 = vpop.xlane.xlu0 %2278 }
 0x522   : > { %2482 = vst.msk [vmem:[%s3310_s20 + $0x1b8] sm:$0xff] %vm2426_vm4, %v2281_v48  ;;  %v2283_v50 = vpop.xlane.xlu2 %2282 }
 0x523   : > { %2481 = vst.msk [vmem:[%s3310_s20 + $0x1b0] sm:$0xff] %vm2426_vm4, %v2279_v49 }
 0x524   : > { %2483 = vst.msk [vmem:[%s3310_s20 + $0x1c0] sm:$0xff] %vm2426_vm4, %v2283_v50 }
 0x526   : > { %2370 = vmax.xlane.f32.xlu1 %v2142_v51  ;;  %2368 = vmax.xlane.f32.xlu0 %v2141_v52 }
 0x527   : > { %2372 = vmax.xlane.f32.xlu2 %v2143_v53 }
 0x529   : > { %v2287_v54 = vpop.xlane.xlu1 %2286  ;;  %v2285_v55 = vpop.xlane.xlu0 %2284 }
 0x52a   : > { %2485 = vst.msk [vmem:[%s3310_s20 + $0x1d0] sm:$0xff] %vm2426_vm4, %v2287_v54  ;;  %v2289_v56 = vpop.xlane.xlu2 %2288 }
 0x52b   : > { %2484 = vst.msk [vmem:[%s3310_s20 + $0x1c8] sm:$0xff] %vm2426_vm4, %v2285_v55 }
 0x52c   : > { %2486 = vst.msk [vmem:[%s3310_s20 + $0x1d8] sm:$0xff] %vm2426_vm4, %v2289_v56 }
 0x52e   : > { %2376 = vmax.xlane.f32.xlu1 %v2145_v57  ;;  %2374 = vmax.xlane.f32.xlu0 %v2144_v58 }
 0x52f   : > { %2378 = vmax.xlane.f32.xlu2 %v2146_v59 }
 0x531   : > { %v2293_v60 = vpop.xlane.xlu1 %2292  ;;  %v2291_v61 = vpop.xlane.xlu0 %2290 }
 0x532   : > { %2488 = vst.msk [vmem:[%s3310_s20 + $0x1e8] sm:$0xff] %vm2426_vm4, %v2293_v60  ;;  %v2295_v62 = vpop.xlane.xlu2 %2294 }
 0x533   : > { %2487 = vst.msk [vmem:[%s3310_s20 + $0x1e0] sm:$0xff] %vm2426_vm4, %v2291_v61 }
 0x534   : > { %2489 = vst.msk [vmem:[%s3310_s20 + $0x1f0] sm:$0xff] %vm2426_vm4, %v2295_v62 }
 0x536   : > { %2382 = vmax.xlane.f32.xlu1 %v2148_v63  ;;  %2380 = vmax.xlane.f32.xlu0 %v2147_v0 }
 0x537   : > { %2384 = vmax.xlane.f32.xlu2 %v2149_v1 }
 0x539   : > { %v2299_v2 = vpop.xlane.xlu1 %2298  ;;  %v2297_v3 = vpop.xlane.xlu0 %2296 }
 0x53a   : > { %2491 = vst.msk [vmem:[%s3310_s20 + $0x200] sm:$0xff] %vm2426_vm4, %v2299_v2  ;;  %v2301_v4 = vpop.xlane.xlu2 %2300 }
 0x53b   : > { %2490 = vst.msk [vmem:[%s3310_s20 + $0x1f8] sm:$0xff] %vm2426_vm4, %v2297_v3 }
 0x53c   : > { %2492 = vst.msk [vmem:[%s3310_s20 + $0x208] sm:$0xff] %vm2426_vm4, %v2301_v4 }
 0x53e   : > { %2388 = vmax.xlane.f32.xlu1 %v2151_v5  ;;  %2386 = vmax.xlane.f32.xlu0 %v2150_v6 }
 0x53f   : > { %2390 = vmax.xlane.f32.xlu2 %v2152_v7 }
 0x541   : > { %v2305_v8 = vpop.xlane.xlu1 %2304  ;;  %v2303_v9 = vpop.xlane.xlu0 %2302 }
 0x542   : > { %2494 = vst.msk [vmem:[%s3310_s20 + $0x218] sm:$0xff] %vm2426_vm4, %v2305_v8  ;;  %v2307_v10 = vpop.xlane.xlu2 %2306 }
 0x543   : > { %2493 = vst.msk [vmem:[%s3310_s20 + $0x210] sm:$0xff] %vm2426_vm4, %v2303_v9 }
 0x544   : > { %2495 = vst.msk [vmem:[%s3310_s20 + $0x220] sm:$0xff] %vm2426_vm4, %v2307_v10 }
 0x546   : > { %2394 = vmax.xlane.f32.xlu1 %v2154_v11  ;;  %2392 = vmax.xlane.f32.xlu0 %v2153_v12 }
 0x547   : > { %2396 = vmax.xlane.f32.xlu2 %v2155_v13 }
 0x549   : > { %v2311_v14 = vpop.xlane.xlu1 %2310  ;;  %v2309_v19 = vpop.xlane.xlu0 %2308 }
 0x54a   : > { %2497 = vst.msk [vmem:[%s3310_s20 + $0x230] sm:$0xff] %vm2426_vm4, %v2311_v14  ;;  %v2313_v20 = vpop.xlane.xlu2 %2312 }
 0x54b   : > { %2496 = vst.msk [vmem:[%s3310_s20 + $0x228] sm:$0xff] %vm2426_vm4, %v2309_v19 }
 0x54c   : > { %2498 = vst.msk [vmem:[%s3310_s20 + $0x238] sm:$0xff] %vm2426_vm4, %v2313_v20 }
 0x54e   : > { %2400 = vmax.xlane.f32.xlu1 %v2157_v21  ;;  %2398 = vmax.xlane.f32.xlu0 %v2156_v22 }
 0x54f   : > { %2402 = vmax.xlane.f32.xlu2 %v2158_v18 }
 0x551   : > { %v2317_v17 = vpop.xlane.xlu1 %2316  ;;  %v2315_v23 = vpop.xlane.xlu0 %2314 }
 0x552   : > { %2500 = vst.msk [vmem:[%s3310_s20 + $0x248] sm:$0xff] %vm2426_vm4, %v2317_v17  ;;  %v2319_v24 = vpop.xlane.xlu2 %2318 }
 0x553   : > { %2499 = vst.msk [vmem:[%s3310_s20 + $0x240] sm:$0xff] %vm2426_vm4, %v2315_v23 }
 0x554   : > { %2501 = vst.msk [vmem:[%s3310_s20 + $0x250] sm:$0xff] %vm2426_vm4, %v2319_v24 }
 0x556   : > { %2406 = vmax.xlane.f32.xlu1 %v2160_v16  ;;  %2404 = vmax.xlane.f32.xlu0 %v2159_v25 }
 0x557   : > { %2408 = vmax.xlane.f32.xlu2 %v2161_v26 }
 0x559   : > { %v2323_v15 = vpop.xlane.xlu1 %2322  ;;  %v2321_v27 = vpop.xlane.xlu0 %2320 }
 0x55a   : > { %2503 = vst.msk [vmem:[%s3310_s20 + $0x260] sm:$0xff] %vm2426_vm4, %v2323_v15  ;;  %v2325_v28 = vpop.xlane.xlu2 %2324 }
 0x55b   : > { %2502 = vst.msk [vmem:[%s3310_s20 + $0x258] sm:$0xff] %vm2426_vm4, %v2321_v27 }
 0x55c   : > { %2504 = vst.msk [vmem:[%s3310_s20 + $0x268] sm:$0xff] %vm2426_vm4, %v2325_v28 }
 0x55e   : > { %2412 = vmax.xlane.f32.xlu1 %v2163_v29  ;;  %2410 = vmax.xlane.f32.xlu0 %v2162_v30 }
 0x55f   : > { %2414 = vmax.xlane.f32.xlu2 %v2164_v31 }
 0x561   : > { %v2329_v32 = vpop.xlane.xlu1 %2328  ;;  %v2327_v33 = vpop.xlane.xlu0 %2326 }
 0x562   : > { %2506 = vst.msk [vmem:[%s3310_s20 + $0x278] sm:$0xff] %vm2426_vm4, %v2329_v32  ;;  %v2331_v34 = vpop.xlane.xlu2 %2330 }
 0x563   : > { %2505 = vst.msk [vmem:[%s3310_s20 + $0x270] sm:$0xff] %vm2426_vm4, %v2327_v33 }
 0x564   : > { %2507 = vst.msk [vmem:[%s3310_s20 + $0x280] sm:$0xff] %vm2426_vm4, %v2331_v34 }
 0x566   : > { %2418 = vmax.xlane.f32.xlu1 %v2166_v35  ;;  %2416 = vmax.xlane.f32.xlu0 %v2165_v36 }
 0x567   : > { %2420 = vmax.xlane.f32.xlu2 %v2167_v37 }
 0x569   : > { %v2335_v38 = vpop.xlane.xlu1 %2334  ;;  %v2333_v39 = vpop.xlane.xlu0 %2332 }
 0x56a   : > { %2509 = vst.msk [vmem:[%s3310_s20 + $0x290] sm:$0xff] %vm2426_vm4, %v2335_v38  ;;  %v2337_v40 = vpop.xlane.xlu2 %2336 }
 0x56b   : > { %2508 = vst.msk [vmem:[%s3310_s20 + $0x288] sm:$0xff] %vm2426_vm4, %v2333_v39 }
 0x56c   : > { %2510 = vst.msk [vmem:[%s3310_s20 + $0x298] sm:$0xff] %vm2426_vm4, %v2337_v40 }
 0x56e   : > { %2424 = vmax.xlane.f32.xlu1 %v2169_v41  ;;  %2422 = vmax.xlane.f32.xlu0 %v2168_v42 }
 0x571   : > { %v2341_v43 = vpop.xlane.xlu1 %2340  ;;  %v2339_v44 = vpop.xlane.xlu0 %2338 }
 0x572   : > { %2512 = vst.msk [vmem:[%s3310_s20 + $0x2a8] sm:$0xff] %vm2426_vm4, %v2341_v43  ;;  %v2343_v45 = vpop.xlane.xlu2 %2342 }
 0x573   : > { %2511 = vst.msk [vmem:[%s3310_s20 + $0x2a0] sm:$0xff] %vm2426_vm4, %v2339_v44 }
 0x574   : > { %2513 = vst.msk [vmem:[%s3310_s20 + $0x2b0] sm:$0xff] %vm2426_vm4, %v2343_v45 }
 0x579   : > { %v2347_v46 = vpop.xlane.xlu1 %2346  ;;  %v2345_v47 = vpop.xlane.xlu0 %2344 }
 0x57a   : > { %2515 = vst.msk [vmem:[%s3310_s20 + $0x2c0] sm:$0xff] %vm2426_vm4, %v2347_v46  ;;  %v2349_v48 = vpop.xlane.xlu2 %2348 }
 0x57b   : > { %2514 = vst.msk [vmem:[%s3310_s20 + $0x2b8] sm:$0xff] %vm2426_vm4, %v2345_v47 }
 0x57c   : > { %2516 = vst.msk [vmem:[%s3310_s20 + $0x2c8] sm:$0xff] %vm2426_vm4, %v2349_v48 }
 0x581   : > { %v2353_v49 = vpop.xlane.xlu1 %2352  ;;  %v2351_v50 = vpop.xlane.xlu0 %2350 }
 0x582   : > { %2518 = vst.msk [vmem:[%s3310_s20 + $0x2d8] sm:$0xff] %vm2426_vm4, %v2353_v49  ;;  %v2355_v51 = vpop.xlane.xlu2 %2354 }
 0x583   : > { %2517 = vst.msk [vmem:[%s3310_s20 + $0x2d0] sm:$0xff] %vm2426_vm4, %v2351_v50 }
 0x584   : > { %2519 = vst.msk [vmem:[%s3310_s20 + $0x2e0] sm:$0xff] %vm2426_vm4, %v2355_v51 }
 0x589   : > { %v2359_v52 = vpop.xlane.xlu1 %2358  ;;  %v2357_v53 = vpop.xlane.xlu0 %2356 }
 0x58a   : > { %2521 = vst.msk [vmem:[%s3310_s20 + $0x2f0] sm:$0xff] %vm2426_vm4, %v2359_v52  ;;  %v2361_v54 = vpop.xlane.xlu2 %2360 }
 0x58b   : > { %2520 = vst.msk [vmem:[%s3310_s20 + $0x2e8] sm:$0xff] %vm2426_vm4, %v2357_v53 }
 0x58c   : > { %2522 = vst.msk [vmem:[%s3310_s20 + $0x2f8] sm:$0xff] %vm2426_vm4, %v2361_v54 }
 0x591   : > { %v2365_v55 = vpop.xlane.xlu1 %2364  ;;  %v2363_v56 = vpop.xlane.xlu0 %2362 }
 0x592   : > { %2524 = vst.msk [vmem:[%s3310_s20 + $0x308] sm:$0xff] %vm2426_vm4, %v2365_v55  ;;  %v2367_v57 = vpop.xlane.xlu2 %2366 }
 0x593   : > { %2523 = vst.msk [vmem:[%s3310_s20 + $0x300] sm:$0xff] %vm2426_vm4, %v2363_v56 }
 0x594   : > { %2525 = vst.msk [vmem:[%s3310_s20 + $0x310] sm:$0xff] %vm2426_vm4, %v2367_v57 }
 0x599   : > { %v2371_v58 = vpop.xlane.xlu1 %2370  ;;  %v2369_v59 = vpop.xlane.xlu0 %2368 }
 0x59a   : > { %2527 = vst.msk [vmem:[%s3310_s20 + $0x320] sm:$0xff] %vm2426_vm4, %v2371_v58  ;;  %v2373_v60 = vpop.xlane.xlu2 %2372 }
 0x59b   : > { %2526 = vst.msk [vmem:[%s3310_s20 + $0x318] sm:$0xff] %vm2426_vm4, %v2369_v59 }
 0x59c   : > { %2528 = vst.msk [vmem:[%s3310_s20 + $0x328] sm:$0xff] %vm2426_vm4, %v2373_v60 }
 0x5a1   : > { %v2377_v61 = vpop.xlane.xlu1 %2376  ;;  %v2375_v62 = vpop.xlane.xlu0 %2374 }
 0x5a2   : > { %2530 = vst.msk [vmem:[%s3310_s20 + $0x338] sm:$0xff] %vm2426_vm4, %v2377_v61  ;;  %v2379_v63 = vpop.xlane.xlu2 %2378 }
 0x5a3   : > { %2529 = vst.msk [vmem:[%s3310_s20 + $0x330] sm:$0xff] %vm2426_vm4, %v2375_v62 }
 0x5a4   : > { %2531 = vst.msk [vmem:[%s3310_s20 + $0x340] sm:$0xff] %vm2426_vm4, %v2379_v63 }
 0x5a9   : > { %v2383_v0 = vpop.xlane.xlu1 %2382  ;;  %v2381_v1 = vpop.xlane.xlu0 %2380 }
 0x5aa   : > { %2533 = vst.msk [vmem:[%s3310_s20 + $0x350] sm:$0xff] %vm2426_vm4, %v2383_v0  ;;  %v2385_v2 = vpop.xlane.xlu2 %2384 }
 0x5ab   : > { %2532 = vst.msk [vmem:[%s3310_s20 + $0x348] sm:$0xff] %vm2426_vm4, %v2381_v1 }
 0x5ac   : > { %2534 = vst.msk [vmem:[%s3310_s20 + $0x358] sm:$0xff] %vm2426_vm4, %v2385_v2 }
 0x5b1   : > { %v2389_v3 = vpop.xlane.xlu1 %2388  ;;  %v2387_v4 = vpop.xlane.xlu0 %2386 }
 0x5b2   : > { %2536 = vst.msk [vmem:[%s3310_s20 + $0x368] sm:$0xff] %vm2426_vm4, %v2389_v3  ;;  %v2391_v5 = vpop.xlane.xlu2 %2390 }
 0x5b3   : > { %2535 = vst.msk [vmem:[%s3310_s20 + $0x360] sm:$0xff] %vm2426_vm4, %v2387_v4 }
 0x5b4   : > { %2537 = vst.msk [vmem:[%s3310_s20 + $0x370] sm:$0xff] %vm2426_vm4, %v2391_v5 }
 0x5b9   : > { %v2395_v6 = vpop.xlane.xlu1 %2394  ;;  %v2393_v7 = vpop.xlane.xlu0 %2392 }
 0x5ba   : > { %2539 = vst.msk [vmem:[%s3310_s20 + $0x380] sm:$0xff] %vm2426_vm4, %v2395_v6  ;;  %v2397_v8 = vpop.xlane.xlu2 %2396 }
 0x5bb   : > { %2538 = vst.msk [vmem:[%s3310_s20 + $0x378] sm:$0xff] %vm2426_vm4, %v2393_v7 }
 0x5bc   : > { %2540 = vst.msk [vmem:[%s3310_s20 + $0x388] sm:$0xff] %vm2426_vm4, %v2397_v8 }
 0x5c1   : > { %v2401_v9 = vpop.xlane.xlu1 %2400  ;;  %v2399_v10 = vpop.xlane.xlu0 %2398 }
 0x5c2   : > { %2542 = vst.msk [vmem:[%s3310_s20 + $0x398] sm:$0xff] %vm2426_vm4, %v2401_v9  ;;  %v2403_v11 = vpop.xlane.xlu2 %2402 }
 0x5c3   : > { %2541 = vst.msk [vmem:[%s3310_s20 + $0x390] sm:$0xff] %vm2426_vm4, %v2399_v10 }
 0x5c4   : > { %2543 = vst.msk [vmem:[%s3310_s20 + $0x3a0] sm:$0xff] %vm2426_vm4, %v2403_v11 }
 0x5c9   : > { %v2407_v12 = vpop.xlane.xlu1 %2406  ;;  %v2405_v13 = vpop.xlane.xlu0 %2404 }
 0x5ca   : > { %2545 = vst.msk [vmem:[%s3310_s20 + $0x3b0] sm:$0xff] %vm2426_vm4, %v2407_v12  ;;  %v2409_v14 = vpop.xlane.xlu2 %2408 }
 0x5cb   : > { %2544 = vst.msk [vmem:[%s3310_s20 + $0x3a8] sm:$0xff] %vm2426_vm4, %v2405_v13 }
 0x5cc   : > { %2546 = vst.msk [vmem:[%s3310_s20 + $0x3b8] sm:$0xff] %vm2426_vm4, %v2409_v14 }
 0x5d1   : > { %v2413_v19 = vpop.xlane.xlu1 %2412  ;;  %v2411_v20 = vpop.xlane.xlu0 %2410 }
 0x5d2   : > { %2548 = vst.msk [vmem:[%s3310_s20 + $0x3c8] sm:$0xff] %vm2426_vm4, %v2413_v19  ;;  %v2415_v21 = vpop.xlane.xlu2 %2414 }
 0x5d3   : > { %2547 = vst.msk [vmem:[%s3310_s20 + $0x3c0] sm:$0xff] %vm2426_vm4, %v2411_v20 }
 0x5d4   : > { %2549 = vst.msk [vmem:[%s3310_s20 + $0x3d0] sm:$0xff] %vm2426_vm4, %v2415_v21 }
 0x5d9   : > { %v2419_v22 = vpop.xlane.xlu1 %2418  ;;  %v2417_v18 = vpop.xlane.xlu0 %2416 }
 0x5da   : > { %2551 = vst.msk [vmem:[%s3310_s20 + $0x3e0] sm:$0xff] %vm2426_vm4, %v2419_v22  ;;  %v2421_v17 = vpop.xlane.xlu2 %2420 }
 0x5db   : > { %2550 = vst.msk [vmem:[%s3310_s20 + $0x3d8] sm:$0xff] %vm2426_vm4, %v2417_v18 }
 0x5dc   : > { %2552 = vst.msk [vmem:[%s3310_s20 + $0x3e8] sm:$0xff] %vm2426_vm4, %v2421_v17 }
 0x5e1   : > { %v2425_v23 = vpop.xlane.xlu1 %2424  ;;  %v2423_v24 = vpop.xlane.xlu0 %2422 }
 0x5e2   : > { %2554 = vst.msk [vmem:[%s3310_s20 + $0x3f8] sm:$0xff] %vm2426_vm4, %v2425_v23 }
 0x5e3   : > { %2553 = vst.msk [vmem:[%s3310_s20 + $0x3f0] sm:$0xff] %vm2426_vm4, %v2423_v24 }
 0x5e4 PF: > { %s17_s25 = sadd.s32 1, %s3204_s25   ;;  %s3852_s21 = smov %s3196_s23 }
 0x5e5   : > { %p14_p12 = scmp.ge.s32.totalorder %s17_s25, 6   ;;  %s3853_s22 = smov %s3200_s24 }
 0x5e6   : > { %s3854_s23 = smov %s3857_s27  ;;  %s3855_s24 = smov %s3861_s28 }
 0x5e7   :  { %16 = sbr.rel (!%p14_p12) target bundleno = 3 (0x3), region = 87 }
 0x5ec   :  { %2576 = vsyncpa [#allocation4], 1 }
 0x5ed   :  { %2578 = vsyncpa [#allocation4 + $0x1], 1 }

// kernel: tnet_forward.3
= control target key start
LH: loop header
LB: loop body
LE: loop exit
PB: predicated region body
PF: predicated region fallthrough
CT: control target
= control target key end

     0   :  { %13 = vsyncpa [#allocation3], 0  ;;  %s4451_s30 = smov [#allocation2]   ;;  %s4452_s10 = smov 128   ;;  %s6208_s0 = inlined_call_operand.vmem [shape: f32[2,1024], index: 0, kind: input, shape index: {}]   ;;  %s6209_s1 = inlined_call_operand.vmem [shape: f32[1,1024], index: 1, kind: input, shape index: {}]   ;;  %s6210_s2 = inlined_call_operand.vmem [shape: bf16[1024,512], index: 2, kind: input, shape index: {}]   ;;  %s6211_s3 = inlined_call_operand.vmem [shape: f32[1,512], index: 3, kind: input, shape index: {}]   ;;  %s6212_s4 = inlined_call_operand.hbm [shape: bf16[512,256], index: 4, kind: input, shape index: {}]   ;;  %s6213_s5 = inlined_call_operand.vmem [shape: f32[1,256], index: 5, kind: input, shape index: {}]   ;;  %s6214_s6 = inlined_call_operand.vmem [shape: bf16[256,9], index: 6, kind: input, shape index: {}]   ;;  %s6215_s7 = inlined_call_operand.vmem [shape: f32[1,9], index: 7, kind: input, shape index: {}]   ;;  %s6216_s8 = inlined_call_operand.vmem [shape: f32[2,9], index: 8, kind: output, shape index: {}]  }
   0x1   :  { %s26_s29 = sshll.u32 %s6212_s4, 4  ;;  %s28_s9 = sshll.u32 %s4451_s30, 4  ;;  %s27_s29 = int_to_ptr.hbm [resolvable:$true] %s26_s29  ;;  %s29_s9 = int_to_ptr.vmem [resolvable:$true] %s28_s9 }
   0x2   :  { %s4453_s11 = smov 8  }
   0x3   :  { %34 = dma.hbm_to_vmem [thread:$0]  %s27_s29, 8192, %s29_s9, [#allocation3], %s4452_s10, %s4452_s10, %s4453_s11  }
   0x4   :  { %4449 = dma.done.wait [#allocation3], 8192  }
   0x5   :  { %4450 = vsyncadd [#allocation3], 4294959104  ;;  %v2854_v0 = vld [vmem:[%s6210_s2 + $0xe0] sm:$0xf]  ;;  %v4114_v1 = vld [vmem:[%s6210_s2 + $0xec] sm:$0xf0] }
   0x6   :  { %v2982_v2 = vld [vmem:[%s6210_s2 + $0x1e0] sm:$0xf]  ;;  %v2855_v3 = vor.u32 %v4114_v1, %v2854_v0  ;;  %v4146_v4 = vld [vmem:[%s6210_s2 + $0x1ec] sm:$0xf0]  ;;  %vm63_vm0 = vcmask 1041408   ;;  %vm65_vm1 = vcmask 1045508  }
   0x7   :  { %v3110_v5 = vld [vmem:[%s6210_s2 + $0x2e0] sm:$0xf]  ;;  %v4178_v6 = vld [vmem:[%s6210_s2 + $0x2ec] sm:$0xf0]  ;;  %v2983_v7 = vor.u32 %v4146_v4, %v2982_v2  ;;  %vm67_vm2 = vcmask 1043456   ;;  %vm2733_vm3 = vcmask 66560  }
   0x8   :  { %v3111_v8 = vor.u32 %v4178_v6, %v3110_v5  ;;  %v3238_v9 = vld [vmem:[%s6210_s2 + $0x3e0] sm:$0xf]  ;;  %v4210_v10 = vld [vmem:[%s6210_s2 + $0x3ec] sm:$0xf0]  ;;  %1653 = vmatpush.bf16.msra.mxu0 %v2855_v3 }
   0x9   :  { %v2838_v11 = vld [vmem:[%s6210_s2 + $0xc0] sm:$0xf]  ;;  %v3239_v12 = vor.u32 %v4210_v10, %v3238_v9  ;;  %v4110_v13 = vld [vmem:[%s6210_s2 + $0xcc] sm:$0xf0]  ;;  %1666 = vmatpush.bf16.msra.mxu1 %v2983_v7 }
   0xa   :  { %v2966_v14 = vld [vmem:[%s6210_s2 + $0x1c0] sm:$0xf]  ;;  %v4142_v15 = vld [vmem:[%s6210_s2 + $0x1cc] sm:$0xf0]  ;;  %1679 = vmatpush.bf16.msra.mxu2 %v3111_v8  ;;  %v2839_v16 = vor.u32 %v4110_v13, %v2838_v11 }
   0xb   :  { %v2967_v17 = vor.u32 %v4142_v15, %v2966_v14  ;;  %v3094_v18 = vld [vmem:[%s6210_s2 + $0x2c0] sm:$0xf]  ;;  %v4174_v19 = vld [vmem:[%s6210_s2 + $0x2cc] sm:$0xf0]  ;;  %1692 = vmatpush.bf16.msra.mxu3 %v3239_v12 }
   0xc   :  { %v3222_v20 = vld [vmem:[%s6210_s2 + $0x3c0] sm:$0xf]  ;;  %v3095_v21 = vor.u32 %v4174_v19, %v3094_v18  ;;  %v4206_v22 = vld [vmem:[%s6210_s2 + $0x3cc] sm:$0xf0]  ;;  %1654 = vmatpush.bf16.msra.mxu0 %v2839_v16 }
   0xd   :  { %v2822_v23 = vld [vmem:[%s6210_s2 + $0xa0] sm:$0xf]  ;;  %v4106_v24 = vld [vmem:[%s6210_s2 + $0xac] sm:$0xf0]  ;;  %v3223_v25 = vor.u32 %v4206_v22, %v3222_v20  ;;  %1667 = vmatpush.bf16.msra.mxu1 %v2967_v17 }
   0xe   :  { %v2950_v26 = vld [vmem:[%s6210_s2 + $0x1a0] sm:$0xf]  ;;  %v4138_v27 = vld [vmem:[%s6210_s2 + $0x1ac] sm:$0xf0]  ;;  %v2823_v29 = vor.u32 %v4106_v24, %v2822_v23  ;;  %1680 = vmatpush.bf16.msra.mxu2 %v3095_v21 }
   0xf   :  { %v3078_v28 = vld [vmem:[%s6210_s2 + $0x2a0] sm:$0xf]  ;;  %v4170_v30 = vld [vmem:[%s6210_s2 + $0x2ac] sm:$0xf0]  ;;  %v2951_v33 = vor.u32 %v4138_v27, %v2950_v26  ;;  %1693 = vmatpush.bf16.msra.mxu3 %v3223_v25 }
  0x10   :  { %v3206_v31 = vld [vmem:[%s6210_s2 + $0x3a0] sm:$0xf]  ;;  %v4202_v32 = vld [vmem:[%s6210_s2 + $0x3ac] sm:$0xf0]  ;;  %v3079_v34 = vor.u32 %v4170_v30, %v3078_v28  ;;  %1655 = vmatpush.bf16.msra.mxu0 %v2823_v29 }
  0x11   :  { %v2806_v35 = vld [vmem:[%s6210_s2 + $0x80] sm:$0xf]  ;;  %v4102_v36 = vld [vmem:[%s6210_s2 + $0x8c] sm:$0xf0]  ;;  %v3207_v38 = vor.u32 %v4202_v32, %v3206_v31  ;;  %1668 = vmatpush.bf16.msra.mxu1 %v2951_v33 }
  0x12   :  { %v2934_v37 = vld [vmem:[%s6210_s2 + $0x180] sm:$0xf]  ;;  %v4134_v39 = vld [vmem:[%s6210_s2 + $0x18c] sm:$0xf0]  ;;  %v2807_v44 = vor.u32 %v4102_v36, %v2806_v35  ;;  %1681 = vmatpush.bf16.msra.mxu2 %v3079_v34 }
  0x13   :  { %v3062_v40 = vld [vmem:[%s6210_s2 + $0x280] sm:$0xf]  ;;  %v4166_v41 = vld [vmem:[%s6210_s2 + $0x28c] sm:$0xf0]  ;;  %v2935_v45 = vor.u32 %v4134_v39, %v2934_v37  ;;  %1694 = vmatpush.bf16.msra.mxu3 %v3207_v38 }
  0x14   :  { %v3190_v42 = vld [vmem:[%s6210_s2 + $0x380] sm:$0xf]  ;;  %v4198_v43 = vld [vmem:[%s6210_s2 + $0x38c] sm:$0xf0]  ;;  %v3063_v46 = vor.u32 %v4166_v41, %v3062_v40  ;;  %1656 = vmatpush.bf16.msra.mxu0 %v2807_v44 }
  0x15   :  { %v2790_v47 = vld [vmem:[%s6210_s2 + $0x60] sm:$0xf]  ;;  %v4098_v48 = vld [vmem:[%s6210_s2 + $0x6c] sm:$0xf0]  ;;  %v3191_v50 = vor.u32 %v4198_v43, %v3190_v42  ;;  %1669 = vmatpush.bf16.msra.mxu1 %v2935_v45 }
  0x16   :  { %v2918_v49 = vld [vmem:[%s6210_s2 + $0x160] sm:$0xf]  ;;  %v4130_v51 = vld [vmem:[%s6210_s2 + $0x16c] sm:$0xf0]  ;;  %v2791_v56 = vor.u32 %v4098_v48, %v2790_v47  ;;  %1682 = vmatpush.bf16.msra.mxu2 %v3063_v46 }
  0x17   :  { %v3046_v52 = vld [vmem:[%s6210_s2 + $0x260] sm:$0xf]  ;;  %v4162_v53 = vld [vmem:[%s6210_s2 + $0x26c] sm:$0xf0]  ;;  %v2919_v57 = vor.u32 %v4130_v51, %v2918_v49  ;;  %1695 = vmatpush.bf16.msra.mxu3 %v3191_v50 }
  0x18   :  { %v3174_v54 = vld [vmem:[%s6210_s2 + $0x360] sm:$0xf]  ;;  %v4194_v55 = vld [vmem:[%s6210_s2 + $0x36c] sm:$0xf0]  ;;  %v3047_v58 = vor.u32 %v4162_v53, %v3046_v52  ;;  %1657 = vmatpush.bf16.msra.mxu0 %v2791_v56 }
  0x19   :  { %v2774_v59 = vld [vmem:[%s6210_s2 + $0x40] sm:$0xf]  ;;  %v4094_v60 = vld [vmem:[%s6210_s2 + $0x4c] sm:$0xf0]  ;;  %v3175_v62 = vor.u32 %v4194_v55, %v3174_v54  ;;  %1670 = vmatpush.bf16.msra.mxu1 %v2919_v57 }
  0x1a   :  { %v2902_v61 = vld [vmem:[%s6210_s2 + $0x140] sm:$0xf]  ;;  %v4126_v63 = vld [vmem:[%s6210_s2 + $0x14c] sm:$0xf0]  ;;  %v2775_v4 = vor.u32 %v4094_v60, %v2774_v59  ;;  %1683 = vmatpush.bf16.msra.mxu2 %v3047_v58 }
  0x1b   :  { %v3030_v0 = vld [vmem:[%s6210_s2 + $0x240] sm:$0xf]  ;;  %v4158_v1 = vld [vmem:[%s6210_s2 + $0x24c] sm:$0xf0]  ;;  %v2903_v5 = vor.u32 %v4126_v63, %v2902_v61  ;;  %1696 = vmatpush.bf16.msra.mxu3 %v3175_v62 }
  0x1c   :  { %v3158_v2 = vld [vmem:[%s6210_s2 + $0x340] sm:$0xf]  ;;  %v4190_v3 = vld [vmem:[%s6210_s2 + $0x34c] sm:$0xf0]  ;;  %v3031_v6 = vor.u32 %v4158_v1, %v3030_v0  ;;  %1658 = vmatpush.bf16.msra.mxu0 %v2775_v4 }
  0x1d   :  { %v2758_v7 = vld [vmem:[%s6210_s2 + $0x20] sm:$0xf]  ;;  %v4090_v8 = vld [vmem:[%s6210_s2 + $0x2c] sm:$0xf0]  ;;  %v3159_v10 = vor.u32 %v4190_v3, %v3158_v2  ;;  %1671 = vmatpush.bf16.msra.mxu1 %v2903_v5 }
  0x1e   :  { %v2886_v9 = vld [vmem:[%s6210_s2 + $0x120] sm:$0xf]  ;;  %v4122_v11 = vld [vmem:[%s6210_s2 + $0x12c] sm:$0xf0]  ;;  %v2759_v16 = vor.u32 %v4090_v8, %v2758_v7  ;;  %1684 = vmatpush.bf16.msra.mxu2 %v3031_v6 }
  0x1f   :  { %v3014_v12 = vld [vmem:[%s6210_s2 + $0x220] sm:$0xf]  ;;  %v4154_v13 = vld [vmem:[%s6210_s2 + $0x22c] sm:$0xf0]  ;;  %v2887_v19 = vor.u32 %v4122_v11, %v2886_v9  ;;  %1697 = vmatpush.bf16.msra.mxu3 %v3159_v10 }
  0x20   :  { %v3142_v14 = vld [vmem:[%s6210_s2 + $0x320] sm:$0xf]  ;;  %v4186_v15 = vld [vmem:[%s6210_s2 + $0x32c] sm:$0xf0]  ;;  %v3015_v20 = vor.u32 %v4154_v13, %v3014_v12  ;;  %1659 = vmatpush.bf16.msra.mxu0 %v2759_v16 }
  0x21   :  { %v2742_v17 = vld [vmem:[%s6210_s2] sm:$0xf]  ;;  %v4086_v18 = vld [vmem:[%s6210_s2 + $0xc] sm:$0xf0]  ;;  %v3143_v24 = vor.u32 %v4186_v15, %v3142_v14  ;;  %1672 = vmatpush.bf16.msra.mxu1 %v2887_v19 }
  0x22   :  { %v2870_v21 = vld [vmem:[%s6210_s2 + $0x100] sm:$0xf]  ;;  %v4118_v22 = vld [vmem:[%s6210_s2 + $0x10c] sm:$0xf0]  ;;  %v2743_v31 = vor.u32 %v4086_v18, %v2742_v17  ;;  %1685 = vmatpush.bf16.msra.mxu2 %v3015_v20 }
  0x23   :  { %v2998_v23 = vld [vmem:[%s6210_s2 + $0x200] sm:$0xf]  ;;  %v4150_v25 = vld [vmem:[%s6210_s2 + $0x20c] sm:$0xf0]  ;;  %v2871_v35 = vor.u32 %v4118_v22, %v2870_v21  ;;  %1698 = vmatpush.bf16.msra.mxu3 %v3143_v24 }
  0x24   :  { %v3126_v26 = vld [vmem:[%s6210_s2 + $0x300] sm:$0xf]  ;;  %v4182_v27 = vld [vmem:[%s6210_s2 + $0x30c] sm:$0xf0]  ;;  %v2999_v36 = vor.u32 %v4150_v25, %v2998_v23  ;;  %1660 = vmatpush.bf16.msra.mxu0 %v2743_v31 }
  0x25   :  { %v3366_v28 = vld [vmem:[%s6210_s2 + $0x4e0] sm:$0xf]  ;;  %v4242_v29 = vld [vmem:[%s6210_s2 + $0x4ec] sm:$0xf0]  ;;  %v3127_v39 = vor.u32 %v4182_v27, %v3126_v26  ;;  %1673 = vmatpush.bf16.msra.mxu1 %v2871_v35 }
  0x26   :  { %v3494_v30 = vld [vmem:[%s6210_s2 + $0x5e0] sm:$0xf]  ;;  %v4274_v32 = vld [vmem:[%s6210_s2 + $0x5ec] sm:$0xf0]  ;;  %v3367_v40 = vor.u32 %v4242_v29, %v3366_v28  ;;  %1686 = vmatpush.bf16.msra.mxu2 %v2999_v36 }
  0x27   :  { %v3622_v33 = vld [vmem:[%s6210_s2 + $0x6e0] sm:$0xf]  ;;  %v4306_v34 = vld [vmem:[%s6210_s2 + $0x6ec] sm:$0xf0]  ;;  %v3495_v41 = vor.u32 %v4274_v32, %v3494_v30  ;;  %1699 = vmatpush.bf16.msra.mxu3 %v3127_v39 }
  0x28   :  { %v3750_v37 = vld [vmem:[%s6210_s2 + $0x7e0] sm:$0xf]  ;;  %v4338_v38 = vld [vmem:[%s6210_s2 + $0x7ec] sm:$0xf0]  ;;  %v3623_v42 = vor.u32 %v4306_v34, %v3622_v33  ;;  %1705 = vmatpush.bf16.msrb.mxu0 %v3367_v40 }
  0x29   :  { %v3350_v43 = vld [vmem:[%s6210_s2 + $0x4c0] sm:$0xf]  ;;  %v4238_v44 = vld [vmem:[%s6210_s2 + $0x4cc] sm:$0xf0]  ;;  %v3751_v46 = vor.u32 %v4338_v38, %v3750_v37  ;;  %1718 = vmatpush.bf16.msrb.mxu1 %v3495_v41 }
  0x2a   :  { %v3478_v45 = vld [vmem:[%s6210_s2 + $0x5c0] sm:$0xf]  ;;  %v4270_v47 = vld [vmem:[%s6210_s2 + $0x5cc] sm:$0xf0]  ;;  %v3351_v52 = vor.u32 %v4238_v44, %v3350_v43  ;;  %1731 = vmatpush.bf16.msrb.mxu2 %v3623_v42 }
  0x2b   :  { %v3606_v48 = vld [vmem:[%s6210_s2 + $0x6c0] sm:$0xf]  ;;  %v4302_v49 = vld [vmem:[%s6210_s2 + $0x6cc] sm:$0xf0]  ;;  %v3479_v54 = vor.u32 %v4270_v47, %v3478_v45  ;;  %1744 = vmatpush.bf16.msrb.mxu3 %v3751_v46 }
  0x2c   :  { %v3734_v50 = vld [vmem:[%s6210_s2 + $0x7c0] sm:$0xf]  ;;  %v4334_v51 = vld [vmem:[%s6210_s2 + $0x7cc] sm:$0xf0]  ;;  %v3607_v55 = vor.u32 %v4302_v49, %v3606_v48  ;;  %1706 = vmatpush.bf16.msrb.mxu0 %v3351_v52 }
  0x2d   :  { %v3334_v53 = vld [vmem:[%s6210_s2 + $0x4a0] sm:$0xf]  ;;  %v4234_v56 = vld [vmem:[%s6210_s2 + $0x4ac] sm:$0xf0]  ;;  %v3735_v59 = vor.u32 %v4334_v51, %v3734_v50  ;;  %1719 = vmatpush.bf16.msrb.mxu1 %v3479_v54 }
  0x2e   :  { %v3462_v57 = vld [vmem:[%s6210_s2 + $0x5a0] sm:$0xf]  ;;  %v4266_v58 = vld [vmem:[%s6210_s2 + $0x5ac] sm:$0xf0]  ;;  %v3335_v2 = vor.u32 %v4234_v56, %v3334_v53  ;;  %1732 = vmatpush.bf16.msrb.mxu2 %v3607_v55 }
  0x2f   :  { %v3590_v60 = vld [vmem:[%s6210_s2 + $0x6a0] sm:$0xf]  ;;  %v4298_v61 = vld [vmem:[%s6210_s2 + $0x6ac] sm:$0xf0]  ;;  %v3463_v3 = vor.u32 %v4266_v58, %v3462_v57  ;;  %1745 = vmatpush.bf16.msrb.mxu3 %v3735_v59 }
  0x30   :  { %v3718_v62 = vld [vmem:[%s6210_s2 + $0x7a0] sm:$0xf]  ;;  %v4330_v63 = vld [vmem:[%s6210_s2 + $0x7ac] sm:$0xf0]  ;;  %v3591_v7 = vor.u32 %v4298_v61, %v3590_v60  ;;  %1707 = vmatpush.bf16.msrb.mxu0 %v3335_v2 }
  0x31   :  { %v3318_v0 = vld [vmem:[%s6210_s2 + $0x480] sm:$0xf]  ;;  %v4230_v1 = vld [vmem:[%s6210_s2 + $0x48c] sm:$0xf0]  ;;  %v3719_v12 = vor.u32 %v4330_v63, %v3718_v62  ;;  %1720 = vmatpush.bf16.msrb.mxu1 %v3463_v3 }
  0x32   :  { %v3446_v4 = vld [vmem:[%s6210_s2 + $0x580] sm:$0xf]  ;;  %v4262_v5 = vld [vmem:[%s6210_s2 + $0x58c] sm:$0xf0]  ;;  %v3319_v19 = vor.u32 %v4230_v1, %v3318_v0  ;;  %1733 = vmatpush.bf16.msrb.mxu2 %v3591_v7  ;;  %v46_v7 = vld [vmem:[%s6208_s0 + $0x8] sm:$0xff] }
  0x33   :  { %v4781_v6 = vld [vmem:[%s6209_s1] sm:$0xff]  ;;  %v4294_v13 = vld [vmem:[%s6210_s2 + $0x68c] sm:$0xf0]  ;;  %v3447_v22 = vor.u32 %v4262_v5, %v3446_v4  ;;  %1746 = vmatpush.bf16.msrb.mxu3 %v3719_v12 }
  0x34   :  { %v3574_v8 = vld [vmem:[%s6210_s2 + $0x680] sm:$0xf]  ;;  %v49_v9 = vperm.slane %v4781_v6, 0  ;;  %v50_v10 = vperm.slane %v4781_v6, 1  ;;  %v51_v11 = vperm.slane %v4781_v6, 2  ;;  %v52_v15 = vperm.slane %v4781_v6, 3  ;;  %1708 = vmatpush.bf16.msrb.mxu0 %v3319_v19 }
  0x35   :  { %v3702_v14 = vld [vmem:[%s6210_s2 + $0x780] sm:$0xf]  ;;  %v4326_v16 = vld [vmem:[%s6210_s2 + $0x78c] sm:$0xf0]  ;;  %v3575_v23 = vor.u32 %v4294_v13, %v3574_v8  ;;  %1721 = vmatpush.bf16.msrb.mxu1 %v3447_v22  ;;  %v54_v52 = vperm.slane %v4781_v6, 5  ;;  %v53_v60 = vperm.slane %v4781_v6, 4 }
  0x36   :  { %v57_v17 = vrot.slane %v50_v10, 6  ;;  %v58_v18 = vrot.slane %v51_v11, 4  ;;  %v3302_v20 = vld [vmem:[%s6210_s2 + $0x460] sm:$0xf]  ;;  %v59_v21 = vrot.slane %v52_v15, 2  ;;  %v3703_v28 = vor.u32 %v4326_v16, %v3702_v14 }
  0x37   :  { %v4226_v24 = vld [vmem:[%s6210_s2 + $0x46c] sm:$0xf0]  ;;  %v3430_v25 = vld [vmem:[%s6210_s2 + $0x560] sm:$0xf]  ;;  %1734 = vmatpush.bf16.msrb.mxu2 %v3575_v23  ;;  %v55_v2 = vperm.slane %v4781_v6, 6  ;;  %v56_v3 = vperm.slane %v4781_v6, 7 }
  0x38   :  { %v45_v26 = vld [vmem:[%s6208_s0] sm:$0xff]  ;;  %v64_v27 = vsel %vm63_vm0, %v49_v9, %v57_v17  ;;  %v4258_v29 = vld [vmem:[%s6210_s2 + $0x56c] sm:$0xf0]  ;;  %v66_v32 = vsel %vm65_vm1, %v58_v18, %v59_v21  ;;  %v3303_v36 = vor.u32 %v4226_v24, %v3302_v20  ;;  %1747 = vmatpush.bf16.msrb.mxu3 %v3703_v28  ;;  %v60_v8 = vrot.slane %v54_v52, 6  ;;  %v2856_v16 = vld [vmem:[%s6210_s2 + $0xf0] sm:$0xf0] }
  0x39   :  { %v3558_v30 = vld [vmem:[%s6210_s2 + $0x660] sm:$0xf]  ;;  %v4290_v31 = vld [vmem:[%s6210_s2 + $0x66c] sm:$0xf0]  ;;  %v68_v35 = vsel %vm67_vm2, %v64_v27, %v66_v32  ;;  %v3431_v41 = vor.u32 %v4258_v29, %v3430_v25  ;;  %v61_v11 = vrot.slane %v55_v2, 4  ;;  %v62_v12 = vrot.slane %v56_v3, 2 }
  0x3a   :  { %v3686_v33 = vld [vmem:[%s6210_s2 + $0x760] sm:$0xf]  ;;  %v4322_v34 = vld [vmem:[%s6210_s2 + $0x76c] sm:$0xf0]  ;;  %v74_v40 = vadd.f32 %v68_v35, %v45_v26  ;;  %v3559_v42 = vor.u32 %v4290_v31, %v3558_v30  ;;  %1709 = vmatpush.bf16.msrb.mxu0 %v3303_v36  ;;  %v4112_v15 = vld [vmem:[%s6210_s2 + $0xe4] sm:$0xf]  ;;  %v69_v18 = vsel %vm63_vm0, %v53_v60, %v60_v8 }
  0x3b   :  { %v3286_v37 = vld [vmem:[%s6210_s2 + $0x440] sm:$0xf]  ;;  %v4222_v38 = vld [vmem:[%s6210_s2 + $0x44c] sm:$0xf0]  ;;  %v3687_v46 = vor.u32 %v4322_v34, %v3686_v33  ;;  %1722 = vmatpush.bf16.msrb.mxu1 %v3431_v41  ;;  %v4144_v17 = vld [vmem:[%s6210_s2 + $0x1e4] sm:$0xf]  ;;  %v70_v22 = vsel %vm65_vm1, %v61_v11, %v62_v12 }
  0x3c   :  { %v3414_v39 = vld [vmem:[%s6210_s2 + $0x540] sm:$0xf]  ;;  %v4254_v43 = vld [vmem:[%s6210_s2 + $0x54c] sm:$0xf0]  ;;  %v76_v49 = vmax.f32 %v74_v40, 0.0  ;;  %v3287_v53 = vor.u32 %v4222_v38, %v3286_v37  ;;  %1735 = vmatpush.bf16.msrb.mxu2 %v3559_v42  ;;  %v71_v27 = vsel %vm67_vm2, %v69_v18, %v70_v22  ;;  %v2859_v40 = vor.u32 %v4112_v15, %v2856_v16 }
  0x3d   :  { %v3542_v44 = vld [vmem:[%s6210_s2 + $0x640] sm:$0xf]  ;;  %v4286_v45 = vld [vmem:[%s6210_s2 + $0x64c] sm:$0xf0]  ;;  %v3415_v56 = vor.u32 %v4254_v43, %v3414_v39  ;;  %1748 = vmatpush.bf16.msrb.mxu3 %v3687_v46  ;;  %v2984_v19 = vld [vmem:[%s6210_s2 + $0x1f0] sm:$0xf0]  ;;  %v75_v33 = vadd.f32 %v71_v27, %v46_v7 }
  0x3e   :  { %v3670_v47 = vld [vmem:[%s6210_s2 + $0x740] sm:$0xf]  ;;  %v4318_v48 = vld [vmem:[%s6210_s2 + $0x74c] sm:$0xf0]  ;;  %80 = vst [vmem:[#allocation1] ss:$4 sm:$0xff] %v76_v49  ;;  %v3543_v57 = vor.u32 %v4286_v45, %v3542_v44  ;;  %1710 = vmatpush.bf16.msrb.mxu0 %v3287_v53  ;;  %v2987_v41 = vor.u32 %v4144_v17, %v2984_v19 }
  0x3f   :  { %v3270_v50 = vld [vmem:[%s6210_s2 + $0x420] sm:$0xf]  ;;  %v4218_v51 = vld [vmem:[%s6210_s2 + $0x42c] sm:$0xf0]  ;;  %v3671_v61 = vor.u32 %v4318_v48, %v3670_v47  ;;  %1723 = vmatpush.bf16.msrb.mxu1 %v3415_v56  ;;  %v4176_v20 = vld [vmem:[%s6210_s2 + $0x2e4] sm:$0xf] }
  0x40   :  { %v3398_v54 = vld [vmem:[%s6210_s2 + $0x520] sm:$0xf]  ;;  %v4250_v55 = vld [vmem:[%s6210_s2 + $0x52c] sm:$0xf0]  ;;  %v3271_v9 = vor.u32 %v4218_v51, %v3270_v50  ;;  %1736 = vmatpush.bf16.msrb.mxu2 %v3543_v57  ;;  %v3112_v21 = vld [vmem:[%s6210_s2 + $0x2f0] sm:$0xf0] }
  0x41   :  { %v3526_v58 = vld [vmem:[%s6210_s2 + $0x620] sm:$0xf]  ;;  %v4282_v59 = vld [vmem:[%s6210_s2 + $0x62c] sm:$0xf0]  ;;  %v3399_v13 = vor.u32 %v4250_v55, %v3398_v54  ;;  %1749 = vmatpush.bf16.msrb.mxu3 %v3671_v61  ;;  %v4208_v39 = vld [vmem:[%s6210_s2 + $0x3e4] sm:$0xf]  ;;  %v3115_v45 = vor.u32 %v4176_v20, %v3112_v21 }
  0x42   :  { %v3654_v62 = vld [vmem:[%s6210_s2 + $0x720] sm:$0xf]  ;;  %v4314_v63 = vld [vmem:[%s6210_s2 + $0x72c] sm:$0xf0]  ;;  %v3527_v14 = vor.u32 %v4282_v59, %v3526_v58  ;;  %1711 = vmatpush.bf16.msrb.mxu0 %v3271_v9  ;;  %v3240_v42 = vld [vmem:[%s6210_s2 + $0x3f0] sm:$0xf0] }
  0x43   :  { %v3254_v0 = vld [vmem:[%s6210_s2 + $0x400] sm:$0xf]  ;;  %v4214_v1 = vld [vmem:[%s6210_s2 + $0x40c] sm:$0xf0]  ;;  %v3655_v25 = vor.u32 %v4314_v63, %v3654_v62  ;;  %1724 = vmatpush.bf16.msrb.mxu1 %v3399_v13  ;;  %v4108_v43 = vld [vmem:[%s6210_s2 + $0xc4] sm:$0xf]  ;;  %v3243_v52 = vor.u32 %v4208_v39, %v3240_v42 }
  0x44   :  { %v3382_v4 = vld [vmem:[%s6210_s2 + $0x500] sm:$0xf]  ;;  %v4246_v5 = vld [vmem:[%s6210_s2 + $0x50c] sm:$0xf0]  ;;  %v3255_v26 = vor.u32 %v4214_v1, %v3254_v0  ;;  %1737 = vmatpush.bf16.msrb.mxu2 %v3527_v14  ;;  %v77_v44 = vmax.f32 %v75_v33, 0.0 }
  0x45   :  { %v3510_v10 = vld [vmem:[%s6210_s2 + $0x600] sm:$0xf]  ;;  %v4278_v6 = vld [vmem:[%s6210_s2 + $0x60c] sm:$0xf0]  ;;  %v3383_v32 = vor.u32 %v4246_v5, %v3382_v4  ;;  %v2840_v46 = vld [vmem:[%s6210_s2 + $0xd0] sm:$0xf0]  ;;  %1750 = vmatpush.bf16.msrb.mxu3 %v3655_v25 }
  0x46   :  { %v85_v23 = vld.sshfl [vmem:[#allocation1 + $0x10] sm:$0xff pattern:$0x73625140]  ;;  %v83_v24 = vld.sshfl [vmem:[#allocation1] sm:$0xff pattern:$0x73625140]  ;;  %v3511_v36 = vor.u32 %v4278_v6, %v3510_v10  ;;  %1712 = vmatpush.bf16.msrb.mxu0 %v3255_v26  ;;  %v2843_v53 = vor.u32 %v4108_v43, %v2840_v46 }
  0x47   :  { %v4923_v28 = vpack.c.bf16 %v85_v23, %v85_v23  ;;  %v4925_v29 = vpack.c.bf16 %v83_v24, %v83_v24  ;;  %v86_v30 = vld.sshfl [vmem:[#allocation1 + $0x18] sm:$0xff pattern:$0x73625140]  ;;  %v84_v31 = vld.sshfl [vmem:[#allocation1 + $0x8] sm:$0xff pattern:$0x73625140]  ;;  %1725 = vmatpush.bf16.msrb.mxu1 %v3383_v32 }
  0x48   :  { %v4927_v34 = vpack.c.bf16 %v86_v30, %v86_v30  ;;  %v4929_v35 = vpack.c.bf16 %v84_v31, %v84_v31  ;;  %v3638_v37 = vld [vmem:[%s6210_s2 + $0x700] sm:$0xf]  ;;  %v4310_v38 = vld [vmem:[%s6210_s2 + $0x70c] sm:$0xf0]  ;;  %v4140_v47 = vld [vmem:[%s6210_s2 + $0x1c4] sm:$0xf]  ;;  %1738 = vmatpush.bf16.msrb.mxu2 %v3511_v36 }
  0x49   :  { %1687 = vmatmul.bf16.vlgmr.msra.gmra.mxu2 %v4923_v28  ;;  %1661 = vmatmul.bf16.vlgmr.msra.gmra.mxu0 %v4925_v29  ;;  %v2968_v48 = vld [vmem:[%s6210_s2 + $0x1d0] sm:$0xf0]  ;;  %v3639_v49 = vor.u32 %v4310_v38, %v3638_v37  ;;  %v4172_v50 = vld [vmem:[%s6210_s2 + $0x2c4] sm:$0xf]  ;;  %82 = vst [vmem:[#allocation1 + $0x20] ss:$4 sm:$0xff] %v77_v44 }
  0x4a   :  { %1700 = vmatmul.bf16.vlgmr.msra.gmra.mxu3 %v4927_v34  ;;  %1674 = vmatmul.bf16.vlgmr.msra.gmra.mxu1 %v4929_v35  ;;  %v3096_v51 = vld [vmem:[%s6210_s2 + $0x2d0] sm:$0xf0]  ;;  %v2971_v54 = vor.u32 %v4140_v47, %v2968_v48  ;;  %v4204_v55 = vld [vmem:[%s6210_s2 + $0x3c4] sm:$0xf] }
  0x4b   :  { %1757 = vmatpush.bf16.msra.mxu0 %v2859_v40  ;;  %1770 = vmatpush.bf16.msra.mxu1 %v2987_v41  ;;  %v3224_v56 = vld [vmem:[%s6210_s2 + $0x3d0] sm:$0xf0]  ;;  %v4104_v57 = vld [vmem:[%s6210_s2 + $0xa4] sm:$0xf]  ;;  %v3099_v58 = vor.u32 %v4172_v50, %v3096_v51 }
  0x4c   :  { %1783 = vmatpush.bf16.msra.mxu2 %v3115_v45  ;;  %v2824_v59 = vld [vmem:[%s6210_s2 + $0xb0] sm:$0xf0]  ;;  %v4136_v60 = vld [vmem:[%s6210_s2 + $0x1a4] sm:$0xf]  ;;  %1751 = vmatpush.bf16.msrb.mxu3 %v3639_v49  ;;  %v3227_v0 = vor.u32 %v4204_v55, %v3224_v56 }
  0x4d   :  { %v2952_v61 = vld [vmem:[%s6210_s2 + $0x1b0] sm:$0xf0]  ;;  %v4168_v62 = vld [vmem:[%s6210_s2 + $0x2a4] sm:$0xf]  ;;  %v2827_v1 = vor.u32 %v4104_v57, %v2824_v59 }
  0x4e   :  { %v3080_v63 = vld [vmem:[%s6210_s2 + $0x2b0] sm:$0xf0]  ;;  %v2955_v2 = vor.u32 %v4136_v60, %v2952_v61  ;;  %v4200_v3 = vld [vmem:[%s6210_s2 + $0x3a4] sm:$0xf] }
  0x4f   :  { %1758 = vmatpush.bf16.msra.mxu0 %v2843_v53  ;;  %1771 = vmatpush.bf16.msra.mxu1 %v2971_v54  ;;  %v3208_v4 = vld [vmem:[%s6210_s2 + $0x3b0] sm:$0xf0]  ;;  %v3083_v7 = vor.u32 %v4168_v62, %v3080_v63  ;;  %v4100_v9 = vld [vmem:[%s6210_s2 + $0x84] sm:$0xf] }
  0x50   :  { %1796 = vmatpush.bf16.msra.mxu3 %v3243_v52  ;;  %1784 = vmatpush.bf16.msra.mxu2 %v3099_v58  ;;  %v89_v5 = vld.sshfl [vmem:[#allocation1 + $0x30] sm:$0xff pattern:$0x73625140]  ;;  %v87_v8 = vld.sshfl [vmem:[#allocation1 + $0x20] sm:$0xff pattern:$0x73625140]  ;;  %v3211_v12 = vor.u32 %v4200_v3, %v3208_v4 }
  0x51   :  { %v2808_v10 = vld [vmem:[%s6210_s2 + $0x90] sm:$0xf0]  ;;  %v90_v6 = vld.sshfl [vmem:[#allocation1 + $0x38] sm:$0xff pattern:$0x73625140]  ;;  %v5010_v16 = vpack.c.bf16 %v89_v5, %v89_v5  ;;  %v5012_v17 = vpack.c.bf16 %v87_v8, %v87_v8 }
  0x52   :  { %v88_v11 = vld.sshfl [vmem:[#allocation1 + $0x28] sm:$0xff pattern:$0x73625140]  ;;  %v4132_v13 = vld [vmem:[%s6210_s2 + $0x184] sm:$0xf]  ;;  %v5023_v21 = vpack.c.bf16 %v90_v6, %v90_v6  ;;  %v2811_v23 = vor.u32 %v4100_v9, %v2808_v10 }
  0x53   :  { %v2936_v14 = vld [vmem:[%s6210_s2 + $0x190] sm:$0xf0]  ;;  %v4164_v15 = vld [vmem:[%s6210_s2 + $0x284] sm:$0xf]  ;;  %1759 = vmatpush.bf16.msra.mxu0 %v2827_v1  ;;  %1772 = vmatpush.bf16.msra.mxu1 %v2955_v2  ;;  %v5025_v22 = vpack.c.bf16 %v88_v11, %v88_v11 }
  0x54   :  { %1797 = vmatpush.bf16.msra.mxu3 %v3227_v0  ;;  %v3064_v18 = vld [vmem:[%s6210_s2 + $0x290] sm:$0xf0]  ;;  %v4196_v19 = vld [vmem:[%s6210_s2 + $0x384] sm:$0xf]  ;;  %1785 = vmatpush.bf16.msra.mxu2 %v3083_v7  ;;  %v2939_v24 = vor.u32 %v4132_v13, %v2936_v14 }
  0x55   :  { %v3192_v20 = vld [vmem:[%s6210_s2 + $0x390] sm:$0xf0]  ;;  %v4096_v25 = vld [vmem:[%s6210_s2 + $0x64] sm:$0xf]  ;;  %v3067_v27 = vor.u32 %v4164_v15, %v3064_v18 }
  0x56   :  { %v2792_v26 = vld [vmem:[%s6210_s2 + $0x70] sm:$0xf0]  ;;  %v3195_v30 = vor.u32 %v4196_v19, %v3192_v20  ;;  %v4128_v31 = vld [vmem:[%s6210_s2 + $0x164] sm:$0xf] }
  0x57   :  { %v2920_v32 = vld [vmem:[%s6210_s2 + $0x170] sm:$0xf0]  ;;  %v4160_v33 = vld [vmem:[%s6210_s2 + $0x264] sm:$0xf]  ;;  %1760 = vmatpush.bf16.msra.mxu0 %v2811_v23  ;;  %1773 = vmatpush.bf16.msra.mxu1 %v2939_v24  ;;  %v2795_v39 = vor.u32 %v4096_v25, %v2792_v26 }
  0x58   :  { %1798 = vmatpush.bf16.msra.mxu3 %v3211_v12  ;;  %v3048_v36 = vld [vmem:[%s6210_s2 + $0x270] sm:$0xf0]  ;;  %v4192_v37 = vld [vmem:[%s6210_s2 + $0x364] sm:$0xf]  ;;  %v2923_v40 = vor.u32 %v4128_v31, %v2920_v32  ;;  %1786 = vmatpush.bf16.msra.mxu2 %v3067_v27 }
  0x59   :  { %1739 = vmatmul.bf16.vlgmr.msrb.gmra.mxu2 %v5010_v16  ;;  %1713 = vmatmul.bf16.vlgmr.msrb.gmra.mxu0 %v5012_v17  ;;  %v3176_v38 = vld [vmem:[%s6210_s2 + $0x370] sm:$0xf0]  ;;  %v4092_v41 = vld [vmem:[%s6210_s2 + $0x44] sm:$0xf]  ;;  %v3051_v43 = vor.u32 %v4160_v33, %v3048_v36 }
  0x5a   :  { %1752 = vmatmul.bf16.vlgmr.msrb.gmra.mxu3 %v5023_v21  ;;  %1726 = vmatmul.bf16.vlgmr.msrb.gmra.mxu1 %v5025_v22  ;;  %v2776_v42 = vld [vmem:[%s6210_s2 + $0x50] sm:$0xf0]  ;;  %v3179_v44 = vor.u32 %v4192_v37, %v3176_v38  ;;  %v4124_v45 = vld [vmem:[%s6210_s2 + $0x144] sm:$0xf] }
  0x5b   :  { %v2904_v46 = vld [vmem:[%s6210_s2 + $0x150] sm:$0xf0]  ;;  %v4156_v47 = vld [vmem:[%s6210_s2 + $0x244] sm:$0xf]  ;;  %1761 = vmatpush.bf16.msra.mxu0 %v2795_v39  ;;  %1774 = vmatpush.bf16.msra.mxu1 %v2923_v40  ;;  %v2779_v51 = vor.u32 %v4092_v41, %v2776_v42 }
  0x5c   :  { %1799 = vmatpush.bf16.msra.mxu3 %v3195_v30  ;;  %v3032_v48 = vld [vmem:[%s6210_s2 + $0x250] sm:$0xf0]  ;;  %v4188_v49 = vld [vmem:[%s6210_s2 + $0x344] sm:$0xf]  ;;  %v2907_v52 = vor.u32 %v4124_v45, %v2904_v46  ;;  %1787 = vmatpush.bf16.msra.mxu2 %v3051_v43 }
  0x5d   :  { %v3160_v50 = vld [vmem:[%s6210_s2 + $0x350] sm:$0xf0]  ;;  %v4088_v53 = vld [vmem:[%s6210_s2 + $0x24] sm:$0xf]  ;;  %v3035_v55 = vor.u32 %v4156_v47, %v3032_v48 }
  0x5e   :  { %v2760_v54 = vld [vmem:[%s6210_s2 + $0x30] sm:$0xf0]  ;;  %v3163_v56 = vor.u32 %v4188_v49, %v3160_v50  ;;  %v4120_v57 = vld [vmem:[%s6210_s2 + $0x124] sm:$0xf] }
  0x5f   :  { %v2888_v58 = vld [vmem:[%s6210_s2 + $0x130] sm:$0xf0]  ;;  %v4152_v59 = vld [vmem:[%s6210_s2 + $0x224] sm:$0xf]  ;;  %1762 = vmatpush.bf16.msra.mxu0 %v2779_v51  ;;  %1775 = vmatpush.bf16.msra.mxu1 %v2907_v52  ;;  %v2763_v0 = vor.u32 %v4088_v53, %v2760_v54 }
  0x60   :  { %1800 = vmatpush.bf16.msra.mxu3 %v3179_v44  ;;  %v3016_v60 = vld [vmem:[%s6210_s2 + $0x230] sm:$0xf0]  ;;  %v4184_v61 = vld [vmem:[%s6210_s2 + $0x324] sm:$0xf]  ;;  %v2891_v1 = vor.u32 %v4120_v57, %v2888_v58  ;;  %1788 = vmatpush.bf16.msra.mxu2 %v3035_v55 }
  0x61   :  { %v3144_v62 = vld [vmem:[%s6210_s2 + $0x330] sm:$0xf0]  ;;  %v4084_v63 = vld [vmem:[%s6210_s2 + $0x4] sm:$0xf]  ;;  %v3019_v5 = vor.u32 %v4152_v59, %v3016_v60 }
  0x62   :  { %v2744_v2 = vld [vmem:[%s6210_s2 + $0x10] sm:$0xf0]  ;;  %v4116_v3 = vld [vmem:[%s6210_s2 + $0x104] sm:$0xf]  ;;  %v3147_v7 = vor.u32 %v4184_v61, %v3144_v62 }
  0x63   :  { %v2872_v4 = vld [vmem:[%s6210_s2 + $0x110] sm:$0xf0]  ;;  %v4148_v8 = vld [vmem:[%s6210_s2 + $0x204] sm:$0xf]  ;;  %1763 = vmatpush.bf16.msra.mxu0 %v2763_v0  ;;  %1776 = vmatpush.bf16.msra.mxu1 %v2891_v1  ;;  %v2747_v18 = vor.u32 %v4084_v63, %v2744_v2 }
  0x64   :  { %1801 = vmatpush.bf16.msra.mxu3 %v3163_v56  ;;  %v3000_v9 = vld [vmem:[%s6210_s2 + $0x210] sm:$0xf0]  ;;  %v4180_v10 = vld [vmem:[%s6210_s2 + $0x304] sm:$0xf]  ;;  %v2875_v19 = vor.u32 %v4116_v3, %v2872_v4  ;;  %1789 = vmatpush.bf16.msra.mxu2 %v3019_v5 }
  0x65   :  { %v3128_v6 = vld [vmem:[%s6210_s2 + $0x310] sm:$0xf0]  ;;  %v4240_v11 = vld [vmem:[%s6210_s2 + $0x4e4] sm:$0xf]  ;;  %v3003_v25 = vor.u32 %v4148_v8, %v3000_v9 }
  0x66   :  { %v3368_v12 = vld [vmem:[%s6210_s2 + $0x4f0] sm:$0xf0]  ;;  %v4272_v13 = vld [vmem:[%s6210_s2 + $0x5e4] sm:$0xf]  ;;  %v3131_v26 = vor.u32 %v4180_v10, %v3128_v6 }
  0x67   :  { %v3496_v14 = vld [vmem:[%s6210_s2 + $0x5f0] sm:$0xf0]  ;;  %v4304_v15 = vld [vmem:[%s6210_s2 + $0x6e4] sm:$0xf]  ;;  %v3371_v27 = vor.u32 %v4240_v11, %v3368_v12  ;;  %1764 = vmatpush.bf16.msra.mxu0 %v2747_v18  ;;  %1777 = vmatpush.bf16.msra.mxu1 %v2875_v19 }
  0x68   :  { %v3624_v20 = vld [vmem:[%s6210_s2 + $0x6f0] sm:$0xf0]  ;;  %v4336_v23 = vld [vmem:[%s6210_s2 + $0x7e4] sm:$0xf]  ;;  %1802 = vmatpush.bf16.msra.mxu3 %v3147_v7  ;;  %v3499_v30 = vor.u32 %v4272_v13, %v3496_v14  ;;  %1790 = vmatpush.bf16.msra.mxu2 %v3003_v25 }
  0x69   :  { %v3752_v24 = vld [vmem:[%s6210_s2 + $0x7f0] sm:$0xf0]  ;;  %v4236_v31 = vld [vmem:[%s6210_s2 + $0x4c4] sm:$0xf]  ;;  %v3627_v33 = vor.u32 %v4304_v15, %v3624_v20 }
  0x6a   :  { %v3352_v32 = vld [vmem:[%s6210_s2 + $0x4d0] sm:$0xf0]  ;;  %v3755_v36 = vor.u32 %v4336_v23, %v3752_v24  ;;  %v4268_v37 = vld [vmem:[%s6210_s2 + $0x5c4] sm:$0xf]  ;;  %1765 = vmatmul.bf16.vlgmr.msra.gmra.mxu0 %v4925_v29  ;;  %1778 = vmatmul.bf16.vlgmr.msra.gmra.mxu1 %v4929_v35 }
  0x6b   :  { %v3480_v38 = vld [vmem:[%s6210_s2 + $0x5d0] sm:$0xf0]  ;;  %v4300_v39 = vld [vmem:[%s6210_s2 + $0x6c4] sm:$0xf]  ;;  %1809 = vmatpush.bf16.msrb.mxu0 %v3371_v27  ;;  %1822 = vmatpush.bf16.msrb.mxu1 %v3499_v30  ;;  %v3355_v43 = vor.u32 %v4236_v31, %v3352_v32 }
  0x6c   :  { %v3608_v40 = vld [vmem:[%s6210_s2 + $0x6d0] sm:$0xf0]  ;;  %v4332_v41 = vld [vmem:[%s6210_s2 + $0x7c4] sm:$0xf]  ;;  %1803 = vmatpush.bf16.msra.mxu3 %v3131_v26  ;;  %v3483_v44 = vor.u32 %v4268_v37, %v3480_v38  ;;  %1835 = vmatpush.bf16.msrb.mxu2 %v3627_v33 }
  0x6d   :  { %v3736_v42 = vld [vmem:[%s6210_s2 + $0x7d0] sm:$0xf0]  ;;  %v4232_v45 = vld [vmem:[%s6210_s2 + $0x4a4] sm:$0xf]  ;;  %v3611_v47 = vor.u32 %v4300_v39, %v3608_v40  ;;  %1791 = vmatmul.bf16.vlgmr.msra.gmra.mxu2 %v4923_v28 }
  0x6e   :  { %v3336_v46 = vld [vmem:[%s6210_s2 + $0x4b0] sm:$0xf0]  ;;  %v3739_v48 = vor.u32 %v4332_v41, %v3736_v42  ;;  %v4264_v49 = vld [vmem:[%s6210_s2 + $0x5a4] sm:$0xf] }
  0x6f   :  { %v3464_v50 = vld [vmem:[%s6210_s2 + $0x5b0] sm:$0xf0]  ;;  %v4296_v51 = vld [vmem:[%s6210_s2 + $0x6a4] sm:$0xf]  ;;  %1804 = vmatmul.bf16.vlgmr.msra.gmra.mxu3 %v4927_v34  ;;  %1810 = vmatpush.bf16.msrb.mxu0 %v3355_v43  ;;  %v3339_v55 = vor.u32 %v4232_v45, %v3336_v46 }
  0x70   :  { %1848 = vmatpush.bf16.msrb.mxu3 %v3755_v36  ;;  %v3592_v52 = vld [vmem:[%s6210_s2 + $0x6b0] sm:$0xf0]  ;;  %v4328_v53 = vld [vmem:[%s6210_s2 + $0x7a4] sm:$0xf]  ;;  %1823 = vmatpush.bf16.msrb.mxu1 %v3483_v44  ;;  %v3467_v56 = vor.u32 %v4264_v49, %v3464_v50 }
  0x71   :  { %v3720_v54 = vld [vmem:[%s6210_s2 + $0x7b0] sm:$0xf0]  ;;  %v4228_v57 = vld [vmem:[%s6210_s2 + $0x484] sm:$0xf]  ;;  %1836 = vmatpush.bf16.msrb.mxu2 %v3611_v47  ;;  %v3595_v59 = vor.u32 %v4296_v51, %v3592_v52 }
  0x72   :  { %v3320_v58 = vld [vmem:[%s6210_s2 + $0x490] sm:$0xf0]  ;;  %v3723_v60 = vor.u32 %v4328_v53, %v3720_v54  ;;  %v4260_v61 = vld [vmem:[%s6210_s2 + $0x584] sm:$0xf] }
  0x73   :  { %v3448_v62 = vld [vmem:[%s6210_s2 + $0x590] sm:$0xf0]  ;;  %v4292_v63 = vld [vmem:[%s6210_s2 + $0x684] sm:$0xf]  ;;  %1811 = vmatpush.bf16.msrb.mxu0 %v3339_v55  ;;  %v3323_v3 = vor.u32 %v4228_v57, %v3320_v58 }
  0x74   :  { %1849 = vmatpush.bf16.msrb.mxu3 %v3739_v48  ;;  %v3576_v0 = vld [vmem:[%s6210_s2 + $0x690] sm:$0xf0]  ;;  %v4324_v1 = vld [vmem:[%s6210_s2 + $0x784] sm:$0xf]  ;;  %1824 = vmatpush.bf16.msrb.mxu1 %v3467_v56  ;;  %v3451_v4 = vor.u32 %v4260_v61, %v3448_v62  ;;  %v2990_v61 = vld [vmem:[%s6210_s2 + $0x1e8] sm:$0xf] }
  0x75   :  { %v3704_v2 = vld [vmem:[%s6210_s2 + $0x790] sm:$0xf0]  ;;  %v4224_v5 = vld [vmem:[%s6210_s2 + $0x464] sm:$0xf]  ;;  %1837 = vmatpush.bf16.msrb.mxu2 %v3595_v59  ;;  %v3579_v8 = vor.u32 %v4292_v63, %v3576_v0  ;;  %v2862_v59 = vld [vmem:[%s6210_s2 + $0xe8] sm:$0xf] }
  0x76   :  { %v3304_v7 = vld [vmem:[%s6210_s2 + $0x470] sm:$0xf0]  ;;  %v3707_v9 = vor.u32 %v4324_v1, %v3704_v2  ;;  %v4256_v10 = vld [vmem:[%s6210_s2 + $0x564] sm:$0xf]  ;;  %v4147_v62 = vld [vmem:[%s6210_s2 + $0x1f4] sm:$0xf0] }
  0x77   :  { %v3432_v6 = vld [vmem:[%s6210_s2 + $0x570] sm:$0xf0]  ;;  %v4288_v11 = vld [vmem:[%s6210_s2 + $0x664] sm:$0xf]  ;;  %1812 = vmatpush.bf16.msrb.mxu0 %v3323_v3  ;;  %v3307_v15 = vor.u32 %v4224_v5, %v3304_v7  ;;  %v3118_v63 = vld [vmem:[%s6210_s2 + $0x2e8] sm:$0xf] }
  0x78   :  { %1850 = vmatpush.bf16.msrb.mxu3 %v3723_v60  ;;  %v3560_v12 = vld [vmem:[%s6210_s2 + $0x670] sm:$0xf0]  ;;  %v4320_v13 = vld [vmem:[%s6210_s2 + $0x764] sm:$0xf]  ;;  %1825 = vmatpush.bf16.msrb.mxu1 %v3451_v4  ;;  %v3435_v18 = vor.u32 %v4256_v10, %v3432_v6  ;;  %v4115_v60 = vld [vmem:[%s6210_s2 + $0xf4] sm:$0xf0] }
  0x79   :  { %v3688_v14 = vld [vmem:[%s6210_s2 + $0x770] sm:$0xf0]  ;;  %v4220_v19 = vld [vmem:[%s6210_s2 + $0x444] sm:$0xf]  ;;  %1838 = vmatpush.bf16.msrb.mxu2 %v3579_v8  ;;  %v3563_v23 = vor.u32 %v4288_v11, %v3560_v12  ;;  %v4179_v2 = vld [vmem:[%s6210_s2 + $0x2f4] sm:$0xf0]  ;;  %v2863_v8 = vor.u32 %v4115_v60, %v2862_v59 }
  0x7a   :  { %v3288_v20 = vld [vmem:[%s6210_s2 + $0x450] sm:$0xf0]  ;;  %v3691_v24 = vor.u32 %v4320_v13, %v3688_v14  ;;  %v4252_v25 = vld [vmem:[%s6210_s2 + $0x544] sm:$0xf]  ;;  %v3246_v3 = vld [vmem:[%s6210_s2 + $0x3e8] sm:$0xf]  ;;  %v3119_v11 = vor.u32 %v4179_v2, %v3118_v63 }
  0x7b   :  { %v3416_v26 = vld [vmem:[%s6210_s2 + $0x550] sm:$0xf0]  ;;  %v4284_v27 = vld [vmem:[%s6210_s2 + $0x644] sm:$0xf]  ;;  %1813 = vmatpush.bf16.msrb.mxu0 %v3307_v15  ;;  %v3291_v33 = vor.u32 %v4220_v19, %v3288_v20  ;;  %v4211_v4 = vld [vmem:[%s6210_s2 + $0x3f4] sm:$0xf0] }
  0x7c   :  { %1851 = vmatpush.bf16.msrb.mxu3 %v3707_v9  ;;  %v3544_v30 = vld [vmem:[%s6210_s2 + $0x650] sm:$0xf0]  ;;  %v4316_v31 = vld [vmem:[%s6210_s2 + $0x744] sm:$0xf]  ;;  %1826 = vmatpush.bf16.msrb.mxu1 %v3435_v18  ;;  %v3419_v36 = vor.u32 %v4252_v25, %v3416_v26  ;;  %v2991_v9 = vor.u32 %v4147_v62, %v2990_v61  ;;  %v2846_v10 = vld [vmem:[%s6210_s2 + $0xc8] sm:$0xf]  ;;  %v3247_v12 = vor.u32 %v4211_v4, %v3246_v3 }
  0x7d   :  { %v3672_v32 = vld [vmem:[%s6210_s2 + $0x750] sm:$0xf0]  ;;  %v4216_v37 = vld [vmem:[%s6210_s2 + $0x424] sm:$0xf]  ;;  %1839 = vmatpush.bf16.msrb.mxu2 %v3563_v23  ;;  %v3547_v39 = vor.u32 %v4284_v27, %v3544_v30  ;;  %v4111_v6 = vld [vmem:[%s6210_s2 + $0xd4] sm:$0xf0] }
  0x7e   :  { %v3272_v38 = vld [vmem:[%s6210_s2 + $0x430] sm:$0xf0]  ;;  %v3675_v40 = vor.u32 %v4316_v31, %v3672_v32  ;;  %v4248_v41 = vld [vmem:[%s6210_s2 + $0x524] sm:$0xf]  ;;  %v2974_v13 = vld [vmem:[%s6210_s2 + $0x1c8] sm:$0xf]  ;;  %v2847_v23 = vor.u32 %v4111_v6, %v2846_v10 }
  0x7f   :  { %v3400_v42 = vld [vmem:[%s6210_s2 + $0x530] sm:$0xf0]  ;;  %v4280_v43 = vld [vmem:[%s6210_s2 + $0x624] sm:$0xf]  ;;  %1814 = vmatpush.bf16.msrb.mxu0 %v3291_v33  ;;  %v3275_v48 = vor.u32 %v4216_v37, %v3272_v38  ;;  %v4143_v14 = vld [vmem:[%s6210_s2 + $0x1d4] sm:$0xf0] }
  0x80   :  { %1852 = vmatpush.bf16.msrb.mxu3 %v3691_v24  ;;  %v3528_v44 = vld [vmem:[%s6210_s2 + $0x630] sm:$0xf0]  ;;  %v4312_v45 = vld [vmem:[%s6210_s2 + $0x724] sm:$0xf]  ;;  %1827 = vmatpush.bf16.msrb.mxu1 %v3419_v36  ;;  %v3403_v49 = vor.u32 %v4248_v41, %v3400_v42  ;;  %v3102_v15 = vld [vmem:[%s6210_s2 + $0x2c8] sm:$0xf]  ;;  %v2975_v24 = vor.u32 %v4143_v14, %v2974_v13 }
  0x81   :  { %v3656_v46 = vld [vmem:[%s6210_s2 + $0x730] sm:$0xf0]  ;;  %v4212_v47 = vld [vmem:[%s6210_s2 + $0x404] sm:$0xf]  ;;  %1840 = vmatpush.bf16.msrb.mxu2 %v3547_v39  ;;  %v3531_v53 = vor.u32 %v4280_v43, %v3528_v44  ;;  %v4175_v18 = vld [vmem:[%s6210_s2 + $0x2d4] sm:$0xf0] }
  0x82   :  { %v3256_v50 = vld [vmem:[%s6210_s2 + $0x410] sm:$0xf0]  ;;  %v4244_v51 = vld [vmem:[%s6210_s2 + $0x504] sm:$0xf]  ;;  %v3659_v54 = vor.u32 %v4312_v45, %v3656_v46  ;;  %v3230_v19 = vld [vmem:[%s6210_s2 + $0x3c8] sm:$0xf]  ;;  %v3103_v27 = vor.u32 %v4175_v18, %v3102_v15 }
  0x83   :  { %v3384_v52 = vld [vmem:[%s6210_s2 + $0x510] sm:$0xf0]  ;;  %v4276_v55 = vld [vmem:[%s6210_s2 + $0x604] sm:$0xf]  ;;  %1815 = vmatpush.bf16.msrb.mxu0 %v3275_v48  ;;  %v3259_v0 = vor.u32 %v4212_v47, %v3256_v50  ;;  %v4207_v20 = vld [vmem:[%s6210_s2 + $0x3d4] sm:$0xf0] }
  0x84   :  { %1853 = vmatpush.bf16.msrb.mxu3 %v3675_v40  ;;  %v3512_v56 = vld [vmem:[%s6210_s2 + $0x610] sm:$0xf0]  ;;  %v4308_v57 = vld [vmem:[%s6210_s2 + $0x704] sm:$0xf]  ;;  %1828 = vmatpush.bf16.msrb.mxu1 %v3403_v49  ;;  %v3387_v1 = vor.u32 %v4244_v51, %v3384_v52  ;;  %v2830_v25 = vld [vmem:[%s6210_s2 + $0xa8] sm:$0xf]  ;;  %v3231_v30 = vor.u32 %v4207_v20, %v3230_v19 }
  0x85   :  { %v3640_v58 = vld [vmem:[%s6210_s2 + $0x710] sm:$0xf0]  ;;  %1841 = vmatpush.bf16.msrb.mxu2 %v3531_v53  ;;  %v3515_v5 = vor.u32 %v4276_v55, %v3512_v56  ;;  %v4107_v26 = vld [vmem:[%s6210_s2 + $0xb4] sm:$0xf0]  ;;  %v2958_v31 = vld [vmem:[%s6210_s2 + $0x1a8] sm:$0xf] }
  0x86   :  { %v3643_v7 = vor.u32 %v4308_v57, %v3640_v58  ;;  %v4139_v32 = vld [vmem:[%s6210_s2 + $0x1b4] sm:$0xf0]  ;;  %v3086_v33 = vld [vmem:[%s6210_s2 + $0x2a8] sm:$0xf]  ;;  %v2831_v39 = vor.u32 %v4107_v26, %v2830_v25 }
  0x87   :  { %1816 = vmatpush.bf16.msrb.mxu0 %v3259_v0  ;;  %v4171_v36 = vld [vmem:[%s6210_s2 + $0x2b4] sm:$0xf0]  ;;  %v3214_v37 = vld [vmem:[%s6210_s2 + $0x3a8] sm:$0xf]  ;;  %v2959_v40 = vor.u32 %v4139_v32, %v2958_v31 }
  0x88   :  { %1854 = vmatpush.bf16.msrb.mxu3 %v3659_v54  ;;  %1829 = vmatpush.bf16.msrb.mxu1 %v3387_v1  ;;  %v4203_v38 = vld [vmem:[%s6210_s2 + $0x3b4] sm:$0xf0]  ;;  %v2814_v41 = vld [vmem:[%s6210_s2 + $0x88] sm:$0xf]  ;;  %v3087_v43 = vor.u32 %v4171_v36, %v3086_v33 }
  0x89   :  { %1842 = vmatpush.bf16.msrb.mxu2 %v3515_v5  ;;  %v4103_v42 = vld [vmem:[%s6210_s2 + $0x94] sm:$0xf0]  ;;  %v3215_v44 = vor.u32 %v4203_v38, %v3214_v37  ;;  %v2942_v45 = vld [vmem:[%s6210_s2 + $0x188] sm:$0xf] }
  0x8a   :  { %1817 = vmatmul.bf16.vlgmr.msrb.gmra.mxu0 %v5012_v17  ;;  %v4135_v46 = vld [vmem:[%s6210_s2 + $0x194] sm:$0xf0]  ;;  %v3070_v47 = vld [vmem:[%s6210_s2 + $0x288] sm:$0xf]  ;;  %v2815_v51 = vor.u32 %v4103_v42, %v2814_v41 }
  0x8b   :  { %1861 = vmatpush.bf16.msra.mxu0 %v2863_v8  ;;  %1830 = vmatmul.bf16.vlgmr.msrb.gmra.mxu1 %v5025_v22  ;;  %v4167_v48 = vld [vmem:[%s6210_s2 + $0x294] sm:$0xf0]  ;;  %v3198_v49 = vld [vmem:[%s6210_s2 + $0x388] sm:$0xf]  ;;  %v2943_v52 = vor.u32 %v4135_v46, %v2942_v45 }
  0x8c   :  { %1855 = vmatpush.bf16.msrb.mxu3 %v3643_v7  ;;  %1874 = vmatpush.bf16.msra.mxu1 %v2991_v9  ;;  %v4199_v50 = vld [vmem:[%s6210_s2 + $0x394] sm:$0xf0]  ;;  %v2798_v53 = vld [vmem:[%s6210_s2 + $0x68] sm:$0xf]  ;;  %v3071_v55 = vor.u32 %v4167_v48, %v3070_v47 }
  0x8d   :  { %1887 = vmatpush.bf16.msra.mxu2 %v3119_v11  ;;  %v4099_v54 = vld [vmem:[%s6210_s2 + $0x74] sm:$0xf0]  ;;  %v3199_v56 = vor.u32 %v4199_v50, %v3198_v49  ;;  %v2926_v57 = vld [vmem:[%s6210_s2 + $0x168] sm:$0xf] }
  0x8e   :  { %1843 = vmatmul.bf16.vlgmr.msrb.gmra.mxu2 %v5010_v16  ;;  %v4131_v58 = vld [vmem:[%s6210_s2 + $0x174] sm:$0xf0]  ;;  %v3054_v59 = vld [vmem:[%s6210_s2 + $0x268] sm:$0xf]  ;;  %v2799_v63 = vor.u32 %v4099_v54, %v2798_v53 }
  0x8f   :  { %1856 = vmatmul.bf16.vlgmr.msrb.gmra.mxu3 %v5023_v21  ;;  %1862 = vmatpush.bf16.msra.mxu0 %v2847_v23  ;;  %v4163_v60 = vld [vmem:[%s6210_s2 + $0x274] sm:$0xf0]  ;;  %v3182_v61 = vld [vmem:[%s6210_s2 + $0x368] sm:$0xf]  ;;  %v2927_v0 = vor.u32 %v4131_v58, %v2926_v57 }
  0x90   :  { %1900 = vmatpush.bf16.msra.mxu3 %v3247_v12  ;;  %1875 = vmatpush.bf16.msra.mxu1 %v2975_v24  ;;  %v4195_v62 = vld [vmem:[%s6210_s2 + $0x374] sm:$0xf0]  ;;  %v2782_v1 = vld [vmem:[%s6210_s2 + $0x48] sm:$0xf]  ;;  %v3055_v3 = vor.u32 %v4163_v60, %v3054_v59 }
  0x91   :  { %1888 = vmatpush.bf16.msra.mxu2 %v3103_v27  ;;  %v4095_v2 = vld [vmem:[%s6210_s2 + $0x54] sm:$0xf0]  ;;  %v3183_v4 = vor.u32 %v4195_v62, %v3182_v61  ;;  %v2910_v5 = vld [vmem:[%s6210_s2 + $0x148] sm:$0xf] }
  0x92   :  { %v4127_v7 = vld [vmem:[%s6210_s2 + $0x154] sm:$0xf0]  ;;  %v3038_v8 = vld [vmem:[%s6210_s2 + $0x248] sm:$0xf]  ;;  %v2783_v11 = vor.u32 %v4095_v2, %v2782_v1 }
  0x93   :  { %1863 = vmatpush.bf16.msra.mxu0 %v2831_v39  ;;  %v4159_v9 = vld [vmem:[%s6210_s2 + $0x254] sm:$0xf0]  ;;  %v3166_v10 = vld [vmem:[%s6210_s2 + $0x348] sm:$0xf]  ;;  %v2911_v12 = vor.u32 %v4127_v7, %v2910_v5 }
  0x94   :  { %1901 = vmatpush.bf16.msra.mxu3 %v3231_v30  ;;  %1876 = vmatpush.bf16.msra.mxu1 %v2959_v40  ;;  %v4191_v6 = vld [vmem:[%s6210_s2 + $0x354] sm:$0xf0]  ;;  %v2766_v13 = vld [vmem:[%s6210_s2 + $0x28] sm:$0xf]  ;;  %v3039_v15 = vor.u32 %v4159_v9, %v3038_v8 }
  0x95   :  { %1889 = vmatpush.bf16.msra.mxu2 %v3087_v43  ;;  %v4091_v14 = vld [vmem:[%s6210_s2 + $0x34] sm:$0xf0]  ;;  %v3167_v18 = vor.u32 %v4191_v6, %v3166_v10  ;;  %v2894_v19 = vld [vmem:[%s6210_s2 + $0x128] sm:$0xf] }
  0x96   :  { %v4123_v20 = vld [vmem:[%s6210_s2 + $0x134] sm:$0xf0]  ;;  %v3022_v23 = vld [vmem:[%s6210_s2 + $0x228] sm:$0xf]  ;;  %v2767_v30 = vor.u32 %v4091_v14, %v2766_v13 }
  0x97   :  { %1864 = vmatpush.bf16.msra.mxu0 %v2815_v51  ;;  %v4155_v24 = vld [vmem:[%s6210_s2 + $0x234] sm:$0xf0]  ;;  %v3150_v25 = vld [vmem:[%s6210_s2 + $0x328] sm:$0xf]  ;;  %v2895_v31 = vor.u32 %v4123_v20, %v2894_v19 }
  0x98   :  { %1902 = vmatpush.bf16.msra.mxu3 %v3215_v44  ;;  %1877 = vmatpush.bf16.msra.mxu1 %v2943_v52  ;;  %v4187_v26 = vld [vmem:[%s6210_s2 + $0x334] sm:$0xf0]  ;;  %v2750_v27 = vld [vmem:[%s6210_s2 + $0x8] sm:$0xf]  ;;  %v3023_v37 = vor.u32 %v4155_v24, %v3022_v23 }
  0x99   :  { %1890 = vmatpush.bf16.msra.mxu2 %v3071_v55  ;;  %v4087_v32 = vld [vmem:[%s6210_s2 + $0x14] sm:$0xf0]  ;;  %v2878_v33 = vld [vmem:[%s6210_s2 + $0x108] sm:$0xf]  ;;  %v3151_v38 = vor.u32 %v4187_v26, %v3150_v25 }
  0x9a   :  { %v4119_v36 = vld [vmem:[%s6210_s2 + $0x114] sm:$0xf0]  ;;  %v3006_v39 = vld [vmem:[%s6210_s2 + $0x208] sm:$0xf]  ;;  %v2751_v48 = vor.u32 %v4087_v32, %v2750_v27 }
  0x9b   :  { %1865 = vmatpush.bf16.msra.mxu0 %v2799_v63  ;;  %v4151_v40 = vld [vmem:[%s6210_s2 + $0x214] sm:$0xf0]  ;;  %v3134_v41 = vld [vmem:[%s6210_s2 + $0x308] sm:$0xf]  ;;  %v2879_v49 = vor.u32 %v4119_v36, %v2878_v33 }
  0x9c   :  { %1903 = vmatpush.bf16.msra.mxu3 %v3199_v56  ;;  %1878 = vmatpush.bf16.msra.mxu1 %v2927_v0  ;;  %v4183_v42 = vld [vmem:[%s6210_s2 + $0x314] sm:$0xf0]  ;;  %v3374_v43 = vld [vmem:[%s6210_s2 + $0x4e8] sm:$0xf]  ;;  %v3007_v53 = vor.u32 %v4151_v40, %v3006_v39 }
  0x9d   :  { %1891 = vmatpush.bf16.msra.mxu2 %v3055_v3  ;;  %v4243_v44 = vld [vmem:[%s6210_s2 + $0x4f4] sm:$0xf0]  ;;  %v3502_v45 = vld [vmem:[%s6210_s2 + $0x5e8] sm:$0xf]  ;;  %v3135_v54 = vor.u32 %v4183_v42, %v3134_v41 }
  0x9e   :  { %v4275_v46 = vld [vmem:[%s6210_s2 + $0x5f4] sm:$0xf0]  ;;  %v3630_v47 = vld [vmem:[%s6210_s2 + $0x6e8] sm:$0xf]  ;;  %v3375_v55 = vor.u32 %v4243_v44, %v3374_v43 }
  0x9f   :  { %1866 = vmatpush.bf16.msra.mxu0 %v2783_v11  ;;  %v4307_v50 = vld [vmem:[%s6210_s2 + $0x6f4] sm:$0xf0]  ;;  %v3758_v51 = vld [vmem:[%s6210_s2 + $0x7e8] sm:$0xf]  ;;  %v3503_v56 = vor.u32 %v4275_v46, %v3502_v45 }
  0xa0   :  { %1904 = vmatpush.bf16.msra.mxu3 %v3183_v4  ;;  %1879 = vmatpush.bf16.msra.mxu1 %v2911_v12  ;;  %v4339_v52 = vld [vmem:[%s6210_s2 + $0x7f4] sm:$0xf0]  ;;  %v3358_v57 = vld [vmem:[%s6210_s2 + $0x4c8] sm:$0xf]  ;;  %v3631_v59 = vor.u32 %v4307_v50, %v3630_v47 }
  0xa1   :  { %1892 = vmatpush.bf16.msra.mxu2 %v3039_v15  ;;  %v4239_v58 = vld [vmem:[%s6210_s2 + $0x4d4] sm:$0xf0]  ;;  %v3759_v60 = vor.u32 %v4339_v52, %v3758_v51  ;;  %v3486_v61 = vld [vmem:[%s6210_s2 + $0x5c8] sm:$0xf] }
  0xa2   :  { %v4271_v62 = vld [vmem:[%s6210_s2 + $0x5d4] sm:$0xf0]  ;;  %v3614_v63 = vld [vmem:[%s6210_s2 + $0x6c8] sm:$0xf]  ;;  %v3359_v3 = vor.u32 %v4239_v58, %v3358_v57 }
  0xa3   :  { %1867 = vmatpush.bf16.msra.mxu0 %v2767_v30  ;;  %v4303_v0 = vld [vmem:[%s6210_s2 + $0x6d4] sm:$0xf0]  ;;  %v3742_v1 = vld [vmem:[%s6210_s2 + $0x7c8] sm:$0xf]  ;;  %v3487_v4 = vor.u32 %v4271_v62, %v3486_v61 }
  0xa4   :  { %1905 = vmatpush.bf16.msra.mxu3 %v3167_v18  ;;  %1880 = vmatpush.bf16.msra.mxu1 %v2895_v31  ;;  %v4335_v2 = vld [vmem:[%s6210_s2 + $0x7d4] sm:$0xf0]  ;;  %v3342_v5 = vld [vmem:[%s6210_s2 + $0x4a8] sm:$0xf]  ;;  %v3615_v8 = vor.u32 %v4303_v0, %v3614_v63 }
  0xa5   :  { %1893 = vmatpush.bf16.msra.mxu2 %v3023_v37  ;;  %v4235_v7 = vld [vmem:[%s6210_s2 + $0x4b4] sm:$0xf0]  ;;  %v3743_v9 = vor.u32 %v4335_v2, %v3742_v1  ;;  %v3470_v10 = vld [vmem:[%s6210_s2 + $0x5a8] sm:$0xf] }
  0xa6   :  { %v4267_v6 = vld [vmem:[%s6210_s2 + $0x5b4] sm:$0xf0]  ;;  %v3598_v11 = vld [vmem:[%s6210_s2 + $0x6a8] sm:$0xf]  ;;  %v3343_v15 = vor.u32 %v4235_v7, %v3342_v5 }
  0xa7   :  { %1868 = vmatpush.bf16.msra.mxu0 %v2751_v48  ;;  %v4299_v12 = vld [vmem:[%s6210_s2 + $0x6b4] sm:$0xf0]  ;;  %v3726_v13 = vld [vmem:[%s6210_s2 + $0x7a8] sm:$0xf]  ;;  %v3471_v18 = vor.u32 %v4267_v6, %v3470_v10 }
  0xa8   :  { %1906 = vmatpush.bf16.msra.mxu3 %v3151_v38  ;;  %1881 = vmatpush.bf16.msra.mxu1 %v2879_v49  ;;  %v4331_v14 = vld [vmem:[%s6210_s2 + $0x7b4] sm:$0xf0]  ;;  %v3326_v19 = vld [vmem:[%s6210_s2 + $0x488] sm:$0xf]  ;;  %v3599_v23 = vor.u32 %v4299_v12, %v3598_v11 }
  0xa9   :  { %1894 = vmatpush.bf16.msra.mxu2 %v3007_v53  ;;  %v4231_v20 = vld [vmem:[%s6210_s2 + $0x494] sm:$0xf0]  ;;  %v3727_v24 = vor.u32 %v4331_v14, %v3726_v13  ;;  %v3454_v25 = vld [vmem:[%s6210_s2 + $0x588] sm:$0xf] }
  0xaa   :  { %1869 = vmatmul.bf16.vlgmr.msra.gmra.mxu0 %v4925_v29  ;;  %v4263_v26 = vld [vmem:[%s6210_s2 + $0x594] sm:$0xf0]  ;;  %v3582_v27 = vld [vmem:[%s6210_s2 + $0x688] sm:$0xf]  ;;  %v3327_v33 = vor.u32 %v4231_v20, %v3326_v19 }
  0xab   :  { %1913 = vmatpush.bf16.msrb.mxu0 %v3375_v55  ;;  %1882 = vmatmul.bf16.vlgmr.msra.gmra.mxu1 %v4929_v35  ;;  %v4295_v30 = vld [vmem:[%s6210_s2 + $0x694] sm:$0xf0]  ;;  %v3710_v31 = vld [vmem:[%s6210_s2 + $0x788] sm:$0xf]  ;;  %v3455_v36 = vor.u32 %v4263_v26, %v3454_v25  ;;  %v4145_v25 = vld [vmem:[%s6210_s2 + $0x1ec] sm:$0xf] }
  0xac   :  { %1907 = vmatpush.bf16.msra.mxu3 %v3135_v54  ;;  %1926 = vmatpush.bf16.msrb.mxu1 %v3503_v56  ;;  %v4327_v32 = vld [vmem:[%s6210_s2 + $0x794] sm:$0xf0]  ;;  %v3310_v37 = vld [vmem:[%s6210_s2 + $0x468] sm:$0xf]  ;;  %v3583_v39 = vor.u32 %v4295_v30, %v3582_v27  ;;  %v2992_v26 = vld [vmem:[%s6210_s2 + $0x1f8] sm:$0xf0] }
  0xad   :  { %1939 = vmatpush.bf16.msrb.mxu2 %v3631_v59  ;;  %v4227_v38 = vld [vmem:[%s6210_s2 + $0x474] sm:$0xf0]  ;;  %v3711_v40 = vor.u32 %v4327_v32, %v3710_v31  ;;  %v3438_v41 = vld [vmem:[%s6210_s2 + $0x568] sm:$0xf]  ;;  %v4177_v27 = vld [vmem:[%s6210_s2 + $0x2ec] sm:$0xf] }
  0xae   :  { %1895 = vmatmul.bf16.vlgmr.msra.gmra.mxu2 %v4923_v28  ;;  %v4259_v42 = vld [vmem:[%s6210_s2 + $0x574] sm:$0xf0]  ;;  %v3566_v43 = vld [vmem:[%s6210_s2 + $0x668] sm:$0xf]  ;;  %v3311_v47 = vor.u32 %v4227_v38, %v3310_v37  ;;  %v5733_v30 = vld [vmem:[%s6211_s3] sm:$0xf] }
  0xaf   :  { %1908 = vmatmul.bf16.vlgmr.msra.gmra.mxu3 %v4927_v34  ;;  %1914 = vmatpush.bf16.msrb.mxu0 %v3359_v3  ;;  %v4291_v44 = vld [vmem:[%s6210_s2 + $0x674] sm:$0xf0]  ;;  %v3694_v45 = vld [vmem:[%s6210_s2 + $0x768] sm:$0xf]  ;;  %v3439_v48 = vor.u32 %v4259_v42, %v3438_v41  ;;  %v3248_v37 = vld [vmem:[%s6210_s2 + $0x3f8] sm:$0xf0]  ;;  %v2995_v41 = vor.u32 %v4145_v25, %v2992_v26 }
  0xb0   :  { %1952 = vmatpush.bf16.msrb.mxu3 %v3759_v60  ;;  %1927 = vmatpush.bf16.msrb.mxu1 %v3487_v4  ;;  %v4323_v46 = vld [vmem:[%s6210_s2 + $0x774] sm:$0xf0]  ;;  %v3294_v49 = vld [vmem:[%s6210_s2 + $0x448] sm:$0xf]  ;;  %v3567_v51 = vor.u32 %v4291_v44, %v3566_v43  ;;  %v365_v42 = vperm.slane %v5733_v30, 0 }
  0xb1   :  { %1940 = vmatpush.bf16.msrb.mxu2 %v3615_v8  ;;  %v4223_v50 = vld [vmem:[%s6210_s2 + $0x454] sm:$0xf0]  ;;  %v3695_v52 = vor.u32 %v4323_v46, %v3694_v45  ;;  %v3422_v53 = vld [vmem:[%s6210_s2 + $0x548] sm:$0xf]  ;;  %v4109_v43 = vld [vmem:[%s6210_s2 + $0xcc] sm:$0xf] }
  0xb2   :  { %v4255_v54 = vld [vmem:[%s6210_s2 + $0x554] sm:$0xf0]  ;;  %v3550_v55 = vld [vmem:[%s6210_s2 + $0x648] sm:$0xf]  ;;  %v3295_v59 = vor.u32 %v4223_v50, %v3294_v49  ;;  %v2848_v44 = vld [vmem:[%s6210_s2 + $0xd8] sm:$0xf0] }
  0xb3   :  { %1915 = vmatpush.bf16.msrb.mxu0 %v3343_v15  ;;  %v4287_v56 = vld [vmem:[%s6210_s2 + $0x654] sm:$0xf0]  ;;  %v3678_v57 = vld [vmem:[%s6210_s2 + $0x748] sm:$0xf]  ;;  %v3423_v60 = vor.u32 %v4255_v54, %v3422_v53  ;;  %v4173_v49 = vld [vmem:[%s6210_s2 + $0x2cc] sm:$0xf] }
  0xb4   :  { %1953 = vmatpush.bf16.msrb.mxu3 %v3743_v9  ;;  %1928 = vmatpush.bf16.msrb.mxu1 %v3471_v18  ;;  %v4319_v58 = vld [vmem:[%s6210_s2 + $0x754] sm:$0xf0]  ;;  %v3278_v61 = vld [vmem:[%s6210_s2 + $0x428] sm:$0xf]  ;;  %v3551_v63 = vor.u32 %v4287_v56, %v3550_v55  ;;  %v3104_v50 = vld [vmem:[%s6210_s2 + $0x2d8] sm:$0xf0]  ;;  %v2851_v55 = vor.u32 %v4109_v43, %v2848_v44 }
  0xb5   :  { %1941 = vmatpush.bf16.msrb.mxu2 %v3599_v23  ;;  %v4219_v62 = vld [vmem:[%s6210_s2 + $0x434] sm:$0xf0]  ;;  %v3679_v0 = vor.u32 %v4319_v58, %v3678_v57  ;;  %v3406_v1 = vld [vmem:[%s6210_s2 + $0x528] sm:$0xf]  ;;  %v4113_v23 = vld [vmem:[%s6210_s2 + $0xec] sm:$0xf] }
  0xb6   :  { %v4251_v2 = vld [vmem:[%s6210_s2 + $0x534] sm:$0xf0]  ;;  %v3534_v3 = vld [vmem:[%s6210_s2 + $0x628] sm:$0xf]  ;;  %v3279_v10 = vor.u32 %v4219_v62, %v3278_v61  ;;  %v4105_v58 = vld [vmem:[%s6210_s2 + $0xac] sm:$0xf] }
  0xb7   :  { %1916 = vmatpush.bf16.msrb.mxu0 %v3327_v33  ;;  %v4283_v4 = vld [vmem:[%s6210_s2 + $0x634] sm:$0xf0]  ;;  %v3662_v5 = vld [vmem:[%s6210_s2 + $0x728] sm:$0xf]  ;;  %v3407_v6 = vor.u32 %v4251_v2, %v3406_v1  ;;  %v3120_v33 = vld [vmem:[%s6210_s2 + $0x2f8] sm:$0xf0] }
  0xb8   :  { %1954 = vmatpush.bf16.msrb.mxu3 %v3727_v24  ;;  %1929 = vmatpush.bf16.msrb.mxu1 %v3455_v36  ;;  %v4315_v7 = vld [vmem:[%s6210_s2 + $0x734] sm:$0xf0]  ;;  %v3262_v8 = vld [vmem:[%s6210_s2 + $0x408] sm:$0xf]  ;;  %v3535_v14 = vor.u32 %v4283_v4, %v3534_v3  ;;  %v2864_v24 = vld [vmem:[%s6210_s2 + $0xf8] sm:$0xf0]  ;;  %v3123_v45 = vor.u32 %v4177_v27, %v3120_v33 }
  0xb9   :  { %1942 = vmatpush.bf16.msrb.mxu2 %v3583_v39  ;;  %v4215_v9 = vld [vmem:[%s6210_s2 + $0x414] sm:$0xf0]  ;;  %v3390_v11 = vld [vmem:[%s6210_s2 + $0x508] sm:$0xf]  ;;  %v3663_v15 = vor.u32 %v4315_v7, %v3662_v5  ;;  %v4209_v36 = vld [vmem:[%s6210_s2 + $0x3ec] sm:$0xf] }
  0xba   :  { %v4247_v12 = vld [vmem:[%s6210_s2 + $0x514] sm:$0xf0]  ;;  %v3518_v13 = vld [vmem:[%s6210_s2 + $0x608] sm:$0xf]  ;;  %v3263_v31 = vor.u32 %v4215_v9, %v3262_v8  ;;  %v3251_v46 = vor.u32 %v4209_v36, %v3248_v37  ;;  %v4137_v62 = vld [vmem:[%s6210_s2 + $0x1ac] sm:$0xf] }
  0xbb   :  { %1917 = vmatpush.bf16.msrb.mxu0 %v3311_v47  ;;  %v4279_v18 = vld [vmem:[%s6210_s2 + $0x614] sm:$0xf0]  ;;  %v3646_v19 = vld [vmem:[%s6210_s2 + $0x708] sm:$0xf]  ;;  %v3391_v32 = vor.u32 %v4247_v12, %v3390_v11  ;;  %v4141_v47 = vld [vmem:[%s6210_s2 + $0x1cc] sm:$0xf] }
  0xbc   :  { %1955 = vmatpush.bf16.msrb.mxu3 %v3711_v40  ;;  %1930 = vmatpush.bf16.msrb.mxu1 %v3439_v48  ;;  %v4311_v20 = vld [vmem:[%s6210_s2 + $0x714] sm:$0xf0]  ;;  %v3519_v38 = vor.u32 %v4279_v18, %v3518_v13  ;;  %v2867_v40 = vor.u32 %v4113_v23, %v2864_v24  ;;  %v2976_v48 = vld [vmem:[%s6210_s2 + $0x1d8] sm:$0xf0]  ;;  %v4201_v3 = vld [vmem:[%s6210_s2 + $0x3ac] sm:$0xf] }
  0xbd   :  { %1943 = vmatpush.bf16.msrb.mxu2 %v3567_v51  ;;  %v3647_v39 = vor.u32 %v4311_v20, %v3646_v19  ;;  %v4205_v51 = vld [vmem:[%s6210_s2 + $0x3cc] sm:$0xf]  ;;  %v2979_v56 = vor.u32 %v4141_v47, %v2976_v48  ;;  %v3088_v2 = vld [vmem:[%s6210_s2 + $0x2b8] sm:$0xf0] }
  0xbe   :  { %v3216_v4 = vld [vmem:[%s6210_s2 + $0x3b8] sm:$0xf0]  ;;  %v4101_v8 = vld [vmem:[%s6210_s2 + $0x8c] sm:$0xf] }
  0xbf   :  { %1918 = vmatpush.bf16.msrb.mxu0 %v3295_v59  ;;  %v2832_v59 = vld [vmem:[%s6210_s2 + $0xb8] sm:$0xf0]  ;;  %v3219_v11 = vor.u32 %v4201_v3, %v3216_v4  ;;  %v4133_v12 = vld [vmem:[%s6210_s2 + $0x18c] sm:$0xf] }
  0xc0   :  { %1956 = vmatpush.bf16.msrb.mxu3 %v3695_v52  ;;  %1931 = vmatpush.bf16.msrb.mxu1 %v3423_v60  ;;  %v3232_v52 = vld [vmem:[%s6210_s2 + $0x3d8] sm:$0xf0]  ;;  %v3107_v60 = vor.u32 %v4173_v49, %v3104_v50  ;;  %v2835_v5 = vor.u32 %v4105_v58, %v2832_v59  ;;  %v4197_v20 = vld [vmem:[%s6210_s2 + $0x38c] sm:$0xf] }
  0xc1   :  { %1944 = vmatpush.bf16.msrb.mxu2 %v3551_v63  ;;  %v3235_v61 = vor.u32 %v4205_v51, %v3232_v52  ;;  %v2960_v63 = vld [vmem:[%s6210_s2 + $0x1b8] sm:$0xf0]  ;;  %v4125_v51 = vld [vmem:[%s6210_s2 + $0x14c] sm:$0xf] }
  0xc2   :  { %v2963_v7 = vor.u32 %v4137_v62, %v2960_v63  ;;  %v2816_v9 = vld [vmem:[%s6210_s2 + $0x98] sm:$0xf0]  ;;  %v4089_v63 = vld [vmem:[%s6210_s2 + $0x2c] sm:$0xf] }
  0xc3   :  { %1919 = vmatpush.bf16.msrb.mxu0 %v3279_v10  ;;  %v2944_v13 = vld [vmem:[%s6210_s2 + $0x198] sm:$0xf0]  ;;  %v2819_v26 = vor.u32 %v4101_v8, %v2816_v9  ;;  %v4121_v3 = vld [vmem:[%s6210_s2 + $0x12c] sm:$0xf] }
  0xc4   :  { %1957 = vmatpush.bf16.msrb.mxu3 %v3679_v0  ;;  %1932 = vmatpush.bf16.msrb.mxu1 %v3407_v6  ;;  %v4169_v0 = vld [vmem:[%s6210_s2 + $0x2ac] sm:$0xf]  ;;  %v3072_v19 = vld [vmem:[%s6210_s2 + $0x298] sm:$0xf0]  ;;  %v2947_v27 = vor.u32 %v4133_v12, %v2944_v13 }
  0xc5   :  { %1945 = vmatpush.bf16.msrb.mxu2 %v3535_v14  ;;  %v3091_v6 = vor.u32 %v4169_v0, %v3088_v2  ;;  %v4165_v14 = vld [vmem:[%s6210_s2 + $0x28c] sm:$0xf]  ;;  %v3200_v23 = vld [vmem:[%s6210_s2 + $0x398] sm:$0xf0] }
  0xc6   :  { %v1662_v53 = vpop.f32.mrf.mxu0  ;;  %v2800_v33 = vld [vmem:[%s6210_s2 + $0x78] sm:$0xf0]  ;;  %v3075_v36 = vor.u32 %v4165_v14, %v3072_v19  ;;  %v3203_v37 = vor.u32 %v4197_v20, %v3200_v23  ;;  %v4185_v9 = vld [vmem:[%s6210_s2 + $0x32c] sm:$0xf] }
  0xc7   :  { %1920 = vmatpush.bf16.msrb.mxu0 %v3263_v31  ;;  %v1663_v54 = vadd.f32 %v1662_v53, %v365_v42  ;;  %v1675_v57 = vpop.f32.mrf.mxu1  ;;  %v4193_v42 = vld [vmem:[%s6210_s2 + $0x36c] sm:$0xf]  ;;  %v3184_v43 = vld [vmem:[%s6210_s2 + $0x378] sm:$0xf0] }
  0xc8   :  { %1958 = vmatpush.bf16.msrb.mxu3 %v3663_v15  ;;  %1933 = vmatpush.bf16.msrb.mxu1 %v3391_v32  ;;  %v4097_v32 = vld [vmem:[%s6210_s2 + $0x6c] sm:$0xf]  ;;  %v2784_v47 = vld [vmem:[%s6210_s2 + $0x58] sm:$0xf0]  ;;  %v3187_v50 = vor.u32 %v4193_v42, %v3184_v43 }
  0xc9   :  { %1946 = vmatpush.bf16.msrb.mxu2 %v3519_v38  ;;  %v1676_v1 = vadd.f32 %v1675_v57, %v1663_v54  ;;  %v4129_v38 = vld [vmem:[%s6210_s2 + $0x16c] sm:$0xf]  ;;  %v2803_v44 = vor.u32 %v4097_v32, %v2800_v33  ;;  %v2912_v52 = vld [vmem:[%s6210_s2 + $0x158] sm:$0xf0] }
  0xca   :  { %1921 = vmatmul.bf16.vlgmr.msrb.gmra.mxu0 %v5012_v17  ;;  %v4157_v53 = vld [vmem:[%s6210_s2 + $0x24c] sm:$0xf]  ;;  %v3168_v57 = vld [vmem:[%s6210_s2 + $0x358] sm:$0xf0] }
  0xcb   :  { %1965 = vmatpush.bf16.msra.mxu0 %v2867_v40  ;;  %1934 = vmatmul.bf16.vlgmr.msrb.gmra.mxu1 %v5025_v22  ;;  %v4161_v40 = vld [vmem:[%s6210_s2 + $0x26c] sm:$0xf]  ;;  %v2768_v0 = vld [vmem:[%s6210_s2 + $0x38] sm:$0xf0] }
  0xcc   :  { %1959 = vmatpush.bf16.msrb.mxu3 %v3647_v39  ;;  %1978 = vmatpush.bf16.msra.mxu1 %v2995_v41  ;;  %v1688_v10 = vpop.f32.mrf.mxu2  ;;  %v2928_v39 = vld [vmem:[%s6210_s2 + $0x178] sm:$0xf0]  ;;  %v4117_v14 = vld [vmem:[%s6210_s2 + $0x10c] sm:$0xf] }
  0xcd   :  { %1991 = vmatpush.bf16.msra.mxu2 %v3123_v45  ;;  %v1689_v15 = vadd.f32 %v1688_v10, %v1676_v1  ;;  %v1701_v18 = vpop.f32.mrf.mxu3  ;;  %v3056_v41 = vld [vmem:[%s6210_s2 + $0x278] sm:$0xf0]  ;;  %v2931_v45 = vor.u32 %v4129_v38, %v2928_v39  ;;  %v4149_v23 = vld [vmem:[%s6210_s2 + $0x20c] sm:$0xf] }
  0xce   :  { %1947 = vmatmul.bf16.vlgmr.msrb.gmra.mxu2 %v5010_v16  ;;  %v1664_v24 = vpop.f32.mrf.mxu0  ;;  %v3059_v49 = vor.u32 %v4161_v40, %v3056_v41  ;;  %v2896_v4 = vld [vmem:[%s6210_s2 + $0x138] sm:$0xf0]  ;;  %v4273_v33 = vld [vmem:[%s6210_s2 + $0x5ec] sm:$0xf] }
  0xcf   :  { %1960 = vmatmul.bf16.vlgmr.msrb.gmra.mxu3 %v5023_v21  ;;  %1966 = vmatpush.bf16.msra.mxu0 %v2851_v55  ;;  %v1702_v25 = vadd.f32 %v1701_v18, %v1689_v15  ;;  %v1677_v31 = vpop.f32.mrf.mxu1  ;;  %v3040_v55 = vld [vmem:[%s6210_s2 + $0x258] sm:$0xf0]  ;;  %v2899_v12 = vor.u32 %v4121_v3, %v2896_v4  ;;  %v4337_v42 = vld [vmem:[%s6210_s2 + $0x7ec] sm:$0xf] }
  0xd0   :  { %2004 = vmatpush.bf16.msra.mxu3 %v3251_v46  ;;  %1979 = vmatpush.bf16.msra.mxu1 %v2979_v56  ;;  %v4093_v46 = vld [vmem:[%s6210_s2 + $0x4c] sm:$0xf]  ;;  %v3043_v1 = vor.u32 %v4157_v53, %v3040_v55  ;;  %v3024_v8 = vld [vmem:[%s6210_s2 + $0x238] sm:$0xf0] }
  0xd1   :  { %1992 = vmatpush.bf16.msra.mxu2 %v3107_v60  ;;  %v4189_v56 = vld [vmem:[%s6210_s2 + $0x34c] sm:$0xf]  ;;  %v2787_v60 = vor.u32 %v4093_v46, %v2784_v47  ;;  %v3152_v10 = vld [vmem:[%s6210_s2 + $0x338] sm:$0xf0] }
  0xd2   :  { %v3171_v2 = vor.u32 %v4189_v56, %v3168_v57  ;;  %v2752_v13 = vld [vmem:[%s6210_s2 + $0x18] sm:$0xf0]  ;;  %v3155_v20 = vor.u32 %v4185_v9, %v3152_v10  ;;  %v4241_v31 = vld [vmem:[%s6210_s2 + $0x4ec] sm:$0xf] }
  0xd3   :  { %1967 = vmatpush.bf16.msra.mxu0 %v2835_v5  ;;  %v4153_v5 = vld [vmem:[%s6210_s2 + $0x22c] sm:$0xf]  ;;  %v2880_v15 = vld [vmem:[%s6210_s2 + $0x118] sm:$0xf0] }
  0xd4   :  { %2005 = vmatpush.bf16.msra.mxu3 %v3235_v61  ;;  %1980 = vmatpush.bf16.msra.mxu1 %v2963_v7  ;;  %v1690_v48 = vpop.f32.mrf.mxu2  ;;  %v2915_v61 = vor.u32 %v4125_v51, %v2912_v52  ;;  %v3027_v19 = vor.u32 %v4153_v5, %v3024_v8  ;;  %v3008_v24 = vld [vmem:[%s6210_s2 + $0x218] sm:$0xf0]  ;;  %v2883_v40 = vor.u32 %v4117_v14, %v2880_v15  ;;  %v4269_v53 = vld [vmem:[%s6210_s2 + $0x5cc] sm:$0xf] }
  0xd5   :  { %1993 = vmatpush.bf16.msra.mxu2 %v3091_v6  ;;  %v1703_v54 = vpop.f32.mrf.mxu3  ;;  %v4085_v6 = vld [vmem:[%s6210_s2 + $0xc] sm:$0xf]  ;;  %v3376_v32 = vld [vmem:[%s6210_s2 + $0x4f8] sm:$0xf0] }
  0xd6   :  { %v1714_v58 = vpop.f32.mrf.mxu0  ;;  %v2755_v39 = vor.u32 %v4085_v6, %v2752_v13  ;;  %v3632_v41 = vld [vmem:[%s6210_s2 + $0x6f8] sm:$0xf0]  ;;  %v3379_v47 = vor.u32 %v4241_v31, %v3376_v32  ;;  %v4301_v55 = vld [vmem:[%s6210_s2 + $0x6cc] sm:$0xf] }
  0xd7   :  { %1968 = vmatpush.bf16.msra.mxu0 %v2819_v26  ;;  %v1715_v59 = vadd.f32 %v1714_v58, %v1702_v25  ;;  %v1727_v62 = vpop.f32.mrf.mxu1  ;;  %v4181_v25 = vld [vmem:[%s6210_s2 + $0x30c] sm:$0xf]  ;;  %v3760_v43 = vld [vmem:[%s6210_s2 + $0x7f8] sm:$0xf0] }
  0xd8   :  { %2006 = vmatpush.bf16.msra.mxu3 %v3219_v11  ;;  %1981 = vmatpush.bf16.msra.mxu1 %v2947_v27  ;;  %v2771_v11 = vor.u32 %v4089_v63, %v2768_v0  ;;  %v3136_v27 = vld [vmem:[%s6210_s2 + $0x318] sm:$0xf0]  ;;  %v3763_v52 = vor.u32 %v4337_v42, %v3760_v43  ;;  %v4333_v57 = vld [vmem:[%s6210_s2 + $0x7cc] sm:$0xf] }
  0xd9   :  { %1994 = vmatpush.bf16.msra.mxu2 %v3075_v36  ;;  %v5884_v7 = vadd.f32 %v1727_v62, %v1715_v59  ;;  %v3504_v36 = vld [vmem:[%s6210_s2 + $0x5f8] sm:$0xf0]  ;;  %v3139_v46 = vor.u32 %v4181_v25, %v3136_v27  ;;  %v4233_v62 = vld [vmem:[%s6210_s2 + $0x4ac] sm:$0xf] }
  0xda   :  { %v3507_v48 = vor.u32 %v4273_v33, %v3504_v36  ;;  %v3488_v54 = vld [vmem:[%s6210_s2 + $0x5d8] sm:$0xf0]  ;;  %v4265_v3 = vld [vmem:[%s6210_s2 + $0x5ac] sm:$0xf] }
  0xdb   :  { %1969 = vmatpush.bf16.msra.mxu0 %v2803_v44  ;;  %v3616_v56 = vld [vmem:[%s6210_s2 + $0x6d8] sm:$0xf0]  ;;  %v4297_v5 = vld [vmem:[%s6210_s2 + $0x6ac] sm:$0xf] }
  0xdc   :  { %2007 = vmatpush.bf16.msra.mxu3 %v3203_v37  ;;  %1982 = vmatpush.bf16.msra.mxu1 %v2931_v45  ;;  %v5907_v18 = vpop.f32.mrf.mxu2  ;;  %v4305_v37 = vld [vmem:[%s6210_s2 + $0x6ec] sm:$0xf]  ;;  %v3011_v45 = vor.u32 %v4149_v23, %v3008_v24  ;;  %v3744_v58 = vld [vmem:[%s6210_s2 + $0x7d8] sm:$0xf0] }
  0xdd   :  { %1995 = vmatpush.bf16.msra.mxu2 %v3059_v49  ;;  %v5918_v26 = vpop.f32.mrf.mxu3  ;;  %v4237_v49 = vld [vmem:[%s6210_s2 + $0x4cc] sm:$0xf]  ;;  %v3635_v51 = vor.u32 %v4305_v37, %v3632_v41  ;;  %v3344_v63 = vld [vmem:[%s6210_s2 + $0x4b8] sm:$0xf0] }
  0xde   :  { %v1716_v38 = vpop.f32.mrf.mxu0  ;;  %v3472_v4 = vld [vmem:[%s6210_s2 + $0x5b8] sm:$0xf0]  ;;  %v4329_v9 = vld [vmem:[%s6210_s2 + $0x7ac] sm:$0xf] }
  0xdf   :  { %1970 = vmatpush.bf16.msra.mxu0 %v2787_v60  ;;  %v1729_v44 = vpop.f32.mrf.mxu1  ;;  %v3600_v8 = vld [vmem:[%s6210_s2 + $0x6b8] sm:$0xf0]  ;;  %v3475_v6 = vor.u32 %v4265_v3, %v3472_v4  ;;  %v4293_v14 = vld [vmem:[%s6210_s2 + $0x68c] sm:$0xf] }
  0xe0   :  { %2008 = vmatpush.bf16.msra.mxu3 %v3187_v50  ;;  %1983 = vmatpush.bf16.msra.mxu1 %v2915_v61  ;;  %v3360_v50 = vld [vmem:[%s6210_s2 + $0x4d8] sm:$0xf0]  ;;  %v3491_v61 = vor.u32 %v4269_v53, %v3488_v54  ;;  %v3603_v13 = vor.u32 %v4297_v5, %v3600_v8  ;;  %v4225_v27 = vld [vmem:[%s6210_s2 + $0x46c] sm:$0xf] }
  0xe1   :  { %1996 = vmatpush.bf16.msra.mxu2 %v3043_v1  ;;  %v3363_v60 = vor.u32 %v4237_v49, %v3360_v50  ;;  %v3619_v1 = vor.u32 %v4301_v55, %v3616_v56  ;;  %v3728_v10 = vld [vmem:[%s6210_s2 + $0x7b8] sm:$0xf0]  ;;  %v4257_v37 = vld [vmem:[%s6210_s2 + $0x56c] sm:$0xf] }
  0xe2   :  { %v3584_v15 = vld [vmem:[%s6210_s2 + $0x698] sm:$0xf0]  ;;  %v4321_v41 = vld [vmem:[%s6210_s2 + $0x76c] sm:$0xf] }
  0xe3   :  { %1971 = vmatpush.bf16.msra.mxu0 %v2771_v11  ;;  %v4229_v11 = vld [vmem:[%s6210_s2 + $0x48c] sm:$0xf]  ;;  %v3312_v31 = vld [vmem:[%s6210_s2 + $0x478] sm:$0xf0]  ;;  %v3587_v33 = vor.u32 %v4293_v14, %v3584_v15 }
  0xe4   :  { %2009 = vmatpush.bf16.msra.mxu3 %v3171_v2  ;;  %1984 = vmatpush.bf16.msra.mxu1 %v2899_v12  ;;  %v1742_v59 = vpop.f32.mrf.mxu2  ;;  %v3747_v2 = vor.u32 %v4333_v57, %v3744_v58  ;;  %v3328_v12 = vld [vmem:[%s6210_s2 + $0x498] sm:$0xf0]  ;;  %v3315_v43 = vor.u32 %v4225_v27, %v3312_v31  ;;  %v4253_v49 = vld [vmem:[%s6210_s2 + $0x54c] sm:$0xf]  ;;  %v4355_v31 = vld [vmem:[#allocation2 + $0x74] sm:$0xf0] }
  0xe5   :  { %1997 = vmatpush.bf16.msra.mxu2 %v3027_v19  ;;  %v1755_v0 = vpop.f32.mrf.mxu3  ;;  %v4325_v19 = vld [vmem:[%s6210_s2 + $0x78c] sm:$0xf]  ;;  %v3331_v24 = vor.u32 %v4229_v11, %v3328_v12  ;;  %v3440_v38 = vld [vmem:[%s6210_s2 + $0x578] sm:$0xf0] }
  0xe6   :  { %v3696_v42 = vld [vmem:[%s6210_s2 + $0x778] sm:$0xf0]  ;;  %v3443_v44 = vor.u32 %v4257_v37, %v3440_v38  ;;  %v4317_v54 = vld [vmem:[%s6210_s2 + $0x74c] sm:$0xf] }
  0xe7   :  { %1972 = vmatpush.bf16.msra.mxu0 %v2755_v39  ;;  %v6023_v23 = vpop.f32.mrf.mxu0  ;;  %v6031_v32 = vpop.f32.mrf.mxu1  ;;  %v4289_v39 = vld [vmem:[%s6210_s2 + $0x66c] sm:$0xf]  ;;  %v3424_v50 = vld [vmem:[%s6210_s2 + $0x558] sm:$0xf0] }
  0xe8   :  { %2010 = vmatpush.bf16.msra.mxu3 %v3155_v20  ;;  %1985 = vmatpush.bf16.msra.mxu1 %v2883_v40  ;;  %v3712_v20 = vld [vmem:[%s6210_s2 + $0x798] sm:$0xf0]  ;;  %v3427_v59 = vor.u32 %v4253_v49, %v3424_v50  ;;  %v4281_v3 = vld [vmem:[%s6210_s2 + $0x62c] sm:$0xf]  ;;  %v3806_v50 = vld [vmem:[#allocation2 + $0x50] sm:$0xf] }
  0xe9   :  { %1998 = vmatpush.bf16.msra.mxu2 %v3011_v45  ;;  %v3715_v36 = vor.u32 %v4325_v19, %v3712_v20  ;;  %v3568_v40 = vld [vmem:[%s6210_s2 + $0x678] sm:$0xf0]  ;;  %v4221_v45 = vld [vmem:[%s6210_s2 + $0x44c] sm:$0xf] }
  0xea   :  { %1973 = vmatmul.bf16.vlgmr.msra.gmra.mxu0 %v4925_v29  ;;  %v3731_v29 = vor.u32 %v4329_v9, %v3728_v10  ;;  %v3552_v53 = vld [vmem:[%s6210_s2 + $0x658] sm:$0xf0]  ;;  %v4313_v5 = vld [vmem:[%s6210_s2 + $0x72c] sm:$0xf]  ;;  %v366_v9 = vperm.slane %v5733_v30, 1 }
  0xeb   :  { %2017 = vmatpush.bf16.msrb.mxu0 %v3379_v47  ;;  %1986 = vmatmul.bf16.vlgmr.msra.gmra.mxu1 %v4929_v35  ;;  %v3456_v35 = vld [vmem:[%s6210_s2 + $0x598] sm:$0xf0]  ;;  %v3571_v47 = vor.u32 %v4289_v39, %v3568_v40  ;;  %v4245_v12 = vld [vmem:[%s6210_s2 + $0x50c] sm:$0xf] }
  0xec   :  { %2011 = vmatpush.bf16.msra.mxu3 %v3139_v46  ;;  %2030 = vmatpush.bf16.msrb.mxu1 %v3507_v48  ;;  %v3296_v46 = vld [vmem:[%s6210_s2 + $0x458] sm:$0xf0]  ;;  %v3699_v48 = vor.u32 %v4321_v41, %v3696_v42  ;;  %v4309_v19 = vld [vmem:[%s6210_s2 + $0x70c] sm:$0xf] }
  0xed   :  { %2043 = vmatpush.bf16.msrb.mxu2 %v3635_v51  ;;  %v4285_v51 = vld [vmem:[%s6210_s2 + $0x64c] sm:$0xf]  ;;  %v3680_v55 = vld [vmem:[%s6210_s2 + $0x758] sm:$0xf0]  ;;  %v3299_v58 = vor.u32 %v4221_v45, %v3296_v46  ;;  %v4353_v45 = vld [vmem:[#allocation2 + $0x64] sm:$0xf0] }
  0xee   :  { %1999 = vmatmul.bf16.vlgmr.msra.gmra.mxu2 %v4923_v28  ;;  %v3347_v28 = vor.u32 %v4233_v62, %v3344_v63  ;;  %v4249_v62 = vld [vmem:[%s6210_s2 + $0x52c] sm:$0xf]  ;;  %v3555_v0 = vor.u32 %v4285_v51, %v3552_v53  ;;  %v3536_v4 = vld [vmem:[%s6210_s2 + $0x638] sm:$0xf0]  ;;  %v3878_v46 = vld [vmem:[#allocation2 + $0xe0] sm:$0xf] }
  0xef   :  { %2012 = vmatmul.bf16.vlgmr.msra.gmra.mxu3 %v4927_v34  ;;  %2018 = vmatpush.bf16.msrb.mxu0 %v3363_v60  ;;  %v4261_v34 = vld [vmem:[%s6210_s2 + $0x58c] sm:$0xf]  ;;  %v1768_v57 = vpop.f32.mrf.mxu0  ;;  %v1781_v63 = vpop.f32.mrf.mxu1  ;;  %v3664_v8 = vld [vmem:[%s6210_s2 + $0x738] sm:$0xf0]  ;;  %v3870_v51 = vld [vmem:[#allocation2 + $0xd0] sm:$0xf] }
  0xf0   :  { %2056 = vmatpush.bf16.msrb.mxu3 %v3763_v52  ;;  %2031 = vmatpush.bf16.msrb.mxu1 %v3491_v61  ;;  %v3459_v25 = vor.u32 %v4261_v34, %v3456_v35  ;;  %v6066_v52 = vpop.f32.mrf.mxu2  ;;  %v4217_v60 = vld [vmem:[%s6210_s2 + $0x42c] sm:$0xf]  ;;  %v3280_v61 = vld [vmem:[%s6210_s2 + $0x438] sm:$0xf0]  ;;  %v4367_v53 = vld [vmem:[#allocation2 + $0xd4] sm:$0xf0] }
  0xf1   :  { %2044 = vmatpush.bf16.msrb.mxu2 %v3619_v1  ;;  %v3683_v1 = vor.u32 %v4317_v54, %v3680_v55  ;;  %v3283_v10 = vor.u32 %v4217_v60, %v3280_v61  ;;  %v3264_v11 = vld [vmem:[%s6210_s2 + $0x418] sm:$0xf0]  ;;  %v4277_v35 = vld [vmem:[%s6210_s2 + $0x60c] sm:$0xf]  ;;  %v3871_v57 = vor.u32 %v4367_v53, %v3870_v51  ;;  %v4365_v60 = vld [vmem:[#allocation2 + $0xc4] sm:$0xf0] }
  0xf2   :  { %v6077_v56 = vpop.f32.mrf.mxu3  ;;  %v3392_v34 = vld [vmem:[%s6210_s2 + $0x518] sm:$0xf0]  ;;  %v4387_v61 = vld [vmem:[#allocation2 + $0x174] sm:$0xf0]  ;;  %v3888_v53 = vld [vmem:[#allocation2 + $0xf8] sm:$0xf0] }
  0xf3   :  { %2019 = vmatpush.bf16.msrb.mxu0 %v3347_v28  ;;  %v3520_v14 = vld [vmem:[%s6210_s2 + $0x618] sm:$0xf0]  ;;  %v3395_v38 = vor.u32 %v4245_v12, %v3392_v34  ;;  %v3846_v12 = vld [vmem:[#allocation2 + $0xa0] sm:$0xf]  ;;  %v3934_v34 = vld [vmem:[#allocation2 + $0x150] sm:$0xf] }
  0xf4   :  { %2057 = vmatpush.bf16.msrb.mxu3 %v3747_v2  ;;  %2032 = vmatpush.bf16.msrb.mxu1 %v3475_v6  ;;  %v3408_v2 = vld [vmem:[%s6210_s2 + $0x538] sm:$0xf0]  ;;  %v4213_v6 = vld [vmem:[%s6210_s2 + $0x40c] sm:$0xf]  ;;  %v3523_v39 = vor.u32 %v4277_v35, %v3520_v14  ;;  %v4383_v35 = vld [vmem:[#allocation2 + $0x154] sm:$0xf0] }
  0xf5   :  { %2045 = vmatpush.bf16.msrb.mxu2 %v3603_v13  ;;  %v3411_v28 = vor.u32 %v4249_v62, %v3408_v2  ;;  %v3539_v13 = vor.u32 %v4281_v3, %v3536_v4  ;;  %v3648_v20 = vld [vmem:[%s6210_s2 + $0x718] sm:$0xf0]  ;;  %v3267_v37 = vor.u32 %v4213_v6, %v3264_v11  ;;  %v3942_v4 = vld [vmem:[#allocation2 + $0x160] sm:$0xf]  ;;  %v4345_v11 = vld [vmem:[#allocation2 + $0x24] sm:$0xf0] }
  0xf6   :  { %v3651_v40 = vor.u32 %v4309_v19, %v3648_v20  ;;  %v3782_v6 = vld [vmem:[#allocation2 + $0x20] sm:$0xf]  ;;  %v4370_v51 = vld [vmem:[#allocation2 + $0xf4] sm:$0xf] }
  0xf7   :  { %2020 = vmatpush.bf16.msrb.mxu0 %v3331_v24  ;;  %v3822_v24 = vld [vmem:[#allocation2 + $0x70] sm:$0xf] }
  0xf8   :  { %2058 = vmatpush.bf16.msrb.mxu3 %v3731_v29  ;;  %2033 = vmatpush.bf16.msrb.mxu1 %v3459_v25  ;;  %v3667_v29 = vor.u32 %v4313_v5, %v3664_v8  ;;  %v1794_v15 = vpop.f32.mrf.mxu2  ;;  %v1767_v25 = vadd.f32 %v6023_v23, %v366_v9  ;;  %v3823_v41 = vor.u32 %v4355_v31, %v3822_v24  ;;  %v4369_v23 = vld [vmem:[#allocation2 + $0xe4] sm:$0xf0]  ;;  %v3774_v31 = vld [vmem:[#allocation2 + $0x10] sm:$0xf] }
  0xf9   :  { %2046 = vmatpush.bf16.msrb.mxu2 %v3587_v33  ;;  %v3886_v33 = vld [vmem:[#allocation2 + $0xf0] sm:$0xf]  ;;  %v4385_v5 = vld [vmem:[#allocation2 + $0x164] sm:$0xf0]  ;;  %v3935_v15 = vor.u32 %v4383_v35, %v3934_v34  ;;  %v1741_v24 = vadd.f32 %v5907_v18, %v5884_v7  ;;  %v4348_v35 = vld [vmem:[#allocation2 + $0x44] sm:$0xf] }
  0xfa   :  { %v1807_v27 = vpop.f32.mrf.mxu3  ;;  %v3943_v8 = vor.u32 %v4385_v5, %v3942_v4  ;;  %v4350_v5 = vld [vmem:[#allocation2 + $0x54] sm:$0xf] }
  0xfb   :  { %2021 = vmatpush.bf16.msrb.mxu0 %v3315_v43  ;;  %v1780_v43 = vadd.f32 %v6031_v32, %v1767_v25  ;;  %v4351_v32 = vld [vmem:[#allocation2 + $0x54] sm:$0xf0]  ;;  %v3783_v25 = vor.u32 %v4345_v11, %v3782_v6  ;;  %v3894_v6 = vld [vmem:[#allocation2 + $0x100] sm:$0xf]  ;;  %v4373_v11 = vld [vmem:[#allocation2 + $0x104] sm:$0xf0] }
  0xfc   :  { %2059 = vmatpush.bf16.msrb.mxu3 %v3715_v36  ;;  %2034 = vmatpush.bf16.msrb.mxu1 %v3443_v44  ;;  %v4371_v36 = vld [vmem:[#allocation2 + $0xf4] sm:$0xf0]  ;;  %v3814_v44 = vld [vmem:[#allocation2 + $0x60] sm:$0xf]  ;;  %v3807_v55 = vor.u32 %v4351_v32, %v3806_v50  ;;  %v3824_v32 = vld [vmem:[#allocation2 + $0x78] sm:$0xf0] }
  0xfd   :  { %2047 = vmatpush.bf16.msrb.mxu2 %v3571_v47  ;;  %v3887_v42 = vor.u32 %v4371_v36, %v3886_v33  ;;  %v3815_v47 = vor.u32 %v4353_v45, %v3814_v44  ;;  %v1793_v49 = vadd.f32 %v6066_v52, %v1780_v43  ;;  %v4349_v52 = vld [vmem:[#allocation2 + $0x44] sm:$0xf0]  ;;  %v4343_v33 = vld [vmem:[#allocation2 + $0x14] sm:$0xf0]  ;;  %v3838_v36 = vld [vmem:[#allocation2 + $0x90] sm:$0xf]  ;;  %v1754_v44 = vadd.f32 %v5918_v26, %v1741_v24 }
  0xfe   :  { %v3766_v43 = vld [vmem:[#allocation2] sm:$0xf]  ;;  %v3775_v7 = vor.u32 %v4343_v33, %v3774_v31  ;;  %v4341_v45 = vld [vmem:[#allocation2 + $0x4] sm:$0xf0]  ;;  %v4379_v50 = vld [vmem:[#allocation2 + $0x134] sm:$0xf0] }
  0xff   :  { %2022 = vmatpush.bf16.msrb.mxu0 %v3299_v58  ;;  %v1806_v54 = vadd.f32 %v6077_v56, %v1793_v49  ;;  %v3798_v58 = vld [vmem:[#allocation2 + $0x40] sm:$0xf]  ;;  %v4363_v56 = vld [vmem:[#allocation2 + $0xb4] sm:$0xf0]  ;;  %v3918_v49 = vld [vmem:[#allocation2 + $0x130] sm:$0xf]  ;;  %v3767_v26 = vor.u32 %v4341_v45, %v3766_v43 }
 0x100   :  { %2060 = vmatpush.bf16.msrb.mxu3 %v3699_v48  ;;  %2035 = vmatpush.bf16.msrb.mxu1 %v3427_v59  ;;  %v3879_v48 = vor.u32 %v4369_v23, %v3878_v46  ;;  %v3862_v59 = vld [vmem:[#allocation2 + $0xc0] sm:$0xf]  ;;  %v3799_v63 = vor.u32 %v4349_v52, %v3798_v58  ;;  %v4357_v23 = vld [vmem:[#allocation2 + $0x84] sm:$0xf0]  ;;  %v2069_v58 = vmax.f32 %v1754_v44, 0.0 }
 0x101   :  { %2048 = vmatpush.bf16.msrb.mxu2 %v3555_v0  ;;  %v3790_v0 = vld [vmem:[#allocation2 + $0x30] sm:$0xf]  ;;  %v3830_v46 = vld [vmem:[#allocation2 + $0x80] sm:$0xf]  ;;  %v4346_v31 = vld [vmem:[#allocation2 + $0x34] sm:$0xf] }
 0x102   :  { %v3831_v52 = vor.u32 %v4357_v23, %v3830_v46  ;;  %v3792_v33 = vld [vmem:[#allocation2 + $0x38] sm:$0xf0]  ;;  %v4360_v45 = vld [vmem:[#allocation2 + $0xa4] sm:$0xf]  ;;  %v3848_v46 = vld [vmem:[#allocation2 + $0xa8] sm:$0xf0] }
 0x103   :  { %2023 = vmatpush.bf16.msrb.mxu0 %v3283_v10  ;;  %v3795_v43 = vor.u32 %v4346_v31, %v3792_v33  ;;  %v4382_v23 = vld [vmem:[#allocation2 + $0x154] sm:$0xf]  ;;  %v4401_v31 = vld [vmem:[#allocation2 + $0x1e4] sm:$0xf0] }
 0x104   :  { %2061 = vmatpush.bf16.msrb.mxu3 %v3683_v1  ;;  %2036 = vmatpush.bf16.msrb.mxu1 %v3411_v28  ;;  %v3854_v1 = vld [vmem:[#allocation2 + $0xb0] sm:$0xf] }
 0x105   :  { %2049 = vmatpush.bf16.msrb.mxu2 %v3539_v13  ;;  %v3855_v28 = vor.u32 %v4363_v56, %v3854_v1  ;;  %v4361_v13 = vld [vmem:[#allocation2 + $0xa4] sm:$0xf0]  ;;  %v3902_v1 = vld [vmem:[#allocation2 + $0x110] sm:$0xf] }
 0x106   :  { %v3847_v27 = vor.u32 %v4361_v13, %v3846_v12  ;;  %v4386_v12 = vld [vmem:[#allocation2 + $0x174] sm:$0xf]  ;;  %v3952_v13 = vld [vmem:[#allocation2 + $0x178] sm:$0xf0] }
 0x107   :  { %2024 = vmatpush.bf16.msrb.mxu0 %v3267_v37  ;;  %v1818_v62 = vpop.f32.mrf.mxu0  ;;  %v3955_v24 = vor.u32 %v4386_v12, %v3952_v13 }
 0x108   :  { %2062 = vmatpush.bf16.msrb.mxu3 %v3667_v29  ;;  %2037 = vmatpush.bf16.msrb.mxu1 %v3395_v38  ;;  %v1819_v2 = vadd.f32 %v1818_v62, %v1806_v54  ;;  %v1831_v3 = vpop.f32.mrf.mxu1  ;;  %v4359_v38 = vld [vmem:[#allocation2 + $0x94] sm:$0xf0]  ;;  %v3816_v62 = vld [vmem:[#allocation2 + $0x68] sm:$0xf0] }
 0x109   :  { %2050 = vmatpush.bf16.msrb.mxu2 %v3523_v39  ;;  %v3926_v39 = vld [vmem:[#allocation2 + $0x140] sm:$0xf]  ;;  %v3839_v18 = vor.u32 %v4359_v38, %v3838_v36  ;;  %v4362_v36 = vld [vmem:[#allocation2 + $0xb4] sm:$0xf]  ;;  %v3856_v38 = vld [vmem:[#allocation2 + $0xb8] sm:$0xf0] }
 0x10a   :  { %2025 = vmatmul.bf16.vlgmr.msrb.gmra.mxu0 %v5012_v17  ;;  %v3950_v17 = vld [vmem:[#allocation2 + $0x170] sm:$0xf]  ;;  %v1832_v9 = vadd.f32 %v1831_v3, %v1819_v2  ;;  %v4375_v2 = vld [vmem:[#allocation2 + $0x114] sm:$0xf0]  ;;  %v6141_v3 = vpack.c.bf16 %v2069_v58, %v2069_v58  ;;  %v3859_v44 = vor.u32 %v4362_v36, %v3856_v38  ;;  %v3840_v58 = vld [vmem:[#allocation2 + $0x98] sm:$0xf0] }
 0x10b   :  { %2467 = vmatpush.bf16.msra.mxu0 %v3823_v41  ;;  %2038 = vmatmul.bf16.vlgmr.msrb.gmra.mxu1 %v5025_v22  ;;  %v3951_v22 = vor.u32 %v4387_v61, %v3950_v17  ;;  %v4352_v17 = vld [vmem:[#allocation2 + $0x64] sm:$0xf]  ;;  %v3910_v61 = vld [vmem:[#allocation2 + $0x120] sm:$0xf]  ;;  %v4399_v38 = vld [vmem:[#allocation2 + $0x1d4] sm:$0xf0] }
 0x10c   :  { %2063 = vmatpush.bf16.msrb.mxu3 %v3651_v40  ;;  %2480 = vmatpush.bf16.msra.mxu1 %v3887_v42  ;;  %v4381_v40 = vld [vmem:[#allocation2 + $0x144] sm:$0xf0]  ;;  %v3819_v56 = vor.u32 %v4352_v17, %v3816_v62  ;;  %v367_v17 = vperm.slane %v5733_v30, 2  ;;  %v4340_v62 = vld [vmem:[#allocation2 + $0x4] sm:$0xf] }
 0x10d   :  { %2051 = vmatmul.bf16.vlgmr.msrb.gmra.mxu2 %v5010_v16  ;;  %v3863_v16 = vor.u32 %v4365_v60, %v3862_v59  ;;  %v3927_v41 = vor.u32 %v4381_v40, %v3926_v39  ;;  %v3891_v60 = vor.u32 %v4370_v51, %v3888_v53  ;;  %v4384_v40 = vld [vmem:[#allocation2 + $0x164] sm:$0xf]  ;;  %v3851_v51 = vor.u32 %v4360_v45, %v3848_v46  ;;  %v4342_v53 = vld [vmem:[#allocation2 + $0x14] sm:$0xf]  ;;  %v3982_v45 = vld [vmem:[#allocation2 + $0x1b0] sm:$0xf] }
 0x10e   :  { %2493 = vmatpush.bf16.msra.mxu2 %v3951_v22  ;;  %v4377_v22 = vld [vmem:[#allocation2 + $0x124] sm:$0xf0]  ;;  %v4395_v46 = vld [vmem:[#allocation2 + $0x1b4] sm:$0xf0] }
 0x10f   :  { %2064 = vmatmul.bf16.vlgmr.msrb.gmra.mxu3 %v5023_v21  ;;  %2468 = vmatpush.bf16.msra.mxu0 %v3815_v47  ;;  %v4347_v21 = vld [vmem:[#allocation2 + $0x34] sm:$0xf0]  ;;  %v1820_v20 = vpop.f32.mrf.mxu0  ;;  %v4354_v47 = vld [vmem:[#allocation2 + $0x74] sm:$0xf] }
 0x110   :  { %2481 = vmatpush.bf16.msra.mxu1 %v3879_v48  ;;  %v3791_v10 = vor.u32 %v4347_v21, %v3790_v0  ;;  %v1833_v37 = vpop.f32.mrf.mxu1  ;;  %v3827_v59 = vor.u32 %v4354_v47, %v3824_v32  ;;  %v3911_v0 = vor.u32 %v4377_v22, %v3910_v61  ;;  %v3895_v20 = vor.u32 %v4373_v11, %v3894_v6  ;;  %v3936_v47 = vld [vmem:[#allocation2 + $0x158] sm:$0xf0]  ;;  %v4403_v11 = vld [vmem:[#allocation2 + $0x1f4] sm:$0xf0] }
 0x111   :  { %v1844_v29 = vpop.f32.mrf.mxu2 }
 0x112   :  { %2494 = vmatpush.bf16.msra.mxu2 %v3943_v8  ;;  %v1857_v14 = vpop.f32.mrf.mxu3  ;;  %v1845_v19 = vadd.f32 %v1844_v29, %v1832_v9  ;;  %v3808_v8 = vld [vmem:[#allocation2 + $0x58] sm:$0xf0]  ;;  %v4366_v9 = vld [vmem:[#allocation2 + $0xd4] sm:$0xf] }
 0x113   :  { %2469 = vmatpush.bf16.msra.mxu0 %v3807_v55  ;;  %v3919_v55 = vor.u32 %v4379_v50, %v3918_v49  ;;  %v3811_v29 = vor.u32 %v4350_v5, %v3808_v8  ;;  %v3939_v49 = vor.u32 %v4382_v23, %v3936_v47 }
 0x114   :  { %2482 = vmatpush.bf16.msra.mxu1 %v3871_v57  ;;  %v1858_v42 = vadd.f32 %v1857_v14, %v1845_v19  ;;  %v3800_v14 = vld [vmem:[#allocation2 + $0x48] sm:$0xf0] }
 0x115   :  { %v3864_v19 = vld [vmem:[#allocation2 + $0xc8] sm:$0xf0] }
 0x116   :  { %2495 = vmatpush.bf16.msra.mxu2 %v3935_v15  ;;  %v2070_v57 = vmax.f32 %v1858_v42, 0.0  ;;  %v4364_v15 = vld [vmem:[#allocation2 + $0xc4] sm:$0xf] }
 0x117   :  { %2470 = vmatpush.bf16.msra.mxu0 %v3799_v63  ;;  %v4368_v63 = vld [vmem:[#allocation2 + $0xe4] sm:$0xf] }
 0x118   :  { %2483 = vmatpush.bf16.msra.mxu1 %v3863_v16  ;;  %v3880_v16 = vld [vmem:[#allocation2 + $0xe8] sm:$0xf0]  ;;  %v6139_v21 = vpack.c.bf16 %v2070_v57, %v2070_v57 }
 0x119   :  { %v1846_v48 = vpop.f32.mrf.mxu2  ;;  %v3883_v4 = vor.u32 %v4368_v63, %v3880_v16  ;;  %v3768_v63 = vld [vmem:[#allocation2 + $0x8] sm:$0xf0]  ;;  %v4356_v16 = vld [vmem:[#allocation2 + $0x84] sm:$0xf] }
 0x11a   :  { %2496 = vmatpush.bf16.msra.mxu2 %v3927_v41  ;;  %v1859_v54 = vpop.f32.mrf.mxu3  ;;  %v3944_v41 = vld [vmem:[#allocation2 + $0x168] sm:$0xf0]  ;;  %v3771_v30 = vor.u32 %v4340_v62, %v3768_v63  ;;  %v4400_v63 = vld [vmem:[#allocation2 + $0x1e4] sm:$0xf] }
 0x11b   :  { %2471 = vmatpush.bf16.msra.mxu0 %v3791_v10  ;;  %v3872_v10 = vld [vmem:[#allocation2 + $0xd8] sm:$0xf0]  ;;  %v3947_v42 = vor.u32 %v4384_v40, %v3944_v41 }
 0x11c   :  { %2484 = vmatpush.bf16.msra.mxu1 %v3855_v28  ;;  %v3903_v28 = vor.u32 %v4375_v2, %v3902_v1  ;;  %v3875_v34 = vor.u32 %v4366_v9, %v3872_v10  ;;  %v3776_v54 = vld [vmem:[#allocation2 + $0x18] sm:$0xf0]  ;;  %v4378_v1 = vld [vmem:[#allocation2 + $0x134] sm:$0xf]  ;;  %v4376_v9 = vld [vmem:[#allocation2 + $0x124] sm:$0xf] }
 0x11d   :  { %v3779_v61 = vor.u32 %v4342_v53, %v3776_v54  ;;  %v3920_v2 = vld [vmem:[#allocation2 + $0x138] sm:$0xf0]  ;;  %v3912_v10 = vld [vmem:[#allocation2 + $0x128] sm:$0xf0] }
 0x11e   :  { %2497 = vmatpush.bf16.msra.mxu2 %v3919_v55  ;;  %v4358_v55 = vld [vmem:[#allocation2 + $0x94] sm:$0xf]  ;;  %v3915_v13 = vor.u32 %v4376_v9, %v3912_v10  ;;  %v4396_v10 = vld [vmem:[#allocation2 + $0x1c4] sm:$0xf] }
 0x11f   :  { %2472 = vmatpush.bf16.msra.mxu0 %v3783_v25  ;;  %v3803_v25 = vor.u32 %v4348_v35, %v3800_v14  ;;  %v3843_v22 = vor.u32 %v4358_v55, %v3840_v58  ;;  %v3904_v35 = vld [vmem:[#allocation2 + $0x118] sm:$0xf0]  ;;  %v3966_v58 = vld [vmem:[#allocation2 + $0x190] sm:$0xf] }
 0x120   :  { %2485 = vmatpush.bf16.msra.mxu1 %v3847_v27  ;;  %v3867_v27 = vor.u32 %v4364_v15, %v3864_v19  ;;  %v4372_v19 = vld [vmem:[#allocation2 + $0x104] sm:$0xf] }
 0x122   :  { %2498 = vmatpush.bf16.msra.mxu2 %v3911_v0  ;;  %v3832_v0 = vld [vmem:[#allocation2 + $0x88] sm:$0xf0] }
 0x123   :  { %2473 = vmatpush.bf16.msra.mxu0 %v3775_v7  ;;  %v4344_v7 = vld [vmem:[#allocation2 + $0x24] sm:$0xf]  ;;  %v3835_v6 = vor.u32 %v4356_v16, %v3832_v0  ;;  %v4008_v16 = vld [vmem:[#allocation2 + $0x1e8] sm:$0xf0] }
 0x124   :  { %2486 = vmatpush.bf16.msra.mxu1 %v3839_v18  ;;  %v3784_v18 = vld [vmem:[#allocation2 + $0x28] sm:$0xf0] }
 0x125   :  { %v3787_v32 = vor.u32 %v4344_v7, %v3784_v18 }
 0x126   :  { %2499 = vmatpush.bf16.msra.mxu2 %v3903_v28  ;;  %v4014_v28 = vld [vmem:[#allocation2 + $0x1f0] sm:$0xf] }
 0x127   :  { %2474 = vmatpush.bf16.msra.mxu0 %v3767_v26  ;;  %v1870_v37 = vpop.f32.mrf.mxu0  ;;  %v4015_v12 = vor.u32 %v4403_v11, %v4014_v28  ;;  %v3992_v28 = vld [vmem:[#allocation2 + $0x1c8] sm:$0xf0] }
 0x128   :  { %2487 = vmatpush.bf16.msra.mxu1 %v3831_v52  ;;  %v1883_v39 = vpop.f32.mrf.mxu1  ;;  %v4380_v52 = vld [vmem:[#allocation2 + $0x144] sm:$0xf]  ;;  %v1871_v5 = vadd.f32 %v1870_v37, %v367_v17  ;;  %v3998_v37 = vld [vmem:[#allocation2 + $0x1d0] sm:$0xf] }
 0x129   :  { %2506 = vmatpush.bf16.msra.mxu3 %v4015_v12  ;;  %v3999_v41 = vor.u32 %v4399_v38, %v3998_v37  ;;  %v4394_v12 = vld [vmem:[#allocation2 + $0x1b4] sm:$0xf]  ;;  %v3960_v37 = vld [vmem:[#allocation2 + $0x188] sm:$0xf0] }
 0x12a   :  { %2475 = vmatmul.bf16.vlgmr.msra.gmra.mxu0 %v6141_v3  ;;  %2500 = vmatpush.bf16.msra.mxu2 %v3895_v20  ;;  %v3896_v20 = vld [vmem:[#allocation2 + $0x108] sm:$0xf0] }
 0x12b   :  { %2519 = vmatpush.bf16.msrb.mxu0 %v3827_v59  ;;  %2488 = vmatmul.bf16.vlgmr.msra.gmra.mxu1 %v6139_v21  ;;  %v3928_v59 = vld [vmem:[#allocation2 + $0x148] sm:$0xf0] }
 0x12c   :  { %2532 = vmatpush.bf16.msrb.mxu1 %v3891_v60  ;;  %v3931_v60 = vor.u32 %v4380_v52, %v3928_v59  ;;  %v3958_v59 = vld [vmem:[#allocation2 + $0x180] sm:$0xf] }
 0x12e   :  { %2545 = vmatpush.bf16.msrb.mxu2 %v3955_v24  ;;  %v3899_v24 = vor.u32 %v4372_v19, %v3896_v20 }
 0x12f   :  { %2520 = vmatpush.bf16.msrb.mxu0 %v3819_v56  ;;  %v1872_v57 = vpop.f32.mrf.mxu0 }
 0x130   :  { %2533 = vmatpush.bf16.msrb.mxu1 %v3883_v4  ;;  %v1885_v26 = vpop.f32.mrf.mxu1  ;;  %v3923_v4 = vor.u32 %v4378_v1, %v3920_v2  ;;  %v4011_v1 = vor.u32 %v4400_v63, %v4008_v16  ;;  %v4411_v63 = vld [vmem:[%s6214_s6 + $0x38] sm:$0xff] }
 0x131   :  { %v1896_v48 = vpop.f32.mrf.mxu2  ;;  %v4391_v26 = vld [vmem:[#allocation2 + $0x194] sm:$0xf0]  ;;  %v4419_v16 = vld [vmem:[%s6214_s6 + $0x78] sm:$0xff] }
 0x132   :  { %2546 = vmatpush.bf16.msrb.mxu2 %v3947_v42  ;;  %v1909_v50 = vpop.f32.mrf.mxu3  ;;  %v3967_v52 = vor.u32 %v4391_v26, %v3966_v58 }
 0x133   :  { %2521 = vmatpush.bf16.msrb.mxu0 %v3811_v29  ;;  %v1884_v29 = vadd.f32 %v1883_v39, %v1871_v5 }
 0x134   :  { %2534 = vmatpush.bf16.msrb.mxu1 %v3875_v34  ;;  %v4374_v34 = vld [vmem:[#allocation2 + $0x114] sm:$0xf] }
 0x135   :  { %v3907_v14 = vor.u32 %v4374_v34, %v3904_v35  ;;  %v1897_v15 = vadd.f32 %v1896_v48, %v1884_v29  ;;  %v4424_v34 = vld [vmem:[%s6211_s3] sm:$0xf] }
 0x136   :  { %2547 = vmatpush.bf16.msrb.mxu2 %v3939_v49  ;;  %v3983_v49 = vor.u32 %v4395_v46, %v3982_v45  ;;  %v368_v35 = vperm.slane %v4424_v34, 3  ;;  %v4413_v34 = vld [vmem:[%s6214_s6 + $0x48] sm:$0xff] }
 0x137   :  { %2522 = vmatpush.bf16.msrb.mxu0 %v3803_v25  ;;  %v1910_v25 = vadd.f32 %v1909_v50, %v1897_v15  ;;  %v3976_v15 = vld [vmem:[#allocation2 + $0x1a8] sm:$0xf0] }
 0x138   :  { %2535 = vmatpush.bf16.msrb.mxu1 %v3867_v27  ;;  %v4006_v27 = vld [vmem:[#allocation2 + $0x1e0] sm:$0xf] }
 0x139   :  { %v1898_v56 = vpop.f32.mrf.mxu2  ;;  %v4007_v36 = vor.u32 %v4401_v31, %v4006_v27  ;;  %v3968_v27 = vld [vmem:[#allocation2 + $0x198] sm:$0xf0] }
 0x13a   :  { %2548 = vmatpush.bf16.msrb.mxu2 %v3931_v60  ;;  %v1911_v8 = vpop.f32.mrf.mxu3  ;;  %v4389_v60 = vld [vmem:[#allocation2 + $0x184] sm:$0xf0]  ;;  %v4398_v56 = vld [vmem:[#allocation2 + $0x1d4] sm:$0xf] }
 0x13b   :  { %2523 = vmatpush.bf16.msrb.mxu0 %v3795_v43  ;;  %2507 = vmatpush.bf16.msra.mxu3 %v4007_v36  ;;  %v4397_v43 = vld [vmem:[#allocation2 + $0x1c4] sm:$0xf0]  ;;  %v3959_v17 = vor.u32 %v4389_v60, %v3958_v59  ;;  %v4388_v36 = vld [vmem:[#allocation2 + $0x184] sm:$0xf] }
 0x13c   :  { %2536 = vmatpush.bf16.msrb.mxu1 %v3859_v44 }
 0x13e   :  { %2549 = vmatpush.bf16.msrb.mxu2 %v3923_v4  ;;  %v4000_v4 = vld [vmem:[#allocation2 + $0x1d8] sm:$0xf0] }
 0x13f   :  { %2524 = vmatpush.bf16.msrb.mxu0 %v3787_v32  ;;  %2508 = vmatpush.bf16.msra.mxu3 %v3999_v41  ;;  %v3974_v32 = vld [vmem:[#allocation2 + $0x1a0] sm:$0xf]  ;;  %v4003_v5 = vor.u32 %v4398_v56, %v4000_v4  ;;  %v4408_v4 = vld [vmem:[%s6214_s6 + $0x20] sm:$0xff] }
 0x140   :  { %2537 = vmatpush.bf16.msrb.mxu1 %v3851_v51  ;;  %v4393_v51 = vld [vmem:[#allocation2 + $0x1a4] sm:$0xf0] }
 0x141   :  { %v3975_v55 = vor.u32 %v4393_v51, %v3974_v32  ;;  %v2141_v32 = vld [vmem:[%s6213_s5] sm:$0x3] }
 0x142   :  { %2550 = vmatpush.bf16.msrb.mxu2 %v3915_v13  ;;  %v3984_v13 = vld [vmem:[#allocation2 + $0x1b8] sm:$0xf0]  ;;  %v2143_v51 = vperm.slane %v2141_v32, 0 }
 0x143   :  { %2525 = vmatpush.bf16.msrb.mxu0 %v3779_v61  ;;  %v4402_v61 = vld [vmem:[#allocation2 + $0x1f4] sm:$0xf]  ;;  %v3987_v29 = vor.u32 %v4394_v12, %v3984_v13  ;;  %v4416_v12 = vld [vmem:[%s6214_s6 + $0x60] sm:$0xff] }
 0x144   :  { %2538 = vmatpush.bf16.msrb.mxu1 %v3843_v22  ;;  %v4016_v22 = vld [vmem:[#allocation2 + $0x1f8] sm:$0xf0]  ;;  %v4415_v13 = vld [vmem:[%s6214_s6 + $0x58] sm:$0xff] }
 0x145   :  { %v4019_v62 = vor.u32 %v4402_v61, %v4016_v22 }
 0x146   :  { %2551 = vmatpush.bf16.msrb.mxu2 %v3907_v14  ;;  %v4392_v14 = vld [vmem:[#allocation2 + $0x1a4] sm:$0xf] }
 0x147   :  { %2526 = vmatpush.bf16.msrb.mxu0 %v3771_v30  ;;  %v1922_v33 = vpop.f32.mrf.mxu0  ;;  %v3979_v20 = vor.u32 %v4392_v14, %v3976_v15 }
 0x148   :  { %2539 = vmatpush.bf16.msrb.mxu1 %v3835_v6  ;;  %v1923_v39 = vadd.f32 %v1922_v33, %v1910_v25  ;;  %v1935_v40 = vpop.f32.mrf.mxu1  ;;  %v3995_v6 = vor.u32 %v4396_v10, %v3992_v28  ;;  %v4390_v25 = vld [vmem:[#allocation2 + $0x194] sm:$0xf] }
 0x149   :  { %v3971_v33 = vor.u32 %v4390_v25, %v3968_v27 }
 0x14a   :  { %2527 = vmatmul.bf16.vlgmr.msrb.gmra.mxu0 %v6141_v3  ;;  %2552 = vmatpush.bf16.msrb.mxu2 %v3899_v24  ;;  %v1936_v42 = vadd.f32 %v1935_v40, %v1923_v39  ;;  %v3990_v3 = vld [vmem:[#allocation2 + $0x1c0] sm:$0xf]  ;;  %v3963_v39 = vor.u32 %v4388_v36, %v3960_v37 }
 0x14b   :  { %2540 = vmatmul.bf16.vlgmr.msrb.gmra.mxu1 %v6139_v21  ;;  %v3991_v44 = vor.u32 %v4397_v43, %v3990_v3  ;;  %2707 = vmatpush.bf16.msra.mxu0 %v4411_v63 }
 0x14c   :  { %2720 = vmatpush.bf16.msra.mxu1 %v4419_v16 }
 0x14d   :  { %2509 = vmatpush.bf16.msra.mxu3 %v3991_v44 }
 0x14f   :  { %v1924_v23 = vpop.f32.mrf.mxu0 }
 0x150   :  { %v1937_v48 = vpop.f32.mrf.mxu1 }
 0x151   :  { %v1948_v21 = vpop.f32.mrf.mxu2  ;;  %2510 = vmatpush.bf16.msra.mxu3 %v3983_v49 }
 0x152   :  { %v1949_v7 = vadd.f32 %v1948_v21, %v1936_v42  ;;  %v1961_v18 = vpop.f32.mrf.mxu3 }
 0x154   :  { %v1962_v47 = vadd.f32 %v1961_v18, %v1949_v7 }
 0x155   :  { %2511 = vmatpush.bf16.msra.mxu3 %v3975_v55 }
 0x156   :  { %v2071_v50 = vmax.f32 %v1962_v47, 0.0 }
 0x158   :  { %v2075_v53 = vpack.c.bf16 %v2071_v50, %v2071_v50 }
 0x159   :  { %v1950_v54 = vpop.f32.mrf.mxu2  ;;  %2512 = vmatpush.bf16.msra.mxu3 %v3967_v52  ;;  %v2144_v52 = vperm.slane %v2141_v32, 1 }
 0x15a   :  { %2501 = vmatmul.bf16.vlgmr.msra.gmra.mxu2 %v2075_v53  ;;  %v1963_v57 = vpop.f32.mrf.mxu3 }
 0x15d   :  { %2513 = vmatpush.bf16.msra.mxu3 %v3959_v17 }
 0x161   :  { %2558 = vmatpush.bf16.msrb.mxu3 %v4019_v62 }
 0x165   :  { %2559 = vmatpush.bf16.msrb.mxu3 %v4011_v1  ;;  %v4418_v1 = vld [vmem:[%s6214_s6 + $0x70] sm:$0xff] }
 0x166   :  { %2721 = vmatpush.bf16.msra.mxu1 %v4418_v1 }
 0x167   :  { %v1974_v0 = vpop.f32.mrf.mxu0 }
 0x168   :  { %v1987_v2 = vpop.f32.mrf.mxu1  ;;  %v1975_v31 = vadd.f32 %v1974_v0, %v368_v35  ;;  %v4410_v0 = vld [vmem:[%s6214_s6 + $0x30] sm:$0xff]  ;;  %v4412_v35 = vld [vmem:[%s6214_s6 + $0x40] sm:$0xff] }
 0x169   :  { %2560 = vmatpush.bf16.msrb.mxu3 %v4003_v5  ;;  %2708 = vmatpush.bf16.msra.mxu0 %v4410_v0  ;;  %v4407_v5 = vld [vmem:[%s6214_s6 + $0x18] sm:$0xff] }
 0x16a   :  { %2553 = vmatmul.bf16.vlgmr.msrb.gmra.mxu2 %v2075_v53  ;;  %v1988_v38 = vadd.f32 %v1987_v2, %v1975_v31  ;;  %v4409_v2 = vld [vmem:[%s6214_s6 + $0x28] sm:$0xff] }
 0x16d   :  { %2561 = vmatpush.bf16.msrb.mxu3 %v3995_v6  ;;  %2709 = vmatpush.bf16.msra.mxu0 %v4409_v2  ;;  %v4417_v6 = vld [vmem:[%s6214_s6 + $0x68] sm:$0xff] }
 0x16e   :  { %2722 = vmatpush.bf16.msra.mxu1 %v4417_v6 }
 0x16f   :  { %v1976_v30 = vpop.f32.mrf.mxu0 }
 0x170   :  { %v1989_v11 = vpop.f32.mrf.mxu1  ;;  %v4405_v30 = vld [vmem:[%s6214_s6 + $0x8] sm:$0xff] }
 0x171   :  { %v2000_v8 = vpop.f32.mrf.mxu2  ;;  %2562 = vmatpush.bf16.msrb.mxu3 %v3987_v29  ;;  %2710 = vmatpush.bf16.msra.mxu0 %v4408_v4  ;;  %v4404_v11 = vld [vmem:[%s6214_s6] sm:$0xff]  ;;  %v4414_v29 = vld [vmem:[%s6214_s6 + $0x50] sm:$0xff] }
 0x172   :  { %v2013_v9 = vpop.f32.mrf.mxu3  ;;  %v2001_v40 = vadd.f32 %v2000_v8, %v1988_v38  ;;  %2723 = vmatpush.bf16.msra.mxu1 %v4416_v12 }
 0x174   :  { %v2014_v41 = vadd.f32 %v2013_v9, %v2001_v40  ;;  %v4406_v9 = vld [vmem:[%s6214_s6 + $0x10] sm:$0xff] }
 0x175   :  { %2563 = vmatpush.bf16.msrb.mxu3 %v3979_v20  ;;  %2711 = vmatpush.bf16.msra.mxu0 %v4407_v5 }
 0x176   :  { %2724 = vmatpush.bf16.msra.mxu1 %v4415_v13 }
 0x179   :  { %v2002_v19 = vpop.f32.mrf.mxu2  ;;  %2564 = vmatpush.bf16.msrb.mxu3 %v3971_v33  ;;  %2712 = vmatpush.bf16.msra.mxu0 %v4406_v9 }
 0x17a   :  { %v2015_v24 = vpop.f32.mrf.mxu3  ;;  %2725 = vmatpush.bf16.msra.mxu1 %v4414_v29 }
 0x17d   :  { %2565 = vmatpush.bf16.msrb.mxu3 %v3963_v39  ;;  %2713 = vmatpush.bf16.msra.mxu0 %v4405_v30 }
 0x17e   :  { %2726 = vmatpush.bf16.msra.mxu1 %v4413_v34 }
 0x181   :  { %2714 = vmatpush.bf16.msra.mxu0 %v4404_v11 }
 0x182   :  { %2727 = vmatpush.bf16.msra.mxu1 %v4412_v35 }
 0x187   :  { %v2026_v42 = vpop.f32.mrf.mxu0 }
 0x188   :  { %v2039_v3 = vpop.f32.mrf.mxu1  ;;  %v2027_v43 = vadd.f32 %v2026_v42, %v2014_v41  ;;  %v4423_v41 = vld [vmem:[%s6215_s7] ss:$0 sm:$0xff] }
 0x18a   :  { %v2040_v21 = vadd.f32 %v2039_v3, %v2027_v43 }
 0x18f   :  { %v2028_v45 = vpop.f32.mrf.mxu0 }
 0x190   :  { %v2052_v44 = vpop.f32.mrf.mxu2  ;;  %v2041_v46 = vpop.f32.mrf.mxu1 }
 0x191   :  { %v2053_v18 = vadd.f32 %v2052_v44, %v2040_v21 }
 0x192   :  { %v2065_v7 = vpop.f32.mrf.mxu3 }
 0x193   :  { %v2066_v23 = vadd.f32 %v2065_v7, %v2053_v18 }
 0x195   :  { %v2072_v47 = vmax.f32 %v2066_v23, 0.0 }
 0x197   :  { %v2076_v48 = vpack.c.bf16 %v2072_v47, %v2072_v47 }
 0x198   :  { %v2054_v49 = vpop.f32.mrf.mxu2 }
 0x199   :  { %2514 = vmatmul.bf16.vlgmr.msra.gmra.mxu3 %v2076_v48 }
 0x19a   :  { %v2067_v50 = vpop.f32.mrf.mxu3 }
 0x1a7   :  { %v2476_v53 = vpop.f32.mrf.mxu0 }
 0x1a8   :  { %v2489_v54 = vpop.f32.mrf.mxu1  ;;  %v2477_v55 = vadd.f32 %v2476_v53, %v2143_v51 }
 0x1a9   :  { %2566 = vmatmul.bf16.vlgmr.msrb.gmra.mxu3 %v2076_v48 }
 0x1aa   :  { %v2490_v57 = vadd.f32 %v2489_v54, %v2477_v55 }
 0x1af   :  { %v2478_v58 = vpop.f32.mrf.mxu0 }
 0x1b0   :  { %v2491_v26 = vpop.f32.mrf.mxu1 }
 0x1c7   :  { %v2528_v59 = vpop.f32.mrf.mxu0 }
 0x1c8   :  { %v2541_v60 = vpop.f32.mrf.mxu1  ;;  %v2529_v17 = vadd.f32 %v2528_v59, %v2144_v52 }
 0x1ca   :  { %v2542_v61 = vadd.f32 %v2541_v60, %v2529_v17 }
 0x1cf   :  { %v2530_v22 = vpop.f32.mrf.mxu0 }
 0x1d0   :  { %v2543_v62 = vpop.f32.mrf.mxu1 }
 0x1dd   :  { %v2502_v56 = vpop.f32.mrf.mxu2 }
 0x1de   :  { %v2503_v14 = vadd.f32 %v2502_v56, %v2490_v57 }
 0x1e5   :  { %v2504_v8 = vpop.f32.mrf.mxu2 }
 0x1ed   :  { %v2554_v10 = vpop.f32.mrf.mxu2 }
 0x1ee   :  { %v2555_v27 = vadd.f32 %v2554_v10, %v2542_v61 }
 0x1f5   :  { %v2556_v28 = vpop.f32.mrf.mxu2 }
 0x21c   :  { %v2515_v15 = vpop.f32.mrf.mxu3 }
 0x21d   :  { %v2516_v19 = vadd.f32 %v2515_v15, %v2503_v14 }
 0x21f   :  { %v2571_v20 = vmax.f32 %v2516_v19, 0.0 }
 0x221   :  { %v2573_v24 = vpack.c.bf16 %v2571_v20, %v2571_v20 }
 0x223   :  { %2715 = vmatmul.bf16.vlgmr.msra.gmra.mxu0 %v2573_v24 }
 0x224   :  { %v2517_v25 = vpop.f32.mrf.mxu3 }
 0x22c   :  { %v2567_v31 = vpop.f32.mrf.mxu3 }
 0x22d   :  { %v2568_v33 = vadd.f32 %v2567_v31, %v2555_v27 }
 0x22f   :  { %v2572_v36 = vmax.f32 %v2568_v33, 0.0 }
 0x231   :  { %v2574_v37 = vpack.c.bf16 %v2572_v36, %v2572_v36 }
 0x233   :  { %2728 = vmatmul.bf16.vlgmr.msra.gmra.mxu1 %v2574_v37 }
 0x234   :  { %v2569_v38 = vpop.f32.mrf.mxu3 }
 0x2a0   :  { %v2716_v39 = vpop.f32.mrf.mxu0 }
 0x2a1   :  { %v2717_v42 = vadd.f32 %v4423_v41, %v2716_v39 }
 0x2a8   :  { %v2718_v40 = vpop.f32.mrf.mxu0 }
 0x2b0   :  { %v2729_v3 = vpop.f32.mrf.mxu1 }
 0x2b1   :  { %v2730_v43 = vadd.f32 %v2729_v3, %v2717_v42 }
 0x2b3   :  { %2734 = vst.msk [vmem:[%s6216_s8] sm:$0x3] %vm2733_vm3, %v2730_v43 }
 0x2b8   :  { %v2731_v21 = vpop.f32.mrf.mxu1 }
 0x2b9   :  { %2739 = vsyncpa [#allocation3], 1 }

</bundles_post_ra>
